<compile_context>
chip_gen: v5e
topology: v5e:2x2
jax: 0.10.0
libtpu: 0.0.40
codegen_flags: <defaults>
</compile_context>

<pallas_src>
import jax
import jax.numpy as jnp
import numpy as np
from jax.experimental import pallas as pl
from jax.experimental.pallas import tpu as pltpu

EPS = 1e-5


# ---------------------------------------------------------------------------
# Fused Bottleneck3D kernel: one (H*W, C) depth plane per grid step.
# ---------------------------------------------------------------------------
def make_bottleneck_kernel(W, HW, PAD):
    """W: plane width, HW: H*W rows per plane, PAD: sublane-aligned halo rows."""

    def kernel(xm_ref, x0_ref, xp_ref,
               w1_ref, w2_ref, w3_ref, w4_ref, w5_ref,
               b1_ref, b2_ref, b3_ref, b4_ref, b5_ref,
               mwl_ref, mwr_ref,
               o_ref, pad_ref):
        f32 = jnp.float32
        P = w1_ref.shape[1]                       # planes

        w1, w2, w3 = w1_ref[...], w2_ref[...], w3_ref[...]
        w4, w5 = w4_ref[...], w5_ref[...]
        b1, b2, b3 = b1_ref[...], b2_ref[...], b3_ref[...]
        b4, b5 = b4_ref[...], b5_ref[...]
        mwl, mwr = mwl_ref[...], mwr_ref[...]     # (HW, 1) 0/1 masks for W boundaries

        # Zero the scratch borders once per step; the plane data always lands in rows
        # [PAD, PAD+HW), so the borders stay zero and provide the conv zero padding.
        zeros_pad = jnp.zeros((PAD, P), f32)
        pad_ref[pl.ds(0, PAD), :] = zeros_pad
        pad_ref[pl.ds(PAD + HW, PAD), :] = zeros_pad

        def shifted(val, shift):
            """Stage `val` once, read the -shift / +shift row windows back."""
            pad_ref[pl.ds(PAD, HW), :] = val
            lo = pad_ref[pl.ds(PAD - shift, HW), :]   # row r -> val[r - shift]
            hi = pad_ref[pl.ds(PAD + shift, HW), :]   # row r -> val[r + shift]
            return lo, hi

        def conv123(x2d):
            """conv1+bn1+relu -> conv2(1,1,3)+bn2 -> conv3(1,3,1)+bn3 (+out2)."""
            out1 = jnp.maximum(jnp.dot(x2d, w1, preferred_element_type=f32) + b1, 0.0)

            # conv2: three W-taps stacked on the contraction axis -> one matmul.
            lo, hi = shifted(out1, 1)
            cat2 = jnp.concatenate([lo * mwl, out1, hi * mwr], axis=-1)
            out2 = jnp.dot(cat2, w2, preferred_element_type=f32) + b2

            # conv3: ReLU once, three H-taps (row shift of +-W; zero borders pad H).
            r2 = jnp.maximum(out2, 0.0)
            lo, hi = shifted(r2, W)
            cat3 = jnp.concatenate([lo, r2, hi], axis=-1)
            out3 = jnp.dot(cat3, w3, preferred_element_type=f32) + b3 + out2
            return out2, out3

        x0 = x0_ref[...]
        out2_c, out3_c = conv123(x0)
        _, out3_m = conv123(xm_ref[...])   # halo plane d-1 (recomputed, stays in VMEM)
        _, out3_p = conv123(xp_ref[...])   # halo plane d+1

        # conv4 (3,1,1): taps are the neighbouring planes' relu(out3); zero at D edges.
        d = pl.program_id(1)
        nd = pl.num_programs(1)
        m_edge = (d > 0).astype(f32)
        p_edge = (d < nd - 1).astype(f32)
        cat4 = jnp.concatenate([jnp.maximum(out3_m, 0.0) * m_edge,
                                jnp.maximum(out3_c, 0.0),
                                jnp.maximum(out3_p, 0.0) * p_edge], axis=-1)
        out4 = jnp.dot(cat4, w4, preferred_element_type=f32) + b4 + out2_c + out3_c

        # conv5 (1x1x1) + bn5 + residual + relu (lane-dense store, cout = cin).
        out5 = (jnp.dot(jnp.maximum(out4, 0.0), w5, preferred_element_type=f32)
                + b5 + x0)
        o_ref[...] = jnp.maximum(out5, 0.0)

    return kernel


# ---------------------------------------------------------------------------
# JAX glue: layout, BN folding, BlockSpecs
# ---------------------------------------------------------------------------
def _fold_bn(gamma, beta, mean, var):
    scale = gamma / jnp.sqrt(var + EPS)
    bias = beta - mean * scale
    return scale.reshape(1, -1), bias.reshape(1, -1)


def bottleneck3d_forward(x_ncdhw, params):
    # NCDHW -> NDHWC -> (N, D, H*W, C): channels on the lane axis.
    x = jnp.transpose(x_ncdhw, (0, 2, 3, 4, 1)).astype(jnp.float32)
    N, D, H, W, cin = x.shape
    planes = params["conv1"].shape[0]
    cout = params["conv5"].shape[0]
    assert cin == cout, "residual add requires inplanes == planes * expansion"
    HW = H * W
    PAD = max(8, ((W + 7) // 8) * 8)          # sublane-aligned halo for the scratch
    x4 = x.reshape(N, D, HW, cin)

    # Fold the (inference) BN scale into the conv weights; stack the 3-tap weights
    # along K so each spatial conv is a single (HW, 3P) @ (3P, P) matmul.
    s1, b1 = _fold_bn(*params["bn1"])
    s2, b2 = _fold_bn(*params["bn2"])
    s3, b3 = _fold_bn(*params["bn3"])
    s4, b4 = _fold_bn(*params["bn4"])
    s5, b5 = _fold_bn(*params["bn5"])
    w1 = params["conv1"][:, :, 0, 0, 0].T * s1                                      # (cin, P)
    w2 = jnp.concatenate([params["conv2"][:, :, 0, 0, k].T for k in range(3)], 0) * s2
    w3 = jnp.concatenate([params["conv3"][:, :, 0, k, 0].T for k in range(3)], 0) * s3
    w4 = jnp.concatenate([params["conv4"][:, :, k, 0, 0].T for k in range(3)], 0) * s4
    w5 = params["conv5"][:, :, 0, 0, 0].T * s5                                      # (P, cout)

    # 0/1 masks that zero the W-direction taps crossing a row boundary.
    w_pos = np.arange(HW) % W
    mask_wl = jnp.asarray((w_pos > 0).astype(np.float32).reshape(HW, 1))
    mask_wr = jnp.asarray((w_pos < W - 1).astype(np.float32).reshape(HW, 1))

    consts = (w1, w2, w3, w4, w5, b1, b2, b3, b4, b5, mask_wl, mask_wr)

    plane_block = (None, None, HW, cin)
    xm_spec = pl.BlockSpec(plane_block, lambda n, d: (n, jnp.maximum(d - 1, 0), 0, 0))
    x0_spec = pl.BlockSpec(plane_block, lambda n, d: (n, d, 0, 0))
    xp_spec = pl.BlockSpec(plane_block, lambda n, d: (n, jnp.minimum(d + 1, D - 1), 0, 0))
    out_spec = pl.BlockSpec((None, None, HW, cout), lambda n, d: (n, d, 0, 0))

    def resident(arr):  # weights / biases / masks: same block every step -> stay in VMEM
        return pl.BlockSpec(arr.shape, lambda n, d: (0,) * arr.ndim)

    flops_plane = 2 * HW * cin * planes + 2 * 2 * HW * (3 * planes) * planes
    step_flops = (3 * flops_plane + 2 * HW * (3 * planes) * planes
                  + 2 * HW * planes * cout)
    bytes_acc = 4 * (N * D * HW * (3 * cin + cout)
                     + sum(int(np.prod(c.shape)) for c in consts))

    out4d = pl.pallas_call(
        make_bottleneck_kernel(W, HW, PAD),
        out_shape=jax.ShapeDtypeStruct((N, D, HW, cout), jnp.float32),
        grid=(N, D),
        in_specs=[xm_spec, x0_spec, xp_spec] + [resident(c) for c in consts],
        out_specs=out_spec,
        scratch_shapes=[pltpu.VMEM((HW + 2 * PAD, planes), jnp.float32)],
        compiler_params=pltpu.CompilerParams(
            dimension_semantics=("parallel", "parallel")),
        cost_estimate=pl.CostEstimate(flops=int(N * D * step_flops),
                                      transcendentals=0,
                                      bytes_accessed=int(bytes_acc)),
    )(x4, x4, x4, *consts)

    return jnp.transpose(out4d.reshape(N, D, H, W, cout), (0, 4, 1, 2, 3))


# ---------------------------------------------------------------------------
# Parameters + pure-JAX reference (lax.conv) for a correctness check
# ---------------------------------------------------------------------------
def init_params(key, inplanes, planes, expansion):
    keys = jax.random.split(key, 5)

    def conv_w(k, co, ci, kd, kh, kw):
        return jax.random.normal(k, (co, ci, kd, kh, kw), jnp.float32) * 0.05

    params = {
        "conv1": conv_w(keys[0], planes, inplanes, 1, 1, 1),
        "conv2": conv_w(keys[1], planes, planes, 1, 1, 3),
        "conv3": conv_w(keys[2], planes, planes, 1, 3, 1),
        "conv4": conv_w(keys[3], planes, planes, 3, 1, 1),
        "conv5": conv_w(keys[4], planes * expansion, planes, 1, 1, 1),
    }

    def bn(c, i):
        ar = jnp.arange(c, dtype=jnp.float32) / c
        gamma = 1.0 + 0.2 * ar + 0.01 * i
        beta = 0.1 * ar - 0.02 * i
        mean = 0.05 * ar - 0.01 * i
        var = 1.0 + 0.3 * ar + 0.01 * i
        return gamma, beta, mean, var

    for i, c in enumerate([planes, planes, planes, planes, planes * expansion], start=1):
        params[f"bn{i}"] = bn(c, i)
    return params


def reference_forward(x_ncdhw, params):
    x = x_ncdhw.astype(jnp.float32)

    def conv(inp, w, padding):
        return jax.lax.conv_general_dilated(
            inp, w, window_strides=(1, 1, 1), padding=padding,
            dimension_numbers=("NCDHW", "OIDHW", "NCDHW"),
            precision=jax.lax.Precision.HIGHEST)

    def bn(inp, name):
        gamma, beta, mean, var = params[name]
        sh = (1, -1, 1, 1, 1)
        return ((inp - mean.reshape(sh)) / jnp.sqrt(var.reshape(sh) + EPS)
                * gamma.reshape(sh) + beta.reshape(sh))

    relu = lambda t: jnp.maximum(t, 0.0)
    residual = x
    out1 = relu(bn(conv(x, params["conv1"], [(0, 0), (0, 0), (0, 0)]), "bn1"))
    out2 = bn(conv(out1, params["conv2"], [(0, 0), (0, 0), (1, 1)]), "bn2")
    out3 = bn(conv(relu(out2), params["conv3"], [(0, 0), (1, 1), (0, 0)]), "bn3") + out2
    out4 = (bn(conv(relu(out3), params["conv4"], [(1, 1), (0, 0), (0, 0)]), "bn4")
            + out2 + out3)
    out5 = bn(conv(relu(out4), params["conv5"], [(0, 0), (0, 0), (0, 0)]), "bn5")
    return relu(out5 + residual)


if __name__ == "__main__":
    key = jax.random.PRNGKey(0)
    k_x, k_p = jax.random.split(key)

    # Lane-dense channel counts (feedback: C >= 128) at small spatial extents.
    planes, expansion = 128, 4
    inplanes = planes * expansion      # residual add requires inplanes == planes*expansion
    N, D, H, W = 2, 4, 8, 8

    x = jax.random.normal(k_x, (N, inplanes, D, H, W), jnp.float32)
    params = init_params(k_p, inplanes, planes, expansion)

    fwd = jax.jit(lambda xx: bottleneck3d_forward(xx, params))
    out = jax.block_until_ready(fwd(x))

    ref = reference_forward(x, params)
    np.testing.assert_allclose(np.asarray(out), np.asarray(ref), rtol=4e-2, atol=4e-2)

    print("KERNEL_OK")
</pallas_src>

<mosaic_0001>
module attributes {stable_mosaic.version = 11 : i64} {
  func.func @kernel(%arg0: i32, %arg1: i32, %arg2: memref<1x1x64x512xf32, #tpu.memory_space<vmem>>, %arg3: memref<1x1x64x512xf32, #tpu.memory_space<vmem>>, %arg4: memref<1x1x64x512xf32, #tpu.memory_space<vmem>>, %arg5: memref<512x128xf32, #tpu.memory_space<vmem>>, %arg6: memref<384x128xf32, #tpu.memory_space<vmem>>, %arg7: memref<384x128xf32, #tpu.memory_space<vmem>>, %arg8: memref<384x128xf32, #tpu.memory_space<vmem>>, %arg9: memref<128x512xf32, #tpu.memory_space<vmem>>, %arg10: memref<1x128xf32, #tpu.memory_space<vmem>>, %arg11: memref<1x128xf32, #tpu.memory_space<vmem>>, %arg12: memref<1x128xf32, #tpu.memory_space<vmem>>, %arg13: memref<1x128xf32, #tpu.memory_space<vmem>>, %arg14: memref<1x512xf32, #tpu.memory_space<vmem>>, %arg15: memref<64x1xf32, #tpu.memory_space<vmem>>, %arg16: memref<64x1xf32, #tpu.memory_space<vmem>>, %arg17: memref<1x1x64x512xf32, #tpu.memory_space<vmem>>, %arg18: memref<80x128xf32, #tpu.memory_space<vmem>>) attributes {dimension_semantics = [#tpu.dimension_semantics<parallel>, #tpu.dimension_semantics<parallel>], iteration_bounds = array<i64: 2, 4>, scalar_prefetch = 0 : i64, scratch_operands = 1 : i64, tpu.core_type = #tpu.core_type<tc>, window_params = [{transform_indices = @transform_0, window_bounds = array<i64: 1, 1, 64, 512>}, {transform_indices = @transform_1, window_bounds = array<i64: 1, 1, 64, 512>}, {transform_indices = @transform_2, window_bounds = array<i64: 1, 1, 64, 512>}, {pipeline_mode = #tpu.pipeline_mode<synchronous>, transform_indices = @transform_3, window_bounds = array<i64: 512, 128>}, {pipeline_mode = #tpu.pipeline_mode<synchronous>, transform_indices = @transform_4, window_bounds = array<i64: 384, 128>}, {pipeline_mode = #tpu.pipeline_mode<synchronous>, transform_indices = @transform_5, window_bounds = array<i64: 384, 128>}, {pipeline_mode = #tpu.pipeline_mode<synchronous>, transform_indices = @transform_6, window_bounds = array<i64: 384, 128>}, {pipeline_mode = #tpu.pipeline_mode<synchronous>, transform_indices = @transform_7, window_bounds = array<i64: 128, 512>}, {pipeline_mode = #tpu.pipeline_mode<synchronous>, transform_indices = @transform_8, window_bounds = array<i64: 1, 128>}, {pipeline_mode = #tpu.pipeline_mode<synchronous>, transform_indices = @transform_9, window_bounds = array<i64: 1, 128>}, {pipeline_mode = #tpu.pipeline_mode<synchronous>, transform_indices = @transform_10, window_bounds = array<i64: 1, 128>}, {pipeline_mode = #tpu.pipeline_mode<synchronous>, transform_indices = @transform_11, window_bounds = array<i64: 1, 128>}, {pipeline_mode = #tpu.pipeline_mode<synchronous>, transform_indices = @transform_12, window_bounds = array<i64: 1, 512>}, {pipeline_mode = #tpu.pipeline_mode<synchronous>, transform_indices = @transform_13, window_bounds = array<i64: 64, 1>}, {pipeline_mode = #tpu.pipeline_mode<synchronous>, transform_indices = @transform_14, window_bounds = array<i64: 64, 1>}, {transform_indices = @transform_15, window_bounds = array<i64: 1, 1, 64, 512>}]} {
    %c0 = arith.constant 0 : index
    %c0_0 = arith.constant 0 : index
    %0 = vector.load %arg5[%c0, %c0_0] : memref<512x128xf32, #tpu.memory_space<vmem>>, vector<512x128xf32>
    %c0_1 = arith.constant 0 : index
    %c0_2 = arith.constant 0 : index
    %1 = vector.load %arg6[%c0_1, %c0_2] : memref<384x128xf32, #tpu.memory_space<vmem>>, vector<384x128xf32>
    %c0_3 = arith.constant 0 : index
    %c0_4 = arith.constant 0 : index
    %2 = vector.load %arg7[%c0_3, %c0_4] : memref<384x128xf32, #tpu.memory_space<vmem>>, vector<384x128xf32>
    %c0_5 = arith.constant 0 : index
    %c0_6 = arith.constant 0 : index
    %3 = vector.load %arg8[%c0_5, %c0_6] : memref<384x128xf32, #tpu.memory_space<vmem>>, vector<384x128xf32>
    %c0_7 = arith.constant 0 : index
    %c0_8 = arith.constant 0 : index
    %4 = vector.load %arg9[%c0_7, %c0_8] : memref<128x512xf32, #tpu.memory_space<vmem>>, vector<128x512xf32>
    %c0_9 = arith.constant 0 : index
    %c0_10 = arith.constant 0 : index
    %5 = vector.load %arg10[%c0_9, %c0_10] : memref<1x128xf32, #tpu.memory_space<vmem>>, vector<1x128xf32>
    %c0_11 = arith.constant 0 : index
    %c0_12 = arith.constant 0 : index
    %6 = vector.load %arg11[%c0_11, %c0_12] : memref<1x128xf32, #tpu.memory_space<vmem>>, vector<1x128xf32>
    %c0_13 = arith.constant 0 : index
    %c0_14 = arith.constant 0 : index
    %7 = vector.load %arg12[%c0_13, %c0_14] : memref<1x128xf32, #tpu.memory_space<vmem>>, vector<1x128xf32>
    %c0_15 = arith.constant 0 : index
    %c0_16 = arith.constant 0 : index
    %8 = vector.load %arg13[%c0_15, %c0_16] : memref<1x128xf32, #tpu.memory_space<vmem>>, vector<1x128xf32>
    %c0_17 = arith.constant 0 : index
    %c0_18 = arith.constant 0 : index
    %9 = vector.load %arg14[%c0_17, %c0_18] : memref<1x512xf32, #tpu.memory_space<vmem>>, vector<1x512xf32>
    %c0_19 = arith.constant 0 : index
    %c0_20 = arith.constant 0 : index
    %10 = vector.load %arg15[%c0_19, %c0_20] : memref<64x1xf32, #tpu.memory_space<vmem>>, vector<64x1xf32>
    %c0_21 = arith.constant 0 : index
    %c0_22 = arith.constant 0 : index
    %11 = vector.load %arg16[%c0_21, %c0_22] : memref<64x1xf32, #tpu.memory_space<vmem>>, vector<64x1xf32>
    %cst = arith.constant 0.000000e+00 : f32
    %12 = vector.broadcast %cst : f32 to vector<8x128xf32>
    %c0_23 = arith.constant 0 : index
    %c0_24 = arith.constant 0 : index
    %13 = vector.load %arg18[%c0_23, %c0_24] : memref<80x128xf32, #tpu.memory_space<vmem>>, vector<8x128xf32>
    tpu.vector_store %arg18[%c0_23, %c0_24], %12 {strides = array<i32>} : memref<80x128xf32, #tpu.memory_space<vmem>>, vector<8x128xf32>,
    %c72 = arith.constant 72 : index
    %c0_25 = arith.constant 0 : index
    %14 = vector.load %arg18[%c72, %c0_25] : memref<80x128xf32, #tpu.memory_space<vmem>>, vector<8x128xf32>
    tpu.vector_store %arg18[%c72, %c0_25], %12 {strides = array<i32>} : memref<80x128xf32, #tpu.memory_space<vmem>>, vector<8x128xf32>,
    %c0_26 = arith.constant 0 : index
    %c0_27 = arith.constant 0 : index
    %c0_28 = arith.constant 0 : index
    %c0_29 = arith.constant 0 : index
    %15 = vector.load %arg3[%c0_26, %c0_27, %c0_28, %c0_29] : memref<1x1x64x512xf32, #tpu.memory_space<vmem>>, vector<1x1x64x512xf32>
    %16 = vector.shape_cast %15 : vector<1x1x64x512xf32> to vector<64x512xf32>
    %cst_30 = arith.constant dense<0.000000e+00> : vector<64x128xf32>
    %17 = tpu.matmul %16, %0, %cst_30 {dimension_numbers = #tpu.dot_dimension_numbers<[1], [0], [0], [1], [0, 0, 1, 1], [], []>} : vector<64x512xf32>, vector<512x128xf32>, vector<64x128xf32> -> vector<64x128xf32>
    %18 = vector.broadcast %5 : vector<1x128xf32> to vector<64x128xf32>
    %19 = arith.addf %17, %18 : vector<64x128xf32>
    %cst_31 = arith.constant 0.000000e+00 : f32
    %20 = vector.broadcast %cst_31 : f32 to vector<64x128xf32>
    %21 = arith.maximumf %19, %20 : vector<64x128xf32>
    %c8 = arith.constant 8 : index
    %c0_32 = arith.constant 0 : index
    %22 = vector.load %arg18[%c8, %c0_32] : memref<80x128xf32, #tpu.memory_space<vmem>>, vector<64x128xf32>
    tpu.vector_store %arg18[%c8, %c0_32], %21 {strides = array<i32>} : memref<80x128xf32, #tpu.memory_space<vmem>>, vector<64x128xf32>,
    %c7 = arith.constant 7 : index
    %c0_33 = arith.constant 0 : index
    %23 = vector.load %arg18[%c7, %c0_33] : memref<80x128xf32, #tpu.memory_space<vmem>>, vector<64x128xf32>
    %c9 = arith.constant 9 : index
    %c0_34 = arith.constant 0 : index
    %24 = vector.load %arg18[%c9, %c0_34] : memref<80x128xf32, #tpu.memory_space<vmem>>, vector<64x128xf32>
    %25 = vector.broadcast %10 : vector<64x1xf32> to vector<64x128xf32>
    %26 = arith.mulf %23, %25 : vector<64x128xf32>
    %27 = vector.broadcast %11 : vector<64x1xf32> to vector<64x128xf32>
    %28 = arith.mulf %24, %27 : vector<64x128xf32>
    %29 = tpu.concatenate %26, %21, %28 in 1 : vector<64x128xf32>, vector<64x128xf32>, vector<64x128xf32> -> vector<64x384xf32>
    %cst_35 = arith.constant dense<0.000000e+00> : vector<64x128xf32>
    %30 = tpu.matmul %29, %1, %cst_35 {dimension_numbers = #tpu.dot_dimension_numbers<[1], [0], [0], [1], [0, 0, 1, 1], [], []>} : vector<64x384xf32>, vector<384x128xf32>, vector<64x128xf32> -> vector<64x128xf32>
    %31 = vector.broadcast %6 : vector<1x128xf32> to vector<64x128xf32>
    %32 = arith.addf %30, %31 : vector<64x128xf32>
    %cst_36 = arith.constant 0.000000e+00 : f32
    %33 = vector.broadcast %cst_36 : f32 to vector<64x128xf32>
    %34 = arith.maximumf %32, %33 : vector<64x128xf32>
    %c8_37 = arith.constant 8 : index
    %c0_38 = arith.constant 0 : index
    %35 = vector.load %arg18[%c8_37, %c0_38] : memref<80x128xf32, #tpu.memory_space<vmem>>, vector<64x128xf32>
    tpu.vector_store %arg18[%c8_37, %c0_38], %34 {strides = array<i32>} : memref<80x128xf32, #tpu.memory_space<vmem>>, vector<64x128xf32>,
    %c0_39 = arith.constant 0 : index
    %c0_40 = arith.constant 0 : index
    %36 = vector.load %arg18[%c0_39, %c0_40] : memref<80x128xf32, #tpu.memory_space<vmem>>, vector<64x128xf32>
    %c16 = arith.constant 16 : index
    %c0_41 = arith.constant 0 : index
    %37 = vector.load %arg18[%c16, %c0_41] : memref<80x128xf32, #tpu.memory_space<vmem>>, vector<64x128xf32>
    %38 = tpu.concatenate %36, %34, %37 in 1 : vector<64x128xf32>, vector<64x128xf32>, vector<64x128xf32> -> vector<64x384xf32>
    %cst_42 = arith.constant dense<0.000000e+00> : vector<64x128xf32>
    %39 = tpu.matmul %38, %2, %cst_42 {dimension_numbers = #tpu.dot_dimension_numbers<[1], [0], [0], [1], [0, 0, 1, 1], [], []>} : vector<64x384xf32>, vector<384x128xf32>, vector<64x128xf32> -> vector<64x128xf32>
    %40 = vector.broadcast %7 : vector<1x128xf32> to vector<64x128xf32>
    %41 = arith.addf %39, %40 : vector<64x128xf32>
    %42 = arith.addf %41, %32 : vector<64x128xf32>
    %c0_43 = arith.constant 0 : index
    %c0_44 = arith.constant 0 : index
    %c0_45 = arith.constant 0 : index
    %c0_46 = arith.constant 0 : index
    %43 = vector.load %arg2[%c0_43, %c0_44, %c0_45, %c0_46] : memref<1x1x64x512xf32, #tpu.memory_space<vmem>>, vector<1x1x64x512xf32>
    %44 = vector.shape_cast %43 : vector<1x1x64x512xf32> to vector<64x512xf32>
    %cst_47 = arith.constant dense<0.000000e+00> : vector<64x128xf32>
    %45 = tpu.matmul %44, %0, %cst_47 {dimension_numbers = #tpu.dot_dimension_numbers<[1], [0], [0], [1], [0, 0, 1, 1], [], []>} : vector<64x512xf32>, vector<512x128xf32>, vector<64x128xf32> -> vector<64x128xf32>
    %46 = vector.broadcast %5 : vector<1x128xf32> to vector<64x128xf32>
    %47 = arith.addf %45, %46 : vector<64x128xf32>
    %cst_48 = arith.constant 0.000000e+00 : f32
    %48 = vector.broadcast %cst_48 : f32 to vector<64x128xf32>
    %49 = arith.maximumf %47, %48 : vector<64x128xf32>
    %c8_49 = arith.constant 8 : index
    %c0_50 = arith.constant 0 : index
    %50 = vector.load %arg18[%c8_49, %c0_50] : memref<80x128xf32, #tpu.memory_space<vmem>>, vector<64x128xf32>
    tpu.vector_store %arg18[%c8_49, %c0_50], %49 {strides = array<i32>} : memref<80x128xf32, #tpu.memory_space<vmem>>, vector<64x128xf32>,
    %c7_51 = arith.constant 7 : index
    %c0_52 = arith.constant 0 : index
    %51 = vector.load %arg18[%c7_51, %c0_52] : memref<80x128xf32, #tpu.memory_space<vmem>>, vector<64x128xf32>
    %c9_53 = arith.constant 9 : index
    %c0_54 = arith.constant 0 : index
    %52 = vector.load %arg18[%c9_53, %c0_54] : memref<80x128xf32, #tpu.memory_space<vmem>>, vector<64x128xf32>
    %53 = vector.broadcast %10 : vector<64x1xf32> to vector<64x128xf32>
    %54 = arith.mulf %51, %53 : vector<64x128xf32>
    %55 = vector.broadcast %11 : vector<64x1xf32> to vector<64x128xf32>
    %56 = arith.mulf %52, %55 : vector<64x128xf32>
    %57 = tpu.concatenate %54, %49, %56 in 1 : vector<64x128xf32>, vector<64x128xf32>, vector<64x128xf32> -> vector<64x384xf32>
    %cst_55 = arith.constant dense<0.000000e+00> : vector<64x128xf32>
    %58 = tpu.matmul %57, %1, %cst_55 {dimension_numbers = #tpu.dot_dimension_numbers<[1], [0], [0], [1], [0, 0, 1, 1], [], []>} : vector<64x384xf32>, vector<384x128xf32>, vector<64x128xf32> -> vector<64x128xf32>
    %59 = vector.broadcast %6 : vector<1x128xf32> to vector<64x128xf32>
    %60 = arith.addf %58, %59 : vector<64x128xf32>
    %cst_56 = arith.constant 0.000000e+00 : f32
    %61 = vector.broadcast %cst_56 : f32 to vector<64x128xf32>
    %62 = arith.maximumf %60, %61 : vector<64x128xf32>
    %c8_57 = arith.constant 8 : index
    %c0_58 = arith.constant 0 : index
    %63 = vector.load %arg18[%c8_57, %c0_58] : memref<80x128xf32, #tpu.memory_space<vmem>>, vector<64x128xf32>
    tpu.vector_store %arg18[%c8_57, %c0_58], %62 {strides = array<i32>} : memref<80x128xf32, #tpu.memory_space<vmem>>, vector<64x128xf32>,
    %c0_59 = arith.constant 0 : index
    %c0_60 = arith.constant 0 : index
    %64 = vector.load %arg18[%c0_59, %c0_60] : memref<80x128xf32, #tpu.memory_space<vmem>>, vector<64x128xf32>
    %c16_61 = arith.constant 16 : index
    %c0_62 = arith.constant 0 : index
    %65 = vector.load %arg18[%c16_61, %c0_62] : memref<80x128xf32, #tpu.memory_space<vmem>>, vector<64x128xf32>
    %66 = tpu.concatenate %64, %62, %65 in 1 : vector<64x128xf32>, vector<64x128xf32>, vector<64x128xf32> -> vector<64x384xf32>
    %cst_63 = arith.constant dense<0.000000e+00> : vector<64x128xf32>
    %67 = tpu.matmul %66, %2, %cst_63 {dimension_numbers = #tpu.dot_dimension_numbers<[1], [0], [0], [1], [0, 0, 1, 1], [], []>} : vector<64x384xf32>, vector<384x128xf32>, vector<64x128xf32> -> vector<64x128xf32>
    %68 = vector.broadcast %7 : vector<1x128xf32> to vector<64x128xf32>
    %69 = arith.addf %67, %68 : vector<64x128xf32>
    %70 = arith.addf %69, %60 : vector<64x128xf32>
    %c0_64 = arith.constant 0 : index
    %c0_65 = arith.constant 0 : index
    %c0_66 = arith.constant 0 : index
    %c0_67 = arith.constant 0 : index
    %71 = vector.load %arg4[%c0_64, %c0_65, %c0_66, %c0_67] : memref<1x1x64x512xf32, #tpu.memory_space<vmem>>, vector<1x1x64x512xf32>
    %72 = vector.shape_cast %71 : vector<1x1x64x512xf32> to vector<64x512xf32>
    %cst_68 = arith.constant dense<0.000000e+00> : vector<64x128xf32>
    %73 = tpu.matmul %72, %0, %cst_68 {dimension_numbers = #tpu.dot_dimension_numbers<[1], [0], [0], [1], [0, 0, 1, 1], [], []>} : vector<64x512xf32>, vector<512x128xf32>, vector<64x128xf32> -> vector<64x128xf32>
    %74 = vector.broadcast %5 : vector<1x128xf32> to vector<64x128xf32>
    %75 = arith.addf %73, %74 : vector<64x128xf32>
    %cst_69 = arith.constant 0.000000e+00 : f32
    %76 = vector.broadcast %cst_69 : f32 to vector<64x128xf32>
    %77 = arith.maximumf %75, %76 : vector<64x128xf32>
    %c8_70 = arith.constant 8 : index
    %c0_71 = arith.constant 0 : index
    %78 = vector.load %arg18[%c8_70, %c0_71] : memref<80x128xf32, #tpu.memory_space<vmem>>, vector<64x128xf32>
    tpu.vector_store %arg18[%c8_70, %c0_71], %77 {strides = array<i32>} : memref<80x128xf32, #tpu.memory_space<vmem>>, vector<64x128xf32>,
    %c7_72 = arith.constant 7 : index
    %c0_73 = arith.constant 0 : index
    %79 = vector.load %arg18[%c7_72, %c0_73] : memref<80x128xf32, #tpu.memory_space<vmem>>, vector<64x128xf32>
    %c9_74 = arith.constant 9 : index
    %c0_75 = arith.constant 0 : index
    %80 = vector.load %arg18[%c9_74, %c0_75] : memref<80x128xf32, #tpu.memory_space<vmem>>, vector<64x128xf32>
    %81 = vector.broadcast %10 : vector<64x1xf32> to vector<64x128xf32>
    %82 = arith.mulf %79, %81 : vector<64x128xf32>
    %83 = vector.broadcast %11 : vector<64x1xf32> to vector<64x128xf32>
    %84 = arith.mulf %80, %83 : vector<64x128xf32>
    %85 = tpu.concatenate %82, %77, %84 in 1 : vector<64x128xf32>, vector<64x128xf32>, vector<64x128xf32> -> vector<64x384xf32>
    %cst_76 = arith.constant dense<0.000000e+00> : vector<64x128xf32>
    %86 = tpu.matmul %85, %1, %cst_76 {dimension_numbers = #tpu.dot_dimension_numbers<[1], [0], [0], [1], [0, 0, 1, 1], [], []>} : vector<64x384xf32>, vector<384x128xf32>, vector<64x128xf32> -> vector<64x128xf32>
    %87 = vector.broadcast %6 : vector<1x128xf32> to vector<64x128xf32>
    %88 = arith.addf %86, %87 : vector<64x128xf32>
    %cst_77 = arith.constant 0.000000e+00 : f32
    %89 = vector.broadcast %cst_77 : f32 to vector<64x128xf32>
    %90 = arith.maximumf %88, %89 : vector<64x128xf32>
    %c8_78 = arith.constant 8 : index
    %c0_79 = arith.constant 0 : index
    %91 = vector.load %arg18[%c8_78, %c0_79] : memref<80x128xf32, #tpu.memory_space<vmem>>, vector<64x128xf32>
    tpu.vector_store %arg18[%c8_78, %c0_79], %90 {strides = array<i32>} : memref<80x128xf32, #tpu.memory_space<vmem>>, vector<64x128xf32>,
    %c0_80 = arith.constant 0 : index
    %c0_81 = arith.constant 0 : index
    %92 = vector.load %arg18[%c0_80, %c0_81] : memref<80x128xf32, #tpu.memory_space<vmem>>, vector<64x128xf32>
    %c16_82 = arith.constant 16 : index
    %c0_83 = arith.constant 0 : index
    %93 = vector.load %arg18[%c16_82, %c0_83] : memref<80x128xf32, #tpu.memory_space<vmem>>, vector<64x128xf32>
    %94 = tpu.concatenate %92, %90, %93 in 1 : vector<64x128xf32>, vector<64x128xf32>, vector<64x128xf32> -> vector<64x384xf32>
    %cst_84 = arith.constant dense<0.000000e+00> : vector<64x128xf32>
    %95 = tpu.matmul %94, %2, %cst_84 {dimension_numbers = #tpu.dot_dimension_numbers<[1], [0], [0], [1], [0, 0, 1, 1], [], []>} : vector<64x384xf32>, vector<384x128xf32>, vector<64x128xf32> -> vector<64x128xf32>
    %96 = vector.broadcast %7 : vector<1x128xf32> to vector<64x128xf32>
    %97 = arith.addf %95, %96 : vector<64x128xf32>
    %98 = arith.addf %97, %88 : vector<64x128xf32>
    %c0_i32 = arith.constant 0 : i32
    %99 = arith.cmpi sgt, %arg1, %c0_i32 : i32
    %100 = arith.extui %99 : i1 to i32
    %101 = arith.sitofp %100 : i32 to f32
    %c3_i32 = arith.constant 3 : i32
    %102 = arith.cmpi slt, %arg1, %c3_i32 : i32
    %103 = arith.extui %102 : i1 to i32
    %104 = arith.sitofp %103 : i32 to f32
    %cst_85 = arith.constant 0.000000e+00 : f32
    %105 = vector.broadcast %cst_85 : f32 to vector<64x128xf32>
    %106 = arith.maximumf %70, %105 : vector<64x128xf32>
    %107 = vector.broadcast %101 : f32 to vector<64x128xf32>
    %108 = arith.mulf %106, %107 : vector<64x128xf32>
    %cst_86 = arith.constant 0.000000e+00 : f32
    %109 = vector.broadcast %cst_86 : f32 to vector<64x128xf32>
    %110 = arith.maximumf %42, %109 : vector<64x128xf32>
    %cst_87 = arith.constant 0.000000e+00 : f32
    %111 = vector.broadcast %cst_87 : f32 to vector<64x128xf32>
    %112 = arith.maximumf %98, %111 : vector<64x128xf32>
    %113 = vector.broadcast %104 : f32 to vector<64x128xf32>
    %114 = arith.mulf %112, %113 : vector<64x128xf32>
    %115 = tpu.concatenate %108, %110, %114 in 1 : vector<64x128xf32>, vector<64x128xf32>, vector<64x128xf32> -> vector<64x384xf32>
    %cst_88 = arith.constant dense<0.000000e+00> : vector<64x128xf32>
    %116 = tpu.matmul %115, %3, %cst_88 {dimension_numbers = #tpu.dot_dimension_numbers<[1], [0], [0], [1], [0, 0, 1, 1], [], []>} : vector<64x384xf32>, vector<384x128xf32>, vector<64x128xf32> -> vector<64x128xf32>
    %117 = vector.broadcast %8 : vector<1x128xf32> to vector<64x128xf32>
    %118 = arith.addf %116, %117 : vector<64x128xf32>
    %119 = arith.addf %118, %32 : vector<64x128xf32>
    %120 = arith.addf %119, %42 : vector<64x128xf32>
    %cst_89 = arith.constant 0.000000e+00 : f32
    %121 = vector.broadcast %cst_89 : f32 to vector<64x128xf32>
    %122 = arith.maximumf %120, %121 : vector<64x128xf32>
    %cst_90 = arith.constant dense<0.000000e+00> : vector<64x512xf32>
    %123 = tpu.matmul %122, %4, %cst_90 {dimension_numbers = #tpu.dot_dimension_numbers<[1], [0], [0], [1], [0, 0, 1, 1], [], []>} : vector<64x128xf32>, vector<128x512xf32>, vector<64x512xf32> -> vector<64x512xf32>
    %124 = vector.broadcast %9 : vector<1x512xf32> to vector<64x512xf32>
    %125 = arith.addf %123, %124 : vector<64x512xf32>
    %126 = arith.addf %125, %16 : vector<64x512xf32>
    %cst_91 = arith.constant 0.000000e+00 : f32
    %127 = vector.broadcast %cst_91 : f32 to vector<64x512xf32>
    %128 = arith.maximumf %126, %127 : vector<64x512xf32>
    %c0_92 = arith.constant 0 : index
    %c0_93 = arith.constant 0 : index
    %c0_94 = arith.constant 0 : index
    %c0_95 = arith.constant 0 : index
    %129 = vector.load %arg17[%c0_92, %c0_93, %c0_94, %c0_95] : memref<1x1x64x512xf32, #tpu.memory_space<vmem>>, vector<1x1x64x512xf32>
    %130 = vector.shape_cast %129 : vector<1x1x64x512xf32> to vector<64x512xf32>
    %131 = vector.shape_cast %128 : vector<64x512xf32> to vector<1x1x64x512xf32>
    tpu.vector_store %arg17[%c0_92, %c0_93, %c0_94, %c0_95], %131 {strides = array<i32>} : memref<1x1x64x512xf32, #tpu.memory_space<vmem>>, vector<1x1x64x512xf32>,
    return
  }
  func.func @transform_0(%arg0: i32, %arg1: i32) -> (i32, i32, i32, i32) {
    %c1_i32 = arith.constant 1 : i32
    %0 = arith.subi %arg1, %c1_i32 : i32
    %c0_i32 = arith.constant 0 : i32
    %1 = arith.maxsi %0, %c0_i32 : i32
    %c0_i32_0 = arith.constant 0 : i32
    %c0_i32_1 = arith.constant 0 : i32
    %c0_i32_2 = arith.constant 0 : i32
    return %arg0, %1, %c0_i32_0, %c0_i32_1 : i32, i32, i32, i32
  }
  func.func @transform_1(%arg0: i32, %arg1: i32) -> (i32, i32, i32, i32) {
    %c0_i32 = arith.constant 0 : i32
    %c0_i32_0 = arith.constant 0 : i32
    %c0_i32_1 = arith.constant 0 : i32
    return %arg0, %arg1, %c0_i32, %c0_i32_0 : i32, i32, i32, i32
  }
  func.func @transform_2(%arg0: i32, %arg1: i32) -> (i32, i32, i32, i32) {
    %c1_i32 = arith.constant 1 : i32
    %0 = arith.addi %arg1, %c1_i32 : i32
    %c3_i32 = arith.constant 3 : i32
    %1 = arith.minsi %0, %c3_i32 : i32
    %c0_i32 = arith.constant 0 : i32
    %c0_i32_0 = arith.constant 0 : i32
    %c0_i32_1 = arith.constant 0 : i32
    return %arg0, %1, %c0_i32, %c0_i32_0 : i32, i32, i32, i32
  }
  func.func @transform_3(%arg0: i32, %arg1: i32) -> (i32, i32) {
    %c0_i32 = arith.constant 0 : i32
    %c0_i32_0 = arith.constant 0 : i32
    %c0_i32_1 = arith.constant 0 : i32
    return %c0_i32, %c0_i32_0 : i32, i32
  }
  func.func @transform_4(%arg0: i32, %arg1: i32) -> (i32, i32) {
    %c0_i32 = arith.constant 0 : i32
    %c0_i32_0 = arith.constant 0 : i32
    %c0_i32_1 = arith.constant 0 : i32
    return %c0_i32, %c0_i32_0 : i32, i32
  }
  func.func @transform_5(%arg0: i32, %arg1: i32) -> (i32, i32) {
    %c0_i32 = arith.constant 0 : i32
    %c0_i32_0 = arith.constant 0 : i32
    %c0_i32_1 = arith.constant 0 : i32
    return %c0_i32, %c0_i32_0 : i32, i32
  }
  func.func @transform_6(%arg0: i32, %arg1: i32) -> (i32, i32) {
    %c0_i32 = arith.constant 0 : i32
    %c0_i32_0 = arith.constant 0 : i32
    %c0_i32_1 = arith.constant 0 : i32
    return %c0_i32, %c0_i32_0 : i32, i32
  }
  func.func @transform_7(%arg0: i32, %arg1: i32) -> (i32, i32) {
    %c0_i32 = arith.constant 0 : i32
    %c0_i32_0 = arith.constant 0 : i32
    %c0_i32_1 = arith.constant 0 : i32
    return %c0_i32, %c0_i32_0 : i32, i32
  }
  func.func @transform_8(%arg0: i32, %arg1: i32) -> (i32, i32) {
    %c0_i32 = arith.constant 0 : i32
    %c0_i32_0 = arith.constant 0 : i32
    %c0_i32_1 = arith.constant 0 : i32
    return %c0_i32, %c0_i32_0 : i32, i32
  }
  func.func @transform_9(%arg0: i32, %arg1: i32) -> (i32, i32) {
    %c0_i32 = arith.constant 0 : i32
    %c0_i32_0 = arith.constant 0 : i32
    %c0_i32_1 = arith.constant 0 : i32
    return %c0_i32, %c0_i32_0 : i32, i32
  }
  func.func @transform_10(%arg0: i32, %arg1: i32) -> (i32, i32) {
    %c0_i32 = arith.constant 0 : i32
    %c0_i32_0 = arith.constant 0 : i32
    %c0_i32_1 = arith.constant 0 : i32
    return %c0_i32, %c0_i32_0 : i32, i32
  }
  func.func @transform_11(%arg0: i32, %arg1: i32) -> (i32, i32) {
    %c0_i32 = arith.constant 0 : i32
    %c0_i32_0 = arith.constant 0 : i32
    %c0_i32_1 = arith.constant 0 : i32
    return %c0_i32, %c0_i32_0 : i32, i32
  }
  func.func @transform_12(%arg0: i32, %arg1: i32) -> (i32, i32) {
    %c0_i32 = arith.constant 0 : i32
    %c0_i32_0 = arith.constant 0 : i32
    %c0_i32_1 = arith.constant 0 : i32
    return %c0_i32, %c0_i32_0 : i32, i32
  }
  func.func @transform_13(%arg0: i32, %arg1: i32) -> (i32, i32) {
    %c0_i32 = arith.constant 0 : i32
    %c0_i32_0 = arith.constant 0 : i32
    %c0_i32_1 = arith.constant 0 : i32
    return %c0_i32, %c0_i32_0 : i32, i32
  }
  func.func @transform_14(%arg0: i32, %arg1: i32) -> (i32, i32) {
    %c0_i32 = arith.constant 0 : i32
    %c0_i32_0 = arith.constant 0 : i32
    %c0_i32_1 = arith.constant 0 : i32
    return %c0_i32, %c0_i32_0 : i32, i32
  }
  func.func @transform_15(%arg0: i32, %arg1: i32) -> (i32, i32, i32, i32) {
    %c0_i32 = arith.constant 0 : i32
    %c0_i32_0 = arith.constant 0 : i32
    %c0_i32_1 = arith.constant 0 : i32
    return %arg0, %arg1, %c0_i32, %c0_i32_0 : i32, i32, i32, i32
  }
}

</mosaic_0001>

<bundles_post_ra>
// kernel: _lambda_.1
= control target key start
LH: loop header
LB: loop body
LE: loop exit
PB: predicated region body
PF: predicated region fallthrough
CT: control target
= control target key end

     0   :  { %s6425_s0 = inlined_call_operand.hbm [shape: f32[2,4,64,512], index: 0, kind: input, shape index: {}, may-alias: {0,1,2}]   ;;  %s6426_s1 = inlined_call_operand.hbm [shape: f32[2,4,64,512], index: 1, kind: input, shape index: {}, may-alias: {0,1,2}]   ;;  %s6427_s2 = inlined_call_operand.hbm [shape: f32[2,4,64,512], index: 2, kind: input, shape index: {}, may-alias: {0,1,2}]   ;;  %s6428_s3 = inlined_call_operand.hbm [shape: f32[512,128], index: 3, kind: input, shape index: {}]   ;;  %s6429_s4 = inlined_call_operand.hbm [shape: f32[384,128], index: 4, kind: input, shape index: {}]   ;;  %s6430_s5 = inlined_call_operand.hbm [shape: f32[384,128], index: 5, kind: input, shape index: {}]   ;;  %s6431_s6 = inlined_call_operand.hbm [shape: f32[384,128], index: 6, kind: input, shape index: {}]   ;;  %s6432_s7 = inlined_call_operand.hbm [shape: f32[128,512], index: 7, kind: input, shape index: {}]   ;;  %s6433_s8 = inlined_call_operand.vmem [shape: f32[1,128], index: 8, kind: input, shape index: {}]   ;;  %s6434_s9 = inlined_call_operand.vmem [shape: f32[1,128], index: 9, kind: input, shape index: {}]   ;;  %s6435_s10 = inlined_call_operand.vmem [shape: f32[1,128], index: 10, kind: input, shape index: {}]   ;;  %s6436_s11 = inlined_call_operand.hbm [shape: f32[1,128], index: 11, kind: input, shape index: {}]   ;;  %s6437_s12 = inlined_call_operand.hbm [shape: f32[1,512], index: 12, kind: input, shape index: {}]   ;;  %s6438_s13 = inlined_call_operand.hbm [shape: f32[64,1], index: 13, kind: input, shape index: {}]   ;;  %s6439_s14 = inlined_call_operand.hbm [shape: f32[64,1], index: 14, kind: input, shape index: {}]   ;;  %s6440_s15 = inlined_call_operand.hbm [shape: f32[2,4,64,512], index: 15, kind: output, shape index: {}]  }
   0x1   :  { %6592 = sst [smem:[#allocation131_spill]] %s6425_s0 }
   0x2   :  { %6593 = sst [smem:[#allocation132_spill]] %s6426_s1 }
   0x3   :  { %6594 = sst [smem:[#allocation133_spill]] %s6427_s2 }
   0x4   :  { %6595 = sst [smem:[#allocation134_spill]] %s6428_s3 }
   0x5   :  { %6596 = sst [smem:[#allocation135_spill]] %s6429_s4 }
   0x6   :  { %6597 = sst [smem:[#allocation136_spill]] %s6430_s5 }
   0x7   :  { %6598 = sst [smem:[#allocation137_spill]] %s6431_s6 }
   0x8   :  { %6599 = sst [smem:[#allocation138_spill]] %s6432_s7 }
   0x9   :  { %6600 = sst [smem:[#allocation139_spill]] %s6433_s8 }
   0xa   :  { %6601 = sst [smem:[#allocation140_spill]] %s6434_s9 }
   0xb   :  { %6602 = sst [smem:[#allocation141_spill]] %s6435_s10 }
   0xc   :  { %6603 = sst [smem:[#allocation142_spill]] %s6436_s11 }
   0xd   :  { %6604 = sst [smem:[#allocation143_spill]] %s6437_s12 }
   0xe   :  { %6605 = sst [smem:[#allocation144_spill]] %s6438_s13 }
   0xf   :  { %6606 = sst [smem:[#allocation145_spill]] %s6439_s14 }
  0x10   :  { %6607 = sst [smem:[#allocation146_spill]] %s6440_s15 }
  0x11   :  { %20 = vsyncpa [#allocation4], 0 }
  0x12   :  { %22 = vsyncpa [#allocation4 + $0x1], 0 }
  0x13   :  { %23 = vsyncpa [#allocation7], 0 }
  0x14   :  { %25 = vsyncpa [#allocation7 + $0x1], 0 }
  0x15   :  { %26 = vsyncpa [#allocation10], 0 }
  0x16   :  { %27 = vsyncpa [#allocation13], 0 }
  0x17   :  { %28 = vsyncpa [#allocation16], 0 }
  0x18   :  { %29 = vsyncpa [#allocation19], 0 }
  0x19   :  { %30 = vsyncpa [#allocation22], 0 }
  0x1a   :  { %31 = vsyncpa [#allocation5], 0 }
  0x1b   :  { %33 = vsyncpa [#allocation5 + $0x1], 0  ;;  %s4628_s18 = smov 0   ;;  %s4630_s19 = smov 0  }
  0x1c   :  { %s4632_s20 = smov 0   ;;  %s4634_s21 = smov 0  }
  0x1d   :  { %s4636_s22 = smov 0   ;;  %s4638_s23 = smov 0  }
  0x1e   :  { %s4640_s24 = smov 0   ;;  %s4642_s25 = smov 0  }
  0x1f   :  { %s4644_s26 = smov 0   ;;  %s4646_s27 = smov 0  }
  0x20   :  { %s4648_s28 = smov 0   ;;  %s4650_s29 = smov 0  }
  0x21   :  { %s4652_s30 = smov 0   ;;  %s4654_s16 = smov 0  }
  0x22 LB: > { %6608 = sst [smem:[#allocation33_spill]] %s4477_s18  ;;  %s4699_s17 = sadd.s32 4294967295, %s4529_s16   ;;  %s4529_s16 = sphi %s4654_s16, %s39_s16   ;;  %s4525_s30 = sphi %s4652_s30, %s6933_s30   ;;  %s4521_s29 = sphi %s4650_s29, %s6925_s29   ;;  %s4517_s28 = sphi %s4648_s28, %s6924_s28   ;;  %s4513_s27 = sphi %s4646_s27, %s6923_s27   ;;  %s4509_s26 = sphi %s4644_s26, %s6932_s26   ;;  %s4505_s25 = sphi %s4642_s25, %s6931_s25   ;;  %s4501_s24 = sphi %s4640_s24, %s6930_s24   ;;  %s4497_s23 = sphi %s4638_s23, %s6929_s23   ;;  %s4493_s22 = sphi %s4636_s22, %s6928_s22   ;;  %s4489_s21 = sphi %s4634_s21, %s6921_s21   ;;  %s4485_s20 = sphi %s4632_s20, %s6927_s20   ;;  %s4481_s19 = sphi %s4630_s19, %s6920_s19   ;;  %s4477_s18 = sphi %s4628_s18, %s6919_s18  }
  0x23   : > { %6609 = sst [smem:[#allocation34_spill]] %s4481_s19  ;;  %p3479_p0 = scmp.ge.s32.totalorder %s4529_s16, 1 }
  0x24   : > { %6610 = sst [smem:[#allocation35_spill]] %s4485_s20  ;;  %p80_p1 = scmp.eq.s32.totalorder %s4699_s17, 0 }
  0x25   : > { %6611 = sst [smem:[#allocation36_spill]] %s4489_s21  ;;  %p432_p2 = scmp.lt.s32.totalorder %s4529_s16, 9 }
  0x26   : > { %6612 = sst [smem:[#allocation37_spill]] %s4493_s22  ;;  %s4531_s9 = smov [#allocation9]  }
  0x27   : > { %6613 = sst [smem:[#allocation38_spill]] %s4501_s24  ;;  %p4707_p3 = pnand %p3479_p0, %p432_p2 }
  0x28   : > { %6614 = sst [smem:[#allocation39_spill]] %s4513_s27  ;;  %s445_s8 = sshll.u32 %s4531_s9, 4  ;;  %s446_s8 = int_to_ptr.vmem [resolvable:$true] %s445_s8 }
  0x29   : > { %6615 = sst [smem:[#allocation40_spill]] %s4517_s28  ;;  %p3599_p4 = pneg %p4707_p3 }
  0x2a   : > { %6616 = sst [smem:[#allocation41_spill]] %s4521_s29  ;;  %s6448_s15 = smov 128  }
  0x2b   : > { %6617 = sst [smem:[#allocation42_spill]] %s4525_s30  ;;  %p4715_p5 = pnand %p3599_p4, %p80_p1 }
  0x2c   : > { %6618 = sst [smem:[#allocation43_spill]] %s4699_s17  ;;  %s4534_s9 = smov [#allocation12]  }
  0x2d   : > { %s6619_s3 = sld [smem:[#allocation134_spill]]  ;;  %s4535_s0 = smov [#allocation15]  }
  0x2e   : > { %s6620_s27 = scalar_select %p4707_p3, 1, 0 }
  0x2f   : > { %s6623_s5 = sld [smem:[#allocation136_spill]]  ;;  %s6452_s20 = smov 512  }
  0x30   : > { %6621 = sst [smem:[#allocation44_spill]] %s6620_s27  ;;  %s473_s27 = sshll.u32 %s4534_s9, 4  ;;  %s474_s27 = int_to_ptr.vmem [resolvable:$true] %s473_s27 }
  0x31   : > { %s6624_s7 = sld [smem:[#allocation138_spill]]  ;;  %s6454_s9 = smov 32  }
  0x32   : > { %s6625_s12 = sld [smem:[#allocation143_spill]]  ;;  %s4747_s18 = sadd.s32 1, %s4521_s29 }
  0x33   : > { %s443_s28 = sshll.u32 %s6619_s3, 4  ;;  %s6450_s3 = smov 8   ;;  %s444_s28 = int_to_ptr.hbm [resolvable:$true] %s443_s28 }
  0x34   : > { %3602 = dma.hbm_to_vmem [thread:$0]  (!%p4715_p5), %s444_s28, 8192, %s446_s8, [#allocation10], %s6448_s15, %s6448_s15, %s6450_s3  }
  0x35   : > { %s471_s10 = sshll.u32 %s6623_s5, 4  ;;  %s501_s8 = sshll.u32 %s4535_s0, 4  ;;  %s472_s10 = int_to_ptr.hbm [resolvable:$true] %s471_s10  ;;  %s502_s8 = int_to_ptr.vmem [resolvable:$true] %s501_s8 }
  0x36   : > { %3608 = dma.hbm_to_vmem [thread:$0]  (!%p4715_p5), %s472_s10, 6144, %s474_s27, [#allocation13], %s6448_s15, %s6448_s15, %s6450_s3  }
  0x37   : > { %s499_s24 = sshll.u32 %s6624_s7, 4  ;;  %s4538_s27 = smov [#allocation18]   ;;  %s500_s24 = int_to_ptr.hbm [resolvable:$true] %s499_s24 }
  0x38   : > { %s535_s19 = sshll.u32 %s6625_s12, 4  ;;  %s537_s10 = sshll.u32 %s4538_s27, 4  ;;  %s536_s19 = int_to_ptr.hbm [resolvable:$true] %s535_s19  ;;  %s538_s10 = int_to_ptr.vmem [resolvable:$true] %s537_s10 }
  0x39   : > { %3614 = dma.hbm_to_vmem [thread:$0]  (!%p4715_p5), %s500_s24, 8192, %s502_s8, [#allocation16], %s6452_s20, %s6452_s20, %s6454_s9  }
  0x3a   : > { %3620 = dma.hbm_to_vmem [thread:$0]  (!%p4715_p5), %s536_s19, 64, %s538_s10, [#allocation19]  }
  0x3b   : > { %s3476_s0 = sadd.s32 4294967294, %s4529_s16   ;;  %6626 = sst [smem:[#allocation45_spill]] %s4747_s18 }
  0x3c   : > { %p49_p6 = scmp.ge.s32.totalorder %s4747_s18, 4  ;;  %s51_s28 = sadd.s32 1, %s4525_s30 }
  0x3d   : > { %p74_p7 = scmp.eq.s32.totalorder %s4529_s16, 0  ;;  %s94_s24 = sadd.s32 1, %s4497_s23 }
  0x3e   : > { %s4754_s8 = scalar_select %p49_p6, 0, %s4747_s18  }
  0x3f   : > { %s6935_s28 = smov (!%p49_p6, %s51_s28), %s4525_s30  ;;  %p101_p8 = scmp.ne.s32.totalorder %s4497_s23, %s4493_s22 }
  0x40   : > { %6627 = sst [smem:[#allocation46_spill]] %s4754_s8  ;;  %s90_s27 = ssub.s32 %s4521_s29, %s4754_s8 }
  0x41   : > { %p53_p9 = scmp.ge.s32.totalorder %s6935_s28, 2  ;;  %p107_p10 = scmp.ne.s32.totalorder %s4493_s22, %s4489_s21 }
  0x42   : > { %p4765_p11 = por %p101_p8, %p74_p7  ;;  %p419_p12 = scmp.eq.s32.totalorder %s4699_s17, 7 }
  0x43   : > { %s6937_s28 = smov (%p53_p9, %s6935_s28), 0  ;;  %p4774_p13 = por %p107_p10, %p80_p1 }
  0x44   : > { %6629 = sst [smem:[#allocation47_spill]] %s6937_s28  ;;  %p4778_p0 = por %p419_p12, %p101_p8 }
  0x45   : > { %s6630_s10 = scalar_select %p4774_p13, 1, 0 }
  0x46   : > { %s6632_s15 = scalar_select %p4778_p0, 1, 0 }
  0x47   : > { %6631 = sst [smem:[#allocation48_spill]] %s6630_s10  ;;  %s4784_s3 = ssub.s32 %s4525_s30, %s6937_s28 }
  0x48   : > { %6633 = sst [smem:[#allocation49_spill]] %s6632_s15  ;;  %p425_p2 = scmp.eq.s32.totalorder %s3476_s0, 7 }
  0x49   : > { %s91_s20 = sor.u32 %s90_s27, %s4784_s3  ;;  %p3650_p4 = scmp.lt.s32.totalorder %s4529_s16, 8 }
  0x4a   : > { %p92_p6 = scmp.eq.s32.totalorder %s91_s20, 0  ;;  %p4788_p9 = por %p425_p2, %p107_p10 }
  0x4b   : > { %s4793_s5 = sshll.u32 %s4525_s30, 7  ;;  %s603_s7 = sand.u32 1, %s4529_s16  }
  0x4c   : > { %s6634_s9 = scalar_select %p4788_p9, 1, 0 }
  0x4d   : > { %s4797_s12 = scalar_select %p92_p6, %s4497_s23, %s94_s24  }
  0x4e   : > { %6635 = sst [smem:[#allocation50_spill]] %s6634_s9  ;;  %s605_s21 = sand.u32 1, %s4497_s23  }
  0x4f   : > { %s3495_s28 = sshll.u32 %s605_s21, 8  ;;  %s3496_s15 = sshll.u32 %s4521_s29, 5 }
  0x50   : > { %s612_s10 = sadd.s32 %s3496_s15, %s4793_s5  ;;  %s607_s27 = scalar_lea.vmem [#allocation6], %s3495_s28 }
  0x51   : > { %s3498_s0 = sshll.u32 %s612_s10, 3  ;;  %s617_s22 = sshll.u32 %s607_s27, 4  ;;  %s618_s22 = int_to_ptr.vmem [resolvable:$true] %s617_s22 }
  0x52   : > { %s6636_s1 = sld [smem:[#allocation132_spill]]  ;;  %p3631_p8 = pnand %p3650_p4, %p4765_p11 }
  0x53   : > { %s6637_s4 = sld [smem:[#allocation135_spill]]  ;;  %s4812_s15 = scalar_lea.sflag [#allocation7], %s603_s7 }
  0x54   : > { %s6638_s28 = smov 32   ;;  %s6639_s10 = smov 512  }
  0x55   : > { %s6640_s6 = sld [smem:[#allocation137_spill]]  ;;  %s4539_s19 = smov [#allocation11]  }
  0x56   : > { %s459_s27 = sshll.u32 %s4539_s19, 4  ;;  %s6641_s30 = smov 8   ;;  %s460_s27 = int_to_ptr.vmem [resolvable:$true] %s459_s27 }
  0x57   : > { %s6642_s20 = smov 128   ;;  %s4540_s7 = smov [#allocation14]  }
  0x58   : > { %s614_s17 = scalar_lea.hbm %s6636_s1, %s3498_s0  ;;  %s487_s24 = sshll.u32 %s4540_s7, 4  ;;  %s488_s24 = int_to_ptr.vmem [resolvable:$true] %s487_s24 }
  0x59   : > { %s615_s9 = sshll.u32 %s614_s17, 4  ;;  %s457_s21 = sshll.u32 %s6637_s4, 4  ;;  %s616_s9 = int_to_ptr.hbm [resolvable:$true] %s615_s9  ;;  %s458_s21 = int_to_ptr.hbm [resolvable:$true] %s457_s21 }
  0x5a   : > { %3633 = dma.hbm_to_vmem [thread:$0]  (!%p3631_p8), %s616_s9, 4096, %s618_s22, %s4812_s15, %s6639_s10, %s6639_s10, %s6638_s28  }
  0x5b   : > { %s485_s17 = sshll.u32 %s6640_s6, 4  ;;  %s6643_s11 = sld [smem:[#allocation142_spill]]  ;;  %s486_s17 = int_to_ptr.hbm [resolvable:$true] %s485_s17 }
  0x5c   : > { %3605 = dma.hbm_to_vmem [thread:$0]  (!%p4715_p5), %s458_s21, 6144, %s460_s27, [#allocation10], %s6642_s20, %s6642_s20, %s6641_s30  }
  0x5d   : > { %3611 = dma.hbm_to_vmem [thread:$0]  (!%p4715_p5), %s486_s17, 6144, %s488_s24, [#allocation13], %s6642_s20, %s6642_s20, %s6641_s30  }
  0x5e   : > { %s6644_s13 = sld [smem:[#allocation144_spill]]  ;;  %s4541_s21 = smov [#allocation17]  }
  0x5f   : > { %s525_s19 = sshll.u32 %s4541_s21, 4  ;;  %s4542_s1 = smov [#allocation20]   ;;  %s526_s19 = int_to_ptr.vmem [resolvable:$true] %s525_s19 }
  0x60   : > { %s548_s4 = sshll.u32 %s4542_s1, 4  ;;  %s6645_s14 = sld [smem:[#allocation145_spill]]  ;;  %s549_s4 = int_to_ptr.vmem [resolvable:$true] %s548_s4 }
  0x61   : > { %s523_s22 = sshll.u32 %s6643_s11, 4  ;;  %s6646_s24 = sld [smem:[#allocation38_spill]]  ;;  %s524_s22 = int_to_ptr.hbm [resolvable:$true] %s523_s22 }
  0x62   : > { %3617 = dma.hbm_to_vmem [thread:$0]  (!%p4715_p5), %s524_s22, 16, %s526_s19, [#allocation16]  }
  0x63   : > { %s4543_s22 = smov [#allocation21]   ;;  %s3477_s21 = sadd.s32 4294967295, %s4521_s29 }
  0x64   : > { %s546_s0 = sshll.u32 %s6644_s13, 4  ;;  %s562_s9 = sshll.u32 %s4543_s22, 4  ;;  %s547_s0 = int_to_ptr.hbm [resolvable:$true] %s546_s0  ;;  %s563_s9 = int_to_ptr.vmem [resolvable:$true] %s562_s9 }
  0x65   : > { %3623 = dma.hbm_to_vmem [thread:$0]  (!%p4715_p5), %s547_s0, 1024, %s549_s4, [#allocation19], %s6642_s20, %s6642_s20, %s6641_s30  }
  0x66   : > { %s560_s17 = sshll.u32 %s6645_s14, 4  ;;  %p56_p10 = scmp.gt.s32.totalorder %s3477_s21, 0  ;;  %s561_s17 = int_to_ptr.hbm [resolvable:$true] %s560_s17 }
  0x67   : > { %3626 = dma.hbm_to_vmem [thread:$0]  (!%p4715_p5), %s561_s17, 1024, %s563_s9, [#allocation22], %s6642_s20, %s6642_s20, %s6641_s30  }
  0x68   : > { %s3478_s19 = sadd.s32 4294967295, %s4754_s8  ;;  %s66_s1 = sadd.s32 1, %s4509_s26 }
  0x69   : > { %p59_p11 = scmp.gt.s32.totalorder %s3478_s19, 0  ;;  %s6939_s21 = smov (!%p56_p10, %s3477_s21), 0 }
  0x6a   : > { %p73_p12 = scmp.ne.s32.totalorder %s4509_s26, %s4505_s25  ;;  %p79_p2 = scmp.ne.s32.totalorder %s4505_s25, %s6646_s24 }
  0x6b   : > { %s6941_s19 = smov (!%p59_p11, %s3478_s19), 0  ;;  %s576_s4 = sand.u32 1, %s4509_s26  }
  0x6c   : > { %s62_s0 = ssub.s32 %s6939_s21, %s6941_s19  ;;  %p75_p6 = por %p74_p7, %p73_p12 }
  0x6d   : > { %s63_s2 = sor.u32 %s62_s0, %s4784_s3  ;;  %s6648_s30 = sld [smem:[#allocation45_spill]] }
  0x6e   : > { %p64_p8 = scmp.eq.s32.totalorder %s63_s2, 0  ;;  %p4865_p5 = por %p80_p1, %p79_p2 }
  0x6f   : > { %s3490_s27 = sshll.u32 %s576_s4, 8  ;;  %s6650_s7 = sld [smem:[#allocation35_spill]] }
  0x70   : > { %s4870_s17 = scalar_select %p64_p8, %s4509_s26, %s66_s1  }
  0x71   : > { %s3492_s24 = sshll.u32 %s6939_s21, 5  ;;  %s6652_s9 = sld [smem:[#allocation34_spill]] }
  0x72   : > { %6651 = sst [smem:[#allocation51_spill]] %s4870_s17  ;;  %s588_s22 = sadd.s32 %s4793_s5, %s3492_s24 }
  0x73   : > { %s580_s19 = scalar_lea.vmem [#allocation3], %s3490_s27  ;;  %s6653_s0 = sld [smem:[#allocation33_spill]] }
  0x74   : > { %s593_s2 = sshll.u32 %s580_s19, 4  ;;  %s3494_s6 = sshll.u32 %s588_s22, 3  ;;  %s594_s2 = int_to_ptr.vmem [resolvable:$true] %s593_s2 }
  0x75   : > { %s6654_s14 = sld [smem:[#allocation131_spill]]  ;;  %p3628_p10 = pnand %p3650_p4, %p75_p6 }
  0x76   : > { %s577_s21 = scalar_lea.sflag [#allocation4], %s576_s4  ;;  %p118_p11 = scmp.lt.s32.totalorder %s6648_s30, 3 }
  0x77   : > { %s120_s27 = sadd.s32 1, %s4754_s8  ;;  %s128_s24 = sadd.s32 1, %s6650_s7 }
  0x78   : > { %s6943_s30 = smov (!%p118_p11, %s6648_s30), 3  ;;  %p121_p12 = scmp.lt.s32.totalorder %s120_s27, 3 }
  0x79   : > { %p135_p2 = scmp.ne.s32.totalorder %s6650_s7, %s6652_s9  ;;  %p141_p8 = scmp.ne.s32.totalorder %s6652_s9, %s6653_s0 }
  0x7a   : > { %s6945_s27 = smov (!%p121_p12, %s120_s27), 3  ;;  %s3500_s22 = sshll.u32 %s6943_s30, 5 }
  0x7b   : > { %s590_s29 = scalar_lea.hbm %s6654_s14, %s3494_s6  ;;  %s629_s6 = sand.u32 1, %s6650_s7  }
  0x7c   : > { %s591_s1 = sshll.u32 %s590_s29, 4  ;;  %p4892_p6 = por %p135_p2, %p74_p7  ;;  %s592_s1 = int_to_ptr.hbm [resolvable:$true] %s591_s1 }
  0x7d   : > { %3630 = dma.hbm_to_vmem [thread:$0]  (!%p3628_p10), %s592_s1, 4096, %s594_s2, %s577_s21, %s6639_s10, %s6639_s10, %s6638_s28  }
  0x7e   : > { %p4898_p10 = por %p141_p8, %p80_p1  ;;  %s124_s14 = ssub.s32 %s6943_s30, %s6945_s27 }
  0x7f   : > { %s3499_s29 = sshll.u32 %s629_s6, 8  ;;  %s125_s4 = sor.u32 %s124_s14, %s4784_s3 }
  0x80   : > { %p126_p11 = scmp.eq.s32.totalorder %s125_s4, 0  ;;  %s639_s9 = sadd.s32 %s3500_s22, %s4793_s5 }
  0x81   : > { %s631_s19 = scalar_lea.vmem [#allocation8], %s3499_s29  ;;  %s3502_s2 = sshll.u32 %s639_s9, 3 }
  0x82   : > { %s644_s0 = sshll.u32 %s631_s19, 4  ;;  %s6947_s7 = smov (!%p126_p11, %s6650_s7), %s128_s24  ;;  %s645_s0 = int_to_ptr.vmem [resolvable:$true] %s644_s0 }
  0x83   : > { %s6657_s21 = sld [smem:[#allocation133_spill]]  ;;  %p3634_p7 = pnand %p3650_p4, %p4892_p6 }
  0x87   : > { %656 = sbr.rel (%p4707_p3) target bundleno = 1736 (0x6c8), region = 80 }
  0x89   : > { %s641_s8 = scalar_lea.hbm %s6657_s21, %s3502_s2 }
  0x8a   : > { %s642_s17 = sshll.u32 %s641_s8, 4  ;;  %s643_s17 = int_to_ptr.hbm [resolvable:$true] %s642_s17 }
  0x8b   : > { %3636 = dma.hbm_to_vmem [thread:$0]  (!%p3634_p7), %s643_s17, 4096, %s645_s0, %s4812_s15, %s6639_s10, %s6639_s10, %s6638_s28  }
  0x8c   : > { %s658_s5 = sand.u32 1, %s4505_s25  }
  0x8d   : > { %s3504_s30 = sshll.u32 %s658_s5, 8  ;;  %s659_s27 = scalar_lea.sflag [#allocation4], %s658_s5 }
  0x8e   : > { %s4921_s24 = scalar_lea.vmem [#allocation3], %s3504_s30 }
  0x8f   : > { %4440 = dma.done.wait (%p4865_p5), %s659_s27, 4096  }
  0x90   : > { %4442 = vsyncadd (%p4865_p5), %s659_s27, 4294963200  ;;  %s6659_s8 = sld [smem:[#allocation43_spill]] }
  0x91   : > { %s6660_s6 = sld [smem:[#allocation37_spill]] }
  0x96   : > { %s668_s15 = sand.u32 1, %s6659_s8  }
  0x97   : > { %s670_s28 = sand.u32 1, %s6660_s6   ;;  %s669_s17 = scalar_lea.sflag [#allocation7], %s668_s15 }
  0x98   : > { %s4931_s10 = sshll.u32 %s670_s28, 8 }
  0x99   : > { %s4934_s14 = scalar_lea.vmem [#allocation6], %s4931_s10 }
  0x9a   : > { %4444 = dma.done.wait (%p4774_p13), %s669_s17, 4096  }
  0x9b   : > { %4446 = vsyncadd (%p4774_p13), %s669_s17, 4294963200  ;;  %s6662_s20 = sld [smem:[#allocation34_spill]] }
  0xa1   : > { %s680_s29 = sand.u32 1, %s6662_s20  }
  0xa2   : > { %s3506_s4 = sshll.u32 %s680_s29, 8 }
  0xa3   : > { %s4941_s22 = scalar_lea.vmem [#allocation8], %s3506_s4 }
  0xa4   : > { %4448 = dma.done.wait (%p4898_p10), %s669_s17, 4096  }
  0xa5   : > { %4450 = vsyncadd (%p4898_p10), %s669_s17, 4294963200 }
  0xa6   : > { %4452 = dma.done.wait (%p80_p1), [#allocation10], 14336  }
  0xa7   : > { %4454 = vsyncadd (%p80_p1), [#allocation10], 4294952960 }
  0xa8   : > { %4456 = dma.done.wait (%p80_p1), [#allocation13], 12288  }
  0xa9   : > { %4458 = vsyncadd (%p80_p1), [#allocation13], 4294955008 }
  0xaa   : > { %4460 = dma.done.wait (%p80_p1), [#allocation16], 8208  }
  0xab   : > { %4462 = vsyncadd (%p80_p1), [#allocation16], 4294959088 }
  0xac   : > { %4464 = dma.done.wait (%p80_p1), [#allocation19], 1088  }
  0xad   : > { %4466 = vsyncadd (%p80_p1), [#allocation19], 4294966208 }
  0xae   : > { %4468 = dma.done.wait (%p80_p1), [#allocation22], 1024  }
  0xaf   : > { %4470 = vsyncadd (%p80_p1), [#allocation22], 4294966272  ;;  %v4967_v0 = vld [vmem:[#allocation9 + $0x78] sm:$0xff]  ;;  %v4969_v1 = vld [vmem:[#allocation9 + $0x70] sm:$0xff]  ;;  %v4544_v37 = vmov 0   ;;  %s6696_s19 = sld [smem:[#allocation139_spill]] }
  0xb0   : > { %3523 = vmatpush.msra.mxu1 %v4967_v0  ;;  %1121 = vmatpush.msra.mxu0 %v4967_v0  ;;  %v4973_v2 = vld [vmem:[#allocation9 + $0x68] sm:$0xff]  ;;  %v4977_v3 = vld [vmem:[#allocation9 + $0x60] sm:$0xff]  ;;  %v838_v4 = vld [vmem:[#allocation9 + $0x178] sm:$0xff]  ;;  %s6730_s18 = sld [smem:[#allocation140_spill]]  ;;  %s6261_s2 = scalar_lea.vmem [#allocation23], %s4931_s10 }
  0xb1   : > { %v837_v5 = vld [vmem:[#allocation9 + $0x170] sm:$0xff]  ;;  %v4981_v6 = vld [vmem:[#allocation9 + $0x58] sm:$0xff]  ;;  %1203 = vmatpush.msra.mxu2 %v838_v4  ;;  %v836_v8 = vld [vmem:[#allocation9 + $0x168] sm:$0xff]  ;;  %3790 = vset.pattern.permute.xlu0 %v4544_v37  ;;  %s6870_s11 = sld [smem:[#allocation39_spill]]  ;;  %s3247_s17 = sshll.u32 %s6261_s2, 4  ;;  %s3248_s17 = int_to_ptr.vmem [resolvable:$true] %s3247_s17 }
  0xb2   : > { %3524 = vmatpush.msra.mxu1 %v4969_v1  ;;  %1122 = vmatpush.msra.mxu0 %v4969_v1  ;;  %v854_v7 = vld [vmem:[#allocation9 + $0x1f8] sm:$0xff]  ;;  %v853_v9 = vld [vmem:[#allocation9 + $0x1f0] sm:$0xff]  ;;  %v852_v11 = vld [vmem:[#allocation9 + $0x1e8] sm:$0xff]  ;;  %s6871_s20 = sld [smem:[#allocation141_spill]] }
  0xb3   : > { %1244 = vmatpush.msra.mxu3 %v854_v7  ;;  %v4984_v10 = vld [vmem:[#allocation9 + $0x50] sm:$0xff]  ;;  %1204 = vmatpush.msra.mxu2 %v837_v5  ;;  %v835_v12 = vld [vmem:[#allocation9 + $0x160] sm:$0xff]  ;;  %v4988_v13 = vld [vmem:[#allocation9 + $0x48] sm:$0xff]  ;;  %s6912_s10 = sld [smem:[#allocation40_spill]] }
  0xb4   : > { %3525 = vmatpush.msra.mxu1 %v4973_v2  ;;  %1123 = vmatpush.msra.mxu0 %v4973_v2  ;;  %v851_v14 = vld [vmem:[#allocation9 + $0x1e0] sm:$0xff]  ;;  %v834_v15 = vld [vmem:[#allocation9 + $0x158] sm:$0xff]  ;;  %v833_v18 = vld [vmem:[#allocation9 + $0x150] sm:$0xff] }
  0xb5   : > { %1245 = vmatpush.msra.mxu3 %v853_v9  ;;  %1205 = vmatpush.msra.mxu2 %v836_v8  ;;  %v4992_v16 = vld [vmem:[#allocation9 + $0x40] sm:$0xff]  ;;  %v850_v17 = vld [vmem:[#allocation9 + $0x1d8] sm:$0xff]  ;;  %v849_v20 = vld [vmem:[#allocation9 + $0x1d0] sm:$0xff]  ;;  %s6697_s0 = smov %s6696_s19 }
  0xb6   : > { %3526 = vmatpush.msra.mxu1 %v4977_v3  ;;  %1124 = vmatpush.msra.mxu0 %v4977_v3  ;;  %v4996_v19 = vld [vmem:[#allocation9 + $0x38] sm:$0xff]  ;;  %v832_v21 = vld [vmem:[#allocation9 + $0x148] sm:$0xff]  ;;  %v5000_v22 = vld [vmem:[#allocation9 + $0x30] sm:$0xff]  ;;  %s6731_s3 = smov %s6730_s18 }
  0xb7   : > { %1246 = vmatpush.msra.mxu3 %v852_v11  ;;  %1206 = vmatpush.msra.mxu2 %v835_v12  ;;  %v848_v23 = vld [vmem:[#allocation9 + $0x1c8] sm:$0xff]  ;;  %v831_v24 = vld [vmem:[#allocation9 + $0x140] sm:$0xff]  ;;  %v830_v27 = vld [vmem:[#allocation9 + $0x138] sm:$0xff]  ;;  %p2765_p1 = scmp.gt.s32.totalorder %s6870_s11, 0  ;;  %p2768_p3 = scmp.lt.s32.totalorder %s6870_s11, 3 }
  0xb8   : > { %3527 = vmatpush.msra.mxu1 %v4981_v6  ;;  %1125 = vmatpush.msra.mxu0 %v4981_v6  ;;  %v5004_v25 = vld [vmem:[#allocation9 + $0x28] sm:$0xff]  ;;  %v847_v26 = vld [vmem:[#allocation9 + $0x1c0] sm:$0xff]  ;;  %v846_v29 = vld [vmem:[#allocation9 + $0x1b8] sm:$0xff]  ;;  %s3518_s1 = sshll.u32 %s6870_s11, 5 }
  0xb9   : > { %1247 = vmatpush.msra.mxu3 %v851_v14  ;;  %1207 = vmatpush.msra.mxu2 %v834_v15  ;;  %v5008_v28 = vld [vmem:[#allocation9 + $0x20] sm:$0xff]  ;;  %v829_v30 = vld [vmem:[#allocation9 + $0x130] sm:$0xff]  ;;  %v5012_v31 = vld [vmem:[#allocation9 + $0x18] sm:$0xff]  ;;  %s2766_s29 = scalar_select %p2765_p1, 1, 0 }
  0xba   : > { %3528 = vmatpush.msra.mxu1 %v4984_v10  ;;  %1126 = vmatpush.msra.mxu0 %v4984_v10  ;;  %v845_v32 = vld [vmem:[#allocation9 + $0x1b0] sm:$0xff]  ;;  %v828_v33 = vld [vmem:[#allocation9 + $0x128] sm:$0xff]  ;;  %v827_v38 = vld [vmem:[#allocation9 + $0x120] sm:$0xff]  ;;  %s2769_s9 = scalar_select %p2768_p3, 1, 0 }
  0xbb   : > { %1248 = vmatpush.msra.mxu3 %v850_v17  ;;  %1208 = vmatpush.msra.mxu2 %v833_v18  ;;  %v1076_v34 = vld [vmem:[#allocation21] sm:$0xff]  ;;  %v5016_v35 = vld [vmem:[#allocation9 + $0x10] sm:$0xff]  ;;  %v826_v41 = vld [vmem:[#allocation9 + $0x118] sm:$0xff]  ;;  %s2767_s4 = scvt.s32.f32 %s2766_s29  ;;  %s3233_s29 = scalar_lea.sflag [#allocation5], %s670_s28 }
  0xbc   : > { %3529 = vmatpush.msra.mxu1 %v4988_v13  ;;  %1127 = vmatpush.msra.mxu0 %v4988_v13  ;;  %v844_v36 = vld [vmem:[#allocation9 + $0x1a8] sm:$0xff]  ;;  %v843_v40 = vld [vmem:[#allocation9 + $0x1a0] sm:$0xff]  ;;  %v842_v43 = vld [vmem:[#allocation9 + $0x198] sm:$0xff] }
  0xbd   : > { %1249 = vmatpush.msra.mxu3 %v849_v20  ;;  %1209 = vmatpush.msra.mxu2 %v832_v21  ;;  %v5020_v39 = vld [vmem:[#allocation9 + $0x8] sm:$0xff]  ;;  %v5023_v42 = vld [vmem:[#allocation9] sm:$0xff]  ;;  %v825_v45 = vld [vmem:[#allocation9 + $0x110] sm:$0xff] }
  0xbe   : > { %3530 = vmatpush.msra.mxu1 %v4992_v16  ;;  %1128 = vmatpush.msra.mxu0 %v4992_v16  ;;  %v1102_v44 = vld [vmem:[%s4934_s14 + $0x80] sm:$0xff]  ;;  %v5028_v46 = vld [vmem:[#allocation9 + $0xf8] sm:$0xff]  ;;  %v824_v47 = vld [vmem:[#allocation9 + $0x108] sm:$0xff] }
  0xbf   : > { %1250 = vmatpush.msra.mxu3 %v848_v23  ;;  %1210 = vmatpush.msra.mxu2 %v831_v24  ;;  %v841_v48 = vld [vmem:[#allocation9 + $0x190] sm:$0xff]  ;;  %v823_v50 = vld [vmem:[#allocation9 + $0x100] sm:$0xff]  ;;  %v840_v51 = vld [vmem:[#allocation9 + $0x188] sm:$0xff] }
  0xc0   : > { %3531 = vmatpush.msra.mxu1 %v4996_v19  ;;  %1129 = vmatpush.msra.mxu0 %v4996_v19  ;;  %v5032_v49 = vld [vmem:[#allocation9 + $0xf0] sm:$0xff]  ;;  %v5036_v52 = vld [vmem:[#allocation9 + $0xe8] sm:$0xff]  ;;  %v5041_v55 = vld [vmem:[#allocation9 + $0xe0] sm:$0xff] }
  0xc1   : > { %1251 = vmatpush.msra.mxu3 %v847_v26  ;;  %1211 = vmatpush.msra.mxu2 %v830_v27  ;;  %v1088_v53 = vld [vmem:[%s4934_s14 + $0x10] sm:$0xff]  ;;  %v1068_v54 = vld [vmem:[#allocation20] sm:$0xff]  ;;  %v5046_v59 = vld [vmem:[#allocation9 + $0xd8] sm:$0xff] }
  0xc2   : > { %3532 = vmatpush.msra.mxu1 %v5000_v22  ;;  %1130 = vmatpush.msra.mxu0 %v5000_v22  ;;  %v839_v56 = vld [vmem:[#allocation9 + $0x180] sm:$0xff]  ;;  %v1089_v60 = vld [vmem:[%s4934_s14 + $0x18] sm:$0xff]  ;;  %v5051_v61 = vld [vmem:[#allocation9 + $0xd0] sm:$0xff] }
  0xc3   : > { %1252 = vmatpush.msra.mxu3 %v846_v29  ;;  %1212 = vmatpush.msra.mxu2 %v829_v30  ;;  %v1106_v57 = vld [vmem:[%s4934_s14 + $0xa0] sm:$0xff]  ;;  %v1077_v62 = vld [vmem:[#allocation21 + $0x8] sm:$0xff]  ;;  %v5065_v11 = vld [vmem:[#allocation9 + $0xb8] sm:$0xff] }
  0xc4   : > { %3533 = vmatpush.msra.mxu1 %v5004_v25  ;;  %1131 = vmatpush.msra.mxu0 %v5004_v25  ;;  %v1086_v58 = vld [vmem:[%s4934_s14] sm:$0xff]  ;;  %v5054_v63 = vld [vmem:[#allocation9 + $0xc8] sm:$0xff]  ;;  %v1092_v4 = vld [vmem:[%s4934_s14 + $0x30] sm:$0xff] }
  0xc5   : > { %1253 = vmatpush.msra.mxu3 %v845_v32  ;;  %1213 = vmatpush.msra.mxu2 %v828_v33  ;;  %v1079_v5 = vld [vmem:[#allocation21 + $0x18] sm:$0xff]  ;;  %v5069_v14 = vld [vmem:[#allocation9 + $0xb0] sm:$0xff]  ;;  %v5072_v17 = vld [vmem:[#allocation9 + $0xa8] sm:$0xff] }
  0xc6   : > { %3534 = vmatpush.msra.mxu1 %v5008_v28  ;;  %1367 = vperm.xlu0 %3790, %v1076_v34   ;;  %v5060_v7 = vld [vmem:[#allocation9 + $0xc0] sm:$0xff]  ;;  %v1093_v12 = vld [vmem:[%s4934_s14 + $0x38] sm:$0xff]  ;;  %v1069_v15 = vld [vmem:[#allocation20 + $0x8] sm:$0xff] }
  0xc7   : > { %1254 = vmatpush.msra.mxu3 %v844_v36  ;;  %1214 = vmatpush.msra.mxu2 %v827_v38  ;;  %v1110_v8 = vld [vmem:[%s4934_s14 + $0xc0] sm:$0xff]  ;;  %v1096_v18 = vld [vmem:[%s4934_s14 + $0x50] sm:$0xff]  ;;  %v5081_v26 = vld [vmem:[#allocation9 + $0x98] sm:$0xff] }
  0xc8   : > { %3535 = vmatpush.msra.mxu1 %v5012_v31  ;;  %1132 = vmatpush.msra.mxu0 %v5008_v28  ;;  %v1090_v9 = vld [vmem:[%s4934_s14 + $0x20] sm:$0xff]  ;;  %v1097_v27 = vld [vmem:[%s4934_s14 + $0x58] sm:$0xff]  ;;  %v5085_v29 = vld [vmem:[#allocation9 + $0x90] sm:$0xff] }
  0xc9   : > { %1255 = vmatpush.msra.mxu3 %v843_v40  ;;  %1215 = vmatpush.msra.mxu2 %v826_v41  ;;  %v1072_v20 = vld [vmem:[#allocation20 + $0x20] sm:$0xff]  ;;  %v1071_v30 = vld [vmem:[#allocation20 + $0x18] sm:$0xff]  ;;  %v1100_v33 = vld [vmem:[%s4934_s14 + $0x70] sm:$0xff] }
  0xca   : > { %3536 = vmatpush.msra.mxu1 %v5016_v35  ;;  %1133 = vmatpush.msra.mxu0 %v5012_v31  ;;  %v5076_v21 = vld [vmem:[#allocation9 + $0xa0] sm:$0xff]  ;;  %v5088_v32 = vld [vmem:[#allocation9 + $0x88] sm:$0xff]  ;;  %v1082_v34 = vld [vmem:[#allocation21 + $0x30] sm:$0xff] }
  0xcb   : > { %1256 = vmatpush.msra.mxu3 %v842_v43  ;;  %1216 = vmatpush.msra.mxu2 %v825_v45  ;;  %v1114_v23 = vld [vmem:[%s4934_s14 + $0xe0] sm:$0xff]  ;;  %v1101_v40 = vld [vmem:[%s4934_s14 + $0x78] sm:$0xff]  ;;  %v1081_v41 = vld [vmem:[#allocation21 + $0x28] sm:$0xff] }
  0xcc   : > { %3537 = vmatpush.msra.mxu1 %v5020_v39  ;;  %1134 = vmatpush.msra.mxu0 %v5016_v35  ;;  %v1094_v24 = vld [vmem:[%s4934_s14 + $0x40] sm:$0xff]  ;;  %v1078_v43 = vld [vmem:[#allocation21 + $0x10] sm:$0xff] }
  0xcd   : > { %1217 = vmatpush.msra.mxu2 %v824_v47  ;;  %1257 = vmatpush.msra.mxu3 %v841_v48  ;;  %v5092_v36 = vld [vmem:[#allocation9 + $0x80] sm:$0xff]  ;;  %v1091_v47 = vld [vmem:[%s4934_s14 + $0x28] sm:$0xff]  ;;  %v1105_v48 = vld [vmem:[%s4934_s14 + $0x98] sm:$0xff] }
  0xce   : > { %3538 = vmatpush.msra.mxu1 %v5023_v42  ;;  %1135 = vmatpush.msra.mxu0 %v5020_v39  ;;  %6663 = vst [vmem:[#allocation52_spill] sm:$0xff] %v5092_v36  ;;  %v1098_v38 = vld [vmem:[%s4934_s14 + $0x60] sm:$0xff] }
  0xcf   : > { %1149 = vmatmul.f32.vlgmr.msra.gmra.mxu1 %v1102_v44  ;;  %1218 = vmatpush.msra.mxu2 %v823_v50  ;;  %v1104_v44 = vld [vmem:[%s4934_s14 + $0x90] sm:$0xff]  ;;  %v1075_v45 = vld [vmem:[#allocation20 + $0x38] sm:$0xff] }
  0xd0   : > { %1162 = vmatpush.msrb.mxu1 %v5028_v46  ;;  %1258 = vmatpush.msra.mxu3 %v840_v51  ;;  %v1074_v50 = vld [vmem:[#allocation20 + $0x30] sm:$0xff] }
  0xd1   : > { %1219 = vmatmul.f32.vlgmr.msra.gmra.mxu2 %v1088_v53  ;;  %1319 = vperm.xlu0 %3790, %v1068_v54   ;;  %v1070_v51 = vld [vmem:[#allocation20 + $0x10] sm:$0xff]  ;;  %v1095_v54 = vld [vmem:[%s4934_s14 + $0x48] sm:$0xff] }
  0xd2   : > { %1163 = vmatpush.msrb.mxu1 %v5032_v49  ;;  %1136 = vmatpush.msra.mxu0 %v5023_v42  ;;  %v1108_v53 = vld [vmem:[%s4934_s14 + $0xb0] sm:$0xff] }
  0xd3   : > { %1259 = vmatpush.msra.mxu3 %v839_v56  ;;  %1137 = vmatmul.f32.vlgmr.msra.gmra.mxu0 %v1086_v58  ;;  %v1109_v56 = vld [vmem:[%s4934_s14 + $0xb8] sm:$0xff]  ;;  %v1112_v58 = vld [vmem:[%s4934_s14 + $0xd0] sm:$0xff] }
  0xd4   : > { %1164 = vmatpush.msrb.mxu1 %v5036_v52  ;;  %1260 = vmatmul.f32.vlgmr.msra.gmra.mxu3 %v1089_v60  ;;  %v1099_v60 = vld [vmem:[%s4934_s14 + $0x68] sm:$0xff] }
  0xd5   : > { %3791 = vset.pattern.permute.xlu1 %v4544_v37  ;;  %3792 = vset.pattern.permute.xlu2 %v4544_v37  ;;  %v1087_v37 = vld [vmem:[%s4934_s14 + $0x8] sm:$0xff] }
  0xd6   : > { %1165 = vmatpush.msrb.mxu1 %v5041_v55  ;;  %1372 = vperm.xlu1 %3791, %v1077_v62   ;;  %v1113_v62 = vld [vmem:[%s4934_s14 + $0xd8] sm:$0xff] }
  0xd7   : > { %1152 = vmatmul.f32.gmra.mxu1 %v1106_v57  ;;  %1377 = vperm.xlu2 %3792, %v1078_v43   ;;  %v1080_v57 = vld [vmem:[#allocation21 + $0x20] sm:$0xff]  ;;  %v5143_v43 = vld [vmem:[#allocation11 + $0x150] sm:$0xff] }
  0xd8   : > { %1166 = vmatpush.msrb.mxu1 %v5046_v59  ;;  %6674 = vst [vmem:[#allocation63_spill] sm:$0xff] %v5143_v43 }
  0xd9   : > { %1222 = vmatmul.f32.gmra.mxu2 %v1092_v4  ;;  %1382 = vperm.xlu0 %3790, %v1079_v5   ;;  %v1073_v4 = vld [vmem:[#allocation20 + $0x28] sm:$0xff]  ;;  %v5108_v5 = vld [vmem:[#allocation11 + $0x178] sm:$0xff] }
  0xda   : > { %1167 = vmatpush.msrb.mxu1 %v5051_v61  ;;  %6664 = vst [vmem:[#allocation53_spill] sm:$0xff] %v5108_v5  ;;  %1498 = vmatpush.msrb.mxu2 %v5108_v5 }
  0xdb   : > { %1140 = vmatmul.f32.gmra.mxu0 %v1090_v9  ;;  %v5112_v9 = vld [vmem:[#allocation11 + $0x170] sm:$0xff] }
  0xdc   : > { %1168 = vmatpush.msrb.mxu1 %v5054_v63  ;;  %1263 = vmatmul.f32.gmra.mxu3 %v1093_v12  ;;  %6666 = vst [vmem:[#allocation55_spill] sm:$0xff] %v5112_v9  ;;  %v1116_v12 = vld [vmem:[%s4934_s14 + $0xf0] sm:$0xff] }
  0xdd   : > { %1499 = vmatpush.msrb.mxu2 %v5112_v9 }
  0xde   : > { %1169 = vmatpush.msrb.mxu1 %v5060_v7  ;;  %1324 = vperm.xlu1 %3791, %v1069_v15   ;;  %v1103_v15 = vld [vmem:[%s4934_s14 + $0x88] sm:$0xff] }
  0xdf   : > { %1155 = vmatmul.f32.gmra.mxu1 %v1110_v8  ;;  %1329 = vperm.xlu2 %3792, %v1070_v51   ;;  %v5110_v8 = vld [vmem:[#allocation11 + $0xf8] sm:$0xff]  ;;  %v5159_v51 = vld [vmem:[#allocation11 + $0x140] sm:$0xff] }
  0xe0   : > { %1170 = vmatpush.msrb.mxu1 %v5065_v11  ;;  %6665 = vst [vmem:[#allocation54_spill] sm:$0xff] %v5110_v8 }
  0xe1   : > { %1225 = vmatmul.f32.gmra.mxu2 %v1096_v18  ;;  %1339 = vperm.xlu0 %3790, %v1072_v20   ;;  %v1117_v18 = vld [vmem:[%s4934_s14 + $0xf8] sm:$0xff]  ;;  %6678 = vst [vmem:[#allocation67_spill] sm:$0xff] %v5159_v51 }
  0xe2   : > { %1171 = vmatpush.msrb.mxu1 %v5069_v14  ;;  %v1083_v20 = vld [vmem:[#allocation21 + $0x38] sm:$0xff] }
  0xe3   : > { %1143 = vmatmul.f32.gmra.mxu0 %v1094_v24  ;;  %v1111_v24 = vld [vmem:[%s4934_s14 + $0xc8] sm:$0xff] }
  0xe4   : > { %1172 = vmatpush.msrb.mxu1 %v5072_v17  ;;  %1266 = vmatmul.f32.gmra.mxu3 %v1097_v27  ;;  %v1115_v27 = vld [vmem:[%s4934_s14 + $0xe8] sm:$0xff] }
  0xe6   : > { %1173 = vmatpush.msrb.mxu1 %v5076_v21  ;;  %1334 = vperm.xlu1 %3791, %v1071_v30   ;;  %v5123_v30 = vld [vmem:[#allocation11 + $0xf0] sm:$0xff] }
  0xe7   : > { %1158 = vmatmul.f32.gmra.mxu1 %v1114_v23  ;;  %1387 = vperm.xlu2 %3792, %v1080_v57   ;;  %v1107_v23 = vld [vmem:[%s4934_s14 + $0xa8] sm:$0xff]  ;;  %6667 = vst [vmem:[#allocation56_spill] sm:$0xff] %v5123_v30  ;;  %v5173_v57 = vld [vmem:[#allocation11 + $0xb8] sm:$0xff] }
  0xe8   : > { %1174 = vmatpush.msrb.mxu1 %v5081_v26  ;;  %6680 = vst [vmem:[#allocation69_spill] sm:$0xff] %v5173_v57 }
  0xe9   : > { %1228 = vmatmul.f32.gmra.mxu2 %v1100_v33  ;;  %1397 = vperm.xlu0 %3790, %v1082_v34   ;;  %v5125_v33 = vld [vmem:[#allocation11 + $0x168] sm:$0xff] }
  0xea   : > { %1175 = vmatpush.msrb.mxu1 %v5085_v29  ;;  %6668 = vst [vmem:[#allocation57_spill] sm:$0xff] %v5125_v33  ;;  %v5127_v34 = vld [vmem:[#allocation11 + $0xe8] sm:$0xff]  ;;  %1500 = vmatpush.msrb.mxu2 %v5125_v33  ;;  %v5263_v33 = vld [vmem:[#allocation11 + $0x100] sm:$0xff] }
  0xeb   : > { %1146 = vmatmul.f32.gmra.mxu0 %v1098_v38  ;;  %6669 = vst [vmem:[#allocation58_spill] sm:$0xff] %v5127_v34  ;;  %v5135_v38 = vld [vmem:[#allocation11 + $0xe0] sm:$0xff] }
  0xec   : > { %1176 = vmatpush.msrb.mxu1 %v5088_v32  ;;  %1269 = vmatmul.f32.gmra.mxu3 %v1101_v40  ;;  %6671 = vst [vmem:[#allocation60_spill] sm:$0xff] %v5135_v38  ;;  %v5137_v40 = vld [vmem:[#allocation11 + $0x158] sm:$0xff] }
  0xed   : > { %6672 = vst [vmem:[#allocation61_spill] sm:$0xff] %v5137_v40 }
  0xee   : > { %1177 = vmatpush.msrb.mxu1 %v5092_v36  ;;  %1392 = vperm.xlu1 %3791, %v1081_v41   ;;  %v5139_v41 = vld [vmem:[#allocation11 + $0xd8] sm:$0xff]  ;;  %6695 = vst [vmem:[#allocation84_spill] sm:$0xff] %v5263_v33 }
  0xef   : > { %1178 = vmatmul.f32.vlgmr.msrb.gmra.mxu1 %v1087_v37  ;;  %1344 = vperm.xlu2 %3792, %v1073_v4   ;;  %v5131_v37 = vld [vmem:[#allocation11 + $0x160] sm:$0xff]  ;;  %6673 = vst [vmem:[#allocation62_spill] sm:$0xff] %v5139_v41  ;;  %v5184_v4 = vld [vmem:[#allocation11 + $0x50] sm:$0xff] }
  0xf0   : > { %1457 = vmatpush.msra.mxu1 %v5110_v8  ;;  %6670 = vst [vmem:[#allocation59_spill] sm:$0xff] %v5131_v37  ;;  %1501 = vmatpush.msrb.mxu2 %v5131_v37  ;;  %v5260_v37 = vld [vmem:[#allocation11 + $0x108] sm:$0xff] }
  0xf1   : > { %1231 = vmatmul.f32.gmra.mxu2 %v1104_v44  ;;  %1354 = vperm.xlu0 %3790, %v1075_v45   ;;  %v5147_v44 = vld [vmem:[#allocation11 + $0xd0] sm:$0xff]  ;;  %v5149_v45 = vld [vmem:[#allocation11 + $0x148] sm:$0xff]  ;;  %6694 = vst [vmem:[#allocation83_spill] sm:$0xff] %v5260_v37 }
  0xf2   : > { %1458 = vmatpush.msra.mxu1 %v5123_v30  ;;  %1502 = vmatpush.msrb.mxu2 %v5137_v40  ;;  %6675 = vst [vmem:[#allocation64_spill] sm:$0xff] %v5147_v44 }
  0xf3   : > { %6676 = vst [vmem:[#allocation65_spill] sm:$0xff] %v5149_v45 }
  0xf4   : > { %1272 = vmatmul.f32.gmra.mxu3 %v1105_v48  ;;  %1459 = vmatpush.msra.mxu1 %v5127_v34  ;;  %v5155_v48 = vld [vmem:[#allocation11 + $0x70] sm:$0xff] }
  0xf5   : > { %1503 = vmatpush.msrb.mxu2 %v5143_v43  ;;  %v5242_v43 = vld [vmem:[#allocation11 + $0x18] sm:$0xff] }
  0xf6   : > { %1349 = vperm.xlu1 %3791, %v1074_v50   ;;  %1460 = vmatpush.msra.mxu1 %v5135_v38  ;;  %v5157_v50 = vld [vmem:[#allocation11 + $0xc8] sm:$0xff] }
  0xf7   : > { %1181 = vmatmul.f32.gmra.mxu1 %v1091_v47  ;;  %1402 = vperm.xlu2 %3792, %v1083_v20   ;;  %v5151_v47 = vld [vmem:[#allocation11 + $0x78] sm:$0xff]  ;;  %6677 = vst [vmem:[#allocation66_spill] sm:$0xff] %v5157_v50  ;;  %v5197_v20 = vld [vmem:[#allocation11 + $0xa0] sm:$0xff] }
  0xf8   : > { %1461 = vmatpush.msra.mxu1 %v5139_v41  ;;  %1504 = vmatpush.msrb.mxu2 %v5149_v45  ;;  %6685 = vst [vmem:[#allocation74_spill] sm:$0xff] %v5197_v20  ;;  %v5273_v41 = vld [vmem:[%s6696_s19] ss:$0 sm:$0xff]  ;;  %s2770_s19 = scvt.s32.f32 %s2769_s9 }
  0xf9   : > { %1234 = vmatmul.f32.gmra.mxu2 %v1108_v53  ;;  %1416 = vmatpush.msrb.mxu0 %v5151_v47  ;;  %v5165_v53 = vld [vmem:[#allocation11 + $0x68] sm:$0xff] }
  0xfa   : > { %1462 = vmatpush.msra.mxu1 %v5147_v44  ;;  %1505 = vmatpush.msrb.mxu2 %v5159_v51  ;;  %v5220_v51 = vld [vmem:[#allocation11 + $0x88] sm:$0xff] }
  0xfb   : > { %1417 = vmatpush.msrb.mxu0 %v5155_v48  ;;  %6689 = vst [vmem:[#allocation78_spill] sm:$0xff] %v5220_v51 }
  0xfc   : > { %1275 = vmatmul.f32.gmra.mxu3 %v1109_v56  ;;  %1463 = vmatpush.msra.mxu1 %v5157_v50  ;;  %v5171_v56 = vld [vmem:[#allocation11 + $0x60] sm:$0xff] }
  0xfd   : > { %1418 = vmatpush.msrb.mxu0 %v5165_v53 }
  0xff   : > { %1184 = vmatmul.f32.gmra.mxu1 %v1095_v54  ;;  %v5167_v54 = vld [vmem:[#allocation11 + $0xc0] sm:$0xff]  ;;  %1419 = vmatpush.msrb.mxu0 %v5171_v56 }
 0x100   : > { %6679 = vst [vmem:[#allocation68_spill] sm:$0xff] %v5167_v54  ;;  %1464 = vmatpush.msra.mxu1 %v5167_v54  ;;  %v5248_v54 = vld [vmem:[#allocation11 + $0x110] sm:$0xff] }
 0x101   : > { %1237 = vmatmul.f32.gmra.mxu2 %v1112_v58  ;;  %v5175_v58 = vld [vmem:[#allocation11 + $0x138] sm:$0xff]  ;;  %6693 = vst [vmem:[#allocation82_spill] sm:$0xff] %v5248_v54 }
 0x102   : > { %6681 = vst [vmem:[#allocation70_spill] sm:$0xff] %v5175_v58  ;;  %1465 = vmatpush.msra.mxu1 %v5173_v57  ;;  %1506 = vmatpush.msrb.mxu2 %v5175_v58  ;;  %v5211_v58 = vld [vmem:[#allocation11 + $0x38] sm:$0xff]  ;;  %v6490_v57 = vmov 0.0  }
 0x103   : > { %1084 = vst [vmem:[#allocation2] sm:$0xff] %v6490_v57 }
 0x104   : > { %1278 = vmatmul.f32.gmra.mxu3 %v1113_v62  ;;  %v5181_v62 = vld [vmem:[#allocation11 + $0xb0] sm:$0xff]  ;;  %1085 = vst [vmem:[#allocation2 + $0x48] sm:$0xff] %v6490_v57  ;;  %v5257_v57 = vld [vmem:[#allocation11] sm:$0xff] }
 0x105   : > { %6682 = vst [vmem:[#allocation71_spill] sm:$0xff] %v5181_v62  ;;  %1466 = vmatpush.msra.mxu1 %v5181_v62  ;;  %v5226_v62 = vld [vmem:[#allocation11 + $0x80] sm:$0xff] }
 0x106   : > { %6690 = vst [vmem:[#allocation79_spill] sm:$0xff] %v5226_v62 }
 0x107   : > { %1187 = vmatmul.f32.gmra.mxu1 %v1099_v60  ;;  %v5179_v60 = vld [vmem:[#allocation11 + $0x58] sm:$0xff] }
 0x108   : > { %1420 = vmatpush.msrb.mxu0 %v5179_v60 }
 0x109   : > { %1240 = vmatmul.f32.gmra.mxu2 %v1116_v12  ;;  %v5186_v12 = vld [vmem:[#allocation11 + $0xa8] sm:$0xff] }
 0x10a   : > { %6683 = vst [vmem:[#allocation72_spill] sm:$0xff] %v5186_v12  ;;  %1421 = vmatpush.msrb.mxu0 %v5184_v4  ;;  %1467 = vmatpush.msra.mxu1 %v5186_v12  ;;  %v5213_v12 = vld [vmem:[#allocation11 + $0x90] sm:$0xff] }
 0x10b   : > { %6688 = vst [vmem:[#allocation77_spill] sm:$0xff] %v5213_v12 }
 0x10c   : > { %1281 = vmatmul.f32.gmra.mxu3 %v1117_v18  ;;  %v5195_v18 = vld [vmem:[#allocation11 + $0x48] sm:$0xff]  ;;  %1468 = vmatpush.msra.mxu1 %v5197_v20  ;;  %v5218_v20 = vld [vmem:[#allocation11 + $0x30] sm:$0xff] }
 0x10d   : > { %1422 = vmatpush.msrb.mxu0 %v5195_v18 }
 0x10f   : > { %1190 = vmatmul.f32.gmra.mxu1 %v1103_v15  ;;  %v5188_v15 = vld [vmem:[#allocation11 + $0x130] sm:$0xff] }
 0x110   : > { %6684 = vst [vmem:[#allocation73_spill] sm:$0xff] %v5188_v15  ;;  %1507 = vmatpush.msrb.mxu2 %v5188_v15  ;;  %v5209_v15 = vld [vmem:[#allocation11 + $0x128] sm:$0xff] }
 0x111   : > { %6687 = vst [vmem:[#allocation76_spill] sm:$0xff] %v5209_v15 }
 0x112   : > { %1508 = vmatpush.msrb.mxu2 %v5209_v15  ;;  %v5231_v15 = vld [vmem:[#allocation11 + $0x120] sm:$0xff] }
 0x113   : > { %6691 = vst [vmem:[#allocation80_spill] sm:$0xff] %v5231_v15 }
 0x114   : > { %1509 = vmatpush.msrb.mxu2 %v5231_v15  ;;  %v5252_v15 = vld [vmem:[#allocation11 + $0x8] sm:$0xff] }
 0x117   : > { %1193 = vmatmul.f32.gmra.mxu1 %v1107_v23 }
 0x11f   : > { %1196 = vmatmul.f32.gmra.mxu1 %v1111_v24  ;;  %v5203_v24 = vld [vmem:[#allocation11 + $0x40] sm:$0xff] }
 0x120   : > { %1423 = vmatpush.msrb.mxu0 %v5203_v24 }
 0x122   : > { %1424 = vmatpush.msrb.mxu0 %v5211_v58 }
 0x124   : > { %1425 = vmatpush.msrb.mxu0 %v5218_v20 }
 0x127   : > { %1199 = vmatmul.f32.gmra.mxu1 %v1115_v27  ;;  %v5205_v27 = vld [vmem:[#allocation11 + $0x98] sm:$0xff] }
 0x128   : > { %6686 = vst [vmem:[#allocation75_spill] sm:$0xff] %v5205_v27  ;;  %1469 = vmatpush.msra.mxu1 %v5205_v27  ;;  %v5224_v27 = vld [vmem:[#allocation11 + $0x28] sm:$0xff] }
 0x129   : > { %1426 = vmatpush.msrb.mxu0 %v5224_v27 }
 0x12a   : > { %1470 = vmatpush.msra.mxu1 %v5213_v12  ;;  %v5234_v12 = vld [vmem:[#allocation11 + $0x20] sm:$0xff] }
 0x12b   : > { %1427 = vmatpush.msrb.mxu0 %v5234_v12 }
 0x12c   : > { %1471 = vmatpush.msra.mxu1 %v5220_v51  ;;  %v5240_v51 = vld [vmem:[#allocation11 + $0x118] sm:$0xff] }
 0x12d   : > { %6692 = vst [vmem:[#allocation81_spill] sm:$0xff] %v5240_v51  ;;  %1510 = vmatpush.msrb.mxu2 %v5240_v51  ;;  %1428 = vmatpush.msrb.mxu0 %v5242_v43 }
 0x12e   : > { %1472 = vmatpush.msra.mxu1 %v5226_v62  ;;  %v5246_v62 = vld [vmem:[#allocation11 + $0x10] sm:$0xff] }
 0x12f   : > { %1429 = vmatpush.msrb.mxu0 %v5246_v62  ;;  %1511 = vmatpush.msrb.mxu2 %v5248_v54 }
 0x131   : > { %1430 = vmatpush.msrb.mxu0 %v5252_v15  ;;  %1512 = vmatpush.msrb.mxu2 %v5260_v37 }
 0x133   : > { %1431 = vmatpush.msrb.mxu0 %v5257_v57  ;;  %1513 = vmatpush.msrb.mxu2 %v5263_v33 }
 0x135   : > { %1737 = vmatpush.msra.mxu2 %v4967_v0 }
 0x137   : > { %1738 = vmatpush.msra.mxu2 %v4969_v1 }
 0x138   : > { %v5281_v34 = vpop.permute.xlu0 %1367 }
 0x139   : > { %1739 = vmatpush.msra.mxu2 %v4973_v2  ;;  %6698 = vst [vmem:[#allocation85_spill] sm:$0xff] %v5281_v34 }
 0x13b   : > { %1740 = vmatpush.msra.mxu2 %v4977_v3 }
 0x13d   : > { %1741 = vmatpush.msra.mxu2 %v4981_v6 }
 0x13f   : > { %1742 = vmatpush.msra.mxu2 %v4984_v10 }
 0x141   : > { %1743 = vmatpush.msra.mxu2 %v4988_v13 }
 0x143   : > { %1744 = vmatpush.msra.mxu2 %v4992_v16 }
 0x145   : > { %1745 = vmatpush.msra.mxu2 %v4996_v19 }
 0x147   : > { %1746 = vmatpush.msra.mxu2 %v5000_v22 }
 0x148   : > { %v5290_v16 = vpop.permute.xlu1 %1372 }
 0x149   : > { %1747 = vmatpush.msra.mxu2 %v5004_v25  ;;  %6699 = vst [vmem:[#allocation86_spill] sm:$0xff] %v5290_v16 }
 0x14b   : > { %1748 = vmatpush.msra.mxu2 %v5008_v28 }
 0x14c   : > { %v5199_v23 = vpop.f32.mrf.mxu1 }
 0x14d   : > { %1749 = vmatpush.msra.mxu2 %v5012_v31  ;;  %v5300_v31 = vpop.permute.xlu2 %1377 }
 0x14e   : > { %6701 = vst [vmem:[#allocation88_spill] sm:$0xff] %v5300_v31 }
 0x14f   : > { %1750 = vmatpush.msra.mxu2 %v5016_v35 }
 0x150   : > { %v1138_v51 = vpop.f32.mrf.mxu0 }
 0x151   : > { %v1139_v37 = vadd.f32 %v5273_v41, %v1138_v51  ;;  %1751 = vmatpush.msra.mxu2 %v5020_v39 }
 0x153   : > { %1752 = vmatpush.msra.mxu2 %v5023_v42 }
 0x154   : > { %v5228_v45 = vpop.f32.mrf.mxu1  ;;  %v1220_v50 = vpop.f32.mrf.mxu2 }
 0x157   : > { %v1261_v44 = vpop.f32.mrf.mxu3 }
 0x158   : > { %v1141_v38 = vpop.f32.mrf.mxu0 }
 0x159   : > { %v1142_v2 = vadd.f32 %v5273_v41, %v1141_v38 }
 0x15c   : > { %v5254_v40 = vpop.f32.mrf.mxu1  ;;  %v1223_v9 = vpop.f32.mrf.mxu2 }
 0x15f   : > { %v1264_v33 = vpop.f32.mrf.mxu3 }
 0x160   : > { %v1144_v3 = vpop.f32.mrf.mxu0 }
 0x164   : > { %v5267_v54 = vpop.f32.mrf.mxu1  ;;  %v1226_v51 = vpop.f32.mrf.mxu2 }
 0x167   : > { %v1267_v36 = vpop.f32.mrf.mxu3 }
 0x168   : > { %v1147_v25 = vpop.f32.mrf.mxu0 }
 0x16c   : > { %v1179_v0 = vpop.f32.mrf.mxu1 }
 0x16d   : > { %v1180_v5 = vadd.f32 %v1179_v0, %v1139_v37  ;;  %v1148_v0 = vadd.f32 %v5273_v41, %v1147_v25 }
 0x16f   : > { %v1221_v1 = vadd.f32 %v1220_v50, %v1180_v5  ;;  %v1145_v5 = vadd.f32 %v5273_v41, %v1144_v3 }
 0x171   : > { %v1262_v30 = vadd.f32 %v1261_v44, %v1221_v1 }
 0x173   : > { %v1285_v8 = vmax.f32 %v1262_v30, 0.0  ;;  %v5292_v30 = vpop.permute.xlu0 %1319 }
 0x174   : > { %v1182_v6 = vpop.f32.mrf.mxu1  ;;  %6700 = vst [vmem:[#allocation87_spill] sm:$0xff] %v5292_v30 }
 0x175   : > { %1293 = vst [vmem:[#allocation2 + $0x8] sm:$0xff] %v1285_v8  ;;  %v1183_v37 = vadd.f32 %v1182_v6, %v1142_v2  ;;  %1473 = vmatmul.f32.vlgmr.msra.gmra.mxu1 %v1285_v8  ;;  %v1229_v8 = vpop.f32.mrf.mxu2  ;;  %v5302_v2 = vpop.permute.xlu1 %1324 }
 0x176   : > { %6702 = vst [vmem:[#allocation89_spill] sm:$0xff] %v5302_v2 }
 0x177   : > { %v1224_v10 = vadd.f32 %v1223_v9, %v1183_v37  ;;  %v1270_v9 = vpop.f32.mrf.mxu3 }
 0x179   : > { %v1265_v13 = vadd.f32 %v1264_v33, %v1224_v10 }
 0x17b   : > { %v1286_v19 = vmax.f32 %v1265_v13, 0.0 }
 0x17c   : > { %v1185_v38 = vpop.f32.mrf.mxu1  ;;  %v1301_v44 = vld [vmem:[#allocation2 + $0x7] sm:$0xff] }
 0x17d   : > { %v1186_v50 = vadd.f32 %v1185_v38, %v1145_v5  ;;  %1294 = vst [vmem:[#allocation2 + $0x10] sm:$0xff] %v1286_v19  ;;  %1476 = vmatmul.f32.gmra.mxu1 %v1286_v19  ;;  %v1357_v22 = vmul.f32 %v5292_v30, %v1301_v44  ;;  %v1151_v5 = vadd.f32 %v5273_v41, %v5199_v23  ;;  %v5310_v38 = vpop.permute.xlu2 %1329  ;;  %v5546_v30 = vld [vmem:[#allocation9 + $0x148] sm:$0xff] }
 0x17e   : > { %6703 = vst [vmem:[#allocation90_spill] sm:$0xff] %v5310_v38 }
 0x17f   : > { %v1227_v28 = vadd.f32 %v1226_v51, %v1186_v50  ;;  %1432 = vmatmul.f32.vlgmr.msrb.gmra.mxu0 %v1357_v22  ;;  %v1273_v42 = vpop.f32.mrf.mxu3  ;;  %6725 = vst [vmem:[#allocation111_spill] sm:$0xff] %v5546_v30 }
 0x181   : > { %v1268_v33 = vadd.f32 %v1267_v36, %v1227_v28  ;;  %v1232_v36 = vpop.f32.mrf.mxu2 }
 0x183   : > { %v1287_v1 = vmax.f32 %v1268_v33, 0.0 }
 0x184   : > { %v1188_v3 = vpop.f32.mrf.mxu1  ;;  %v1302_v6 = vld [vmem:[#allocation2 + $0xf] sm:$0xff] }
 0x185   : > { %v1309_v37 = vld [vmem:[#allocation2 + $0x9] sm:$0xff]  ;;  %v1189_v35 = vadd.f32 %v1188_v3, %v1148_v0  ;;  %1295 = vst [vmem:[#allocation2 + $0x18] sm:$0xff] %v1287_v1  ;;  %1479 = vmatmul.f32.gmra.mxu1 %v1287_v1  ;;  %v1358_v51 = vmul.f32 %v5302_v2, %v1302_v6  ;;  %v5322_v1 = vpop.permute.xlu1 %1334  ;;  %v5517_v2 = vld [vmem:[#allocation9 + $0x168] sm:$0xff] }
 0x186   : > { %v1405_v39 = vmul.f32 %v5281_v34, %v1309_v37  ;;  %6705 = vst [vmem:[#allocation92_spill] sm:$0xff] %v5322_v1  ;;  %v5515_v34 = vld [vmem:[#allocation12 + $0x108] sm:$0xff] }
 0x187   : > { %v1230_v10 = vadd.f32 %v1229_v8, %v1189_v35  ;;  %1435 = vmatmul.f32.gmra.mxu0 %v1358_v51  ;;  %v1276_v33 = vpop.f32.mrf.mxu3  ;;  %6717 = vst [vmem:[#allocation103_spill] sm:$0xff] %v5517_v2 }
 0x188   : > { %1514 = vmatmul.f32.vlgmr.msrb.gmra.mxu2 %v1405_v39 }
 0x189   : > { %1949 = vmatpush.msrb.mxu2 %v5151_v47  ;;  %v1271_v13 = vadd.f32 %v1270_v9, %v1230_v10  ;;  %v1235_v23 = vpop.f32.mrf.mxu2  ;;  %v5317_v9 = vpop.permute.xlu0 %1382 }
 0x18a   : > { %6704 = vst [vmem:[#allocation91_spill] sm:$0xff] %v5317_v9 }
 0x18b   : > { %1950 = vmatpush.msrb.mxu2 %v5155_v48  ;;  %v1288_v19 = vmax.f32 %v1271_v13, 0.0 }
 0x18c   : > { %v1191_v44 = vpop.f32.mrf.mxu1  ;;  %v1303_v50 = vld [vmem:[#allocation2 + $0x17] sm:$0xff] }
 0x18d   : > { %v1310_v22 = vld [vmem:[#allocation2 + $0x11] sm:$0xff]  ;;  %1951 = vmatpush.msrb.mxu2 %v5165_v53  ;;  %v1192_v8 = vadd.f32 %v1191_v44, %v1151_v5  ;;  %1296 = vst [vmem:[#allocation2 + $0x20] sm:$0xff] %v1288_v19  ;;  %1482 = vmatmul.f32.gmra.mxu1 %v1288_v19  ;;  %v1359_v25 = vmul.f32 %v5310_v38, %v1303_v50  ;;  %v5342_v50 = vld [vmem:[#allocation12 + $0x70] sm:$0xff]  ;;  %v5503_v38 = vld [vmem:[#allocation9 + $0x178] sm:$0xff] }
 0x18e   : > { %v1406_v47 = vmul.f32 %v5290_v16, %v1310_v22  ;;  %v1154_v53 = vadd.f32 %v5273_v41, %v5228_v45  ;;  %v5329_v45 = vpop.permute.xlu2 %1387  ;;  %v5345_v22 = vld [vmem:[#allocation12 + $0xf8] sm:$0xff]  ;;  %v5497_v16 = vld [vmem:[#allocation12 + $0x80] sm:$0xff]  ;;  %6715 = vst [vmem:[#allocation101_spill] sm:$0xff] %v5503_v38 }
 0x18f   : > { %1952 = vmatpush.msrb.mxu2 %v5171_v56  ;;  %v1233_v48 = vadd.f32 %v1232_v36, %v1192_v8  ;;  %1438 = vmatmul.f32.gmra.mxu0 %v1359_v25  ;;  %6706 = vst [vmem:[#allocation93_spill] sm:$0xff] %v5329_v45  ;;  %v1279_v5 = vpop.f32.mrf.mxu3  ;;  %v5350_v25 = vld [vmem:[#allocation12 + $0x68] sm:$0xff] }
 0x190   : > { %1517 = vmatmul.f32.gmra.mxu2 %v1406_v47  ;;  %1615 = vmatpush.msra.mxu0 %v5345_v22  ;;  %v5356_v47 = vld [vmem:[#allocation12 + $0x170] sm:$0xff] }
 0x191   : > { %1953 = vmatpush.msrb.mxu2 %v5179_v60  ;;  %v1274_v28 = vadd.f32 %v1273_v42, %v1233_v48  ;;  %v1238_v39 = vpop.f32.mrf.mxu2  ;;  %v5334_v36 = vpop.permute.xlu0 %1339 }
 0x192   : > { %6707 = vst [vmem:[#allocation94_spill] sm:$0xff] %v5334_v36  ;;  %v5358_v48 = vpop.permute.xlu1 %1392 }
 0x193   : > { %1954 = vmatpush.msrb.mxu2 %v5184_v4  ;;  %v1289_v0 = vmax.f32 %v1274_v28, 0.0  ;;  %6708 = vst [vmem:[#allocation95_spill] sm:$0xff] %v5358_v48 }
 0x194   : > { %v1194_v3 = vpop.f32.mrf.mxu1  ;;  %v1304_v56 = vld [vmem:[#allocation2 + $0x1f] sm:$0xff] }
 0x195   : > { %v1311_v6 = vld [vmem:[#allocation2 + $0x19] sm:$0xff]  ;;  %1955 = vmatpush.msrb.mxu2 %v5195_v18  ;;  %v1195_v37 = vadd.f32 %v1194_v3, %v1154_v53  ;;  %1297 = vst [vmem:[#allocation2 + $0x28] sm:$0xff] %v1289_v0  ;;  %1485 = vmatmul.f32.gmra.mxu1 %v1289_v0  ;;  %v1360_v60 = vmul.f32 %v5322_v1, %v1304_v56  ;;  %v5368_v53 = vld [vmem:[#allocation12 + $0x60] sm:$0xff] }
 0x196   : > { %v1407_v35 = vmul.f32 %v5300_v31, %v1311_v6  ;;  %v1157_v18 = vadd.f32 %v5273_v41, %v5254_v40  ;;  %v5340_v40 = vld [vmem:[#allocation12 + $0x78] sm:$0xff]  ;;  %v5366_v28 = vpop.permute.xlu2 %1344  ;;  %v5372_v0 = vld [vmem:[#allocation12 + $0x168] sm:$0xff]  ;;  %v5495_v1 = vld [vmem:[#allocation12 + $0x120] sm:$0xff] }
 0x197   : > { %1956 = vmatpush.msrb.mxu2 %v5203_v24  ;;  %v1236_v4 = vadd.f32 %v1235_v23, %v1195_v37  ;;  %1441 = vmatmul.f32.gmra.mxu0 %v1360_v60  ;;  %v5361_v23 = vld [vmem:[#allocation12 + $0xe8] sm:$0xff]  ;;  %6709 = vst [vmem:[#allocation96_spill] sm:$0xff] %v5366_v28  ;;  %v5378_v60 = vld [vmem:[#allocation12 + $0x58] sm:$0xff] }
 0x198   : > { %1520 = vmatmul.f32.gmra.mxu2 %v1407_v35  ;;  %1574 = vmatpush.msrb.mxu3 %v5340_v40  ;;  %v5381_v35 = vld [vmem:[#allocation12 + $0xe0] sm:$0xff]  ;;  %v5491_v31 = vld [vmem:[#allocation12 + $0x88] sm:$0xff] }
 0x199   : > { %1957 = vmatpush.msrb.mxu2 %v5211_v58  ;;  %v1277_v51 = vadd.f32 %v1276_v33, %v1236_v4  ;;  %v1241_v56 = vpop.f32.mrf.mxu2  ;;  %v1282_v4 = vpop.f32.mrf.mxu3 }
 0x19a   : > { %1575 = vmatpush.msrb.mxu3 %v5342_v50 }
 0x19b   : > { %1958 = vmatpush.msrb.mxu2 %v5218_v20  ;;  %v1290_v10 = vmax.f32 %v1277_v51, 0.0  ;;  %v5385_v51 = vld [vmem:[#allocation12 + $0x160] sm:$0xff] }
 0x19c   : > { %v1197_v42 = vpop.f32.mrf.mxu1  ;;  %v1305_v13 = vld [vmem:[#allocation2 + $0x27] sm:$0xff]  ;;  %1576 = vmatpush.msrb.mxu3 %v5350_v25 }
 0x19d   : > { %v1312_v24 = vld [vmem:[#allocation2 + $0x21] sm:$0xff]  ;;  %1959 = vmatpush.msrb.mxu2 %v5224_v27  ;;  %v1198_v19 = vadd.f32 %v1197_v42, %v1157_v18  ;;  %1298 = vst [vmem:[#allocation2 + $0x30] sm:$0xff] %v1290_v10  ;;  %1488 = vmatmul.f32.gmra.mxu1 %v1290_v10  ;;  %v1361_v58 = vmul.f32 %v5334_v36, %v1305_v13  ;;  %v5396_v13 = vld [vmem:[#allocation12 + $0x48] sm:$0xff] }
 0x19e   : > { %v1408_v44 = vmul.f32 %v5317_v9, %v1312_v24  ;;  %v5347_v27 = vld [vmem:[#allocation12 + $0x178] sm:$0xff]  ;;  %1577 = vmatpush.msrb.mxu3 %v5368_v53  ;;  %v5398_v24 = vld [vmem:[#allocation12 + $0xd0] sm:$0xff]  ;;  %v6714_v9 = vmov 0.0  }
 0x19f   : > { %1960 = vmatpush.msrb.mxu2 %v5234_v12  ;;  %v1239_v20 = vadd.f32 %v1238_v39, %v1198_v19  ;;  %1444 = vmatmul.f32.gmra.mxu0 %v1361_v58  ;;  %v5354_v12 = vld [vmem:[#allocation12 + $0xf0] sm:$0xff]  ;;  %v5389_v18 = vld [vmem:[#allocation12 + $0xd8] sm:$0xff]  ;;  %v5406_v58 = vld [vmem:[#allocation12 + $0x40] sm:$0xff] }
 0x1a0   : > { %1523 = vmatmul.f32.gmra.mxu2 %v1408_v44  ;;  %1656 = vmatpush.msrb.mxu1 %v5347_v27  ;;  %v5387_v39 = vld [vmem:[#allocation12 + $0x50] sm:$0xff]  ;;  %v5393_v10 = vld [vmem:[#allocation12 + $0x158] sm:$0xff]  ;;  %v5408_v44 = vpop.permute.xlu1 %1349 }
 0x1a1   : > { %1961 = vmatpush.msrb.mxu2 %v5242_v43  ;;  %v1280_v8 = vadd.f32 %v1279_v5, %v1239_v20  ;;  %v1160_v43 = vadd.f32 %v5273_v41, %v5267_v54  ;;  %1616 = vmatpush.msra.mxu0 %v5354_v12  ;;  %v5401_v5 = vpop.permute.xlu0 %1397  ;;  %6711 = vst [vmem:[#allocation98_spill] sm:$0xff] %v5408_v44  ;;  %v5487_v36 = vld [vmem:[#allocation12 + $0x90] sm:$0xff] }
 0x1a2   : > { %1657 = vmatpush.msrb.mxu1 %v5356_v47  ;;  %1578 = vmatpush.msrb.mxu3 %v5378_v60  ;;  %6710 = vst [vmem:[#allocation97_spill] sm:$0xff] %v5401_v5 }
 0x1a3   : > { %1962 = vmatpush.msrb.mxu2 %v5246_v62  ;;  %v1291_v33 = vmax.f32 %v1280_v8, 0.0  ;;  %1617 = vmatpush.msra.mxu0 %v5361_v23 }
 0x1a4   : > { %v1200_v3 = vpop.f32.mrf.mxu1  ;;  %v1306_v6 = vld [vmem:[#allocation2 + $0x2f] sm:$0xff]  ;;  %1658 = vmatpush.msrb.mxu1 %v5372_v0  ;;  %1579 = vmatpush.msrb.mxu3 %v5387_v39 }
 0x1a5   : > { %v1313_v37 = vld [vmem:[#allocation2 + $0x29] sm:$0xff]  ;;  %1963 = vmatpush.msrb.mxu2 %v5252_v15  ;;  %v1201_v41 = vadd.f32 %v1200_v3, %v1160_v43  ;;  %1299 = vst [vmem:[#allocation2 + $0x38] sm:$0xff] %v1291_v33  ;;  %1491 = vmatmul.f32.gmra.mxu1 %v1291_v33  ;;  %v1362_v54 = vmul.f32 %v5366_v28, %v1306_v6 }
 0x1a6   : > { %v1409_v62 = vmul.f32 %v5329_v45, %v1313_v37  ;;  %1618 = vmatpush.msra.mxu0 %v5381_v35  ;;  %1659 = vmatpush.msrb.mxu1 %v5385_v51  ;;  %v5477_v45 = vld [vmem:[#allocation12 + $0x128] sm:$0xff]  ;;  %v5481_v28 = vld [vmem:[#allocation12 + $0x98] sm:$0xff] }
 0x1a7   : > { %v1242_v15 = vadd.f32 %v1241_v56, %v1201_v41  ;;  %1447 = vmatmul.f32.gmra.mxu0 %v1362_v54  ;;  %1964 = vmatpush.msrb.mxu2 %v5257_v57  ;;  %v5419_v54 = vpop.permute.xlu2 %1402 }
 0x1a8   : > { %1526 = vmatmul.f32.gmra.mxu2 %v1409_v62  ;;  %1619 = vmatpush.msra.mxu0 %v5389_v18  ;;  %6713 = vst [vmem:[#allocation100_spill] sm:$0xff] %v5419_v54 }
 0x1a9   : > { %v1283_v42 = vadd.f32 %v1282_v4, %v1242_v15  ;;  %1660 = vmatpush.msrb.mxu1 %v5393_v10  ;;  %1580 = vmatpush.msrb.mxu3 %v5396_v13  ;;  %v5415_v33 = vpop.permute.xlu0 %1354  ;;  %v5422_v4 = vld [vmem:[#allocation12 + $0x150] sm:$0xff]  ;;  %v5424_v15 = vld [vmem:[#allocation12 + $0x38] sm:$0xff] }
 0x1aa   : > { %1620 = vmatpush.msra.mxu0 %v5398_v24  ;;  %6712 = vst [vmem:[#allocation99_spill] sm:$0xff] %v5415_v33 }
 0x1ab   : > { %v1292_v19 = vmax.f32 %v1283_v42, 0.0  ;;  %1581 = vmatpush.msrb.mxu3 %v5406_v58  ;;  %v5426_v42 = vld [vmem:[#allocation12 + $0xc8] sm:$0xff]  ;;  %1661 = vmatpush.msrb.mxu1 %v5422_v4 }
 0x1ac   : > { %v1307_v20 = vld [vmem:[#allocation2 + $0x37] sm:$0xff]  ;;  %1621 = vmatpush.msra.mxu0 %v5426_v42 }
 0x1ad   : > { %v1314_v8 = vld [vmem:[#allocation2 + $0x31] sm:$0xff]  ;;  %1300 = vst [vmem:[#allocation2 + $0x40] sm:$0xff] %v1292_v19  ;;  %1494 = vmatmul.f32.gmra.mxu1 %v1292_v19  ;;  %v1363_v57 = vmul.f32 %v5408_v44, %v1307_v20  ;;  %1582 = vmatpush.msrb.mxu3 %v5424_v15  ;;  %v5432_v20 = vld [vmem:[#allocation12 + $0x30] sm:$0xff] }
 0x1ae   : > { %v1410_v43 = vmul.f32 %v5358_v48, %v1314_v8  ;;  %v5430_v19 = vld [vmem:[#allocation12 + $0x148] sm:$0xff]  ;;  %v5434_v8 = vld [vmem:[#allocation12 + $0xc0] sm:$0xff] }
 0x1af   : > { %1450 = vmatmul.f32.gmra.mxu0 %v1363_v57  ;;  %1662 = vmatpush.msrb.mxu1 %v5430_v19  ;;  %v5440_v57 = vld [vmem:[#allocation12 + $0x140] sm:$0xff] }
 0x1b0   : > { %1529 = vmatmul.f32.gmra.mxu2 %v1410_v43  ;;  %1583 = vmatpush.msrb.mxu3 %v5432_v20  ;;  %v5443_v43 = vld [vmem:[#allocation12 + $0x28] sm:$0xff]  ;;  %v5473_v48 = vld [vmem:[#allocation12] sm:$0xff] }
 0x1b1   : > { %1622 = vmatpush.msra.mxu0 %v5434_v8  ;;  %1663 = vmatpush.msrb.mxu1 %v5440_v57  ;;  %v5475_v44 = vld [vmem:[#allocation12 + $0xa0] sm:$0xff] }
 0x1b2   : > { %1584 = vmatpush.msrb.mxu3 %v5443_v43 }
 0x1b4   : > { %v1308_v3 = vld [vmem:[#allocation2 + $0x3f] sm:$0xff] }
 0x1b5   : > { %v1315_v56 = vld [vmem:[#allocation2 + $0x39] sm:$0xff]  ;;  %v1364_v6 = vmul.f32 %v5415_v33, %v1308_v3  ;;  %v1316_v41 = vld [vmem:[#allocation2 + $0x41] sm:$0xff] }
 0x1b6   : > { %v1411_v37 = vmul.f32 %v5401_v5, %v1315_v56  ;;  %v1412_v62 = vmul.f32 %v5419_v54, %v1316_v41  ;;  %v5446_v3 = vld [vmem:[#allocation12 + $0xb8] sm:$0xff]  ;;  %v5448_v56 = vld [vmem:[#allocation12 + $0x20] sm:$0xff]  ;;  %v5456_v41 = vld [vmem:[#allocation12 + $0xb0] sm:$0xff] }
 0x1b7   : > { %1453 = vmatmul.f32.gmra.mxu0 %v1364_v6  ;;  %v5450_v6 = vld [vmem:[#allocation12 + $0x138] sm:$0xff]  ;;  %1585 = vmatpush.msrb.mxu3 %v5448_v56  ;;  %v5464_v54 = vld [vmem:[#allocation12 + $0x130] sm:$0xff]  ;;  %v5467_v5 = vld [vmem:[#allocation12 + $0x8] sm:$0xff] }
 0x1b8   : > { %1532 = vmatmul.f32.gmra.mxu2 %v1411_v37  ;;  %1623 = vmatpush.msra.mxu0 %v5446_v3  ;;  %v5454_v37 = vld [vmem:[#allocation12 + $0x18] sm:$0xff]  ;;  %v5469_v33 = vld [vmem:[#allocation12 + $0xa8] sm:$0xff] }
 0x1b9   : > { %1664 = vmatpush.msrb.mxu1 %v5450_v6  ;;  %1586 = vmatpush.msrb.mxu3 %v5454_v37 }
 0x1ba   : > { %1624 = vmatpush.msra.mxu0 %v5456_v41 }
 0x1bb   : > { %1665 = vmatpush.msrb.mxu1 %v5464_v54 }
 0x1bc   : > { %1625 = vmatpush.msra.mxu0 %v5469_v33 }
 0x1bd   : > { %1666 = vmatpush.msrb.mxu1 %v5477_v45 }
 0x1be   : > { %1626 = vmatpush.msra.mxu0 %v5475_v44 }
 0x1bf   : > { %1667 = vmatpush.msrb.mxu1 %v5495_v1 }
 0x1c0   : > { %1535 = vmatmul.f32.gmra.mxu2 %v1412_v62  ;;  %v5461_v62 = vld [vmem:[#allocation12 + $0x10] sm:$0xff]  ;;  %1627 = vmatpush.msra.mxu0 %v5481_v28 }
 0x1c1   : > { %1587 = vmatpush.msrb.mxu3 %v5461_v62 }
 0x1c2   : > { %1628 = vmatpush.msra.mxu0 %v5487_v36 }
 0x1c3   : > { %1588 = vmatpush.msrb.mxu3 %v5467_v5 }
 0x1c4   : > { %1629 = vmatpush.msra.mxu0 %v5491_v31 }
 0x1c5   : > { %1589 = vmatpush.msrb.mxu3 %v5473_v48 }
 0x1c6   : > { %1590 = vmatmul.f32.vlgmr.msrb.gmra.mxu3 %v6714_v9  ;;  %1630 = vmatpush.msra.mxu0 %v5497_v16 }
 0x1c7   : > { %1778 = vmatpush.msra.mxu3 %v5028_v46  ;;  %v5501_v46 = vld [vmem:[#allocation12 + $0x118] sm:$0xff] }
 0x1c8   : > { %1819 = vmatpush.msrb.mxu0 %v5503_v38  ;;  %1668 = vmatpush.msrb.mxu1 %v5501_v46  ;;  %v5524_v38 = vld [vmem:[#allocation9 + $0x160] sm:$0xff] }
 0x1c9   : > { %1779 = vmatpush.msra.mxu3 %v5032_v49  ;;  %v5508_v49 = vld [vmem:[#allocation12 + $0x110] sm:$0xff]  ;;  %6719 = vst [vmem:[#allocation105_spill] sm:$0xff] %v5524_v38 }
 0x1ca   : > { %1669 = vmatpush.msrb.mxu1 %v5508_v49 }
 0x1cb   : > { %1780 = vmatpush.msra.mxu3 %v5036_v52  ;;  %v5510_v52 = vld [vmem:[#allocation9 + $0x170] sm:$0xff] }
 0x1cc   : > { %6716 = vst [vmem:[#allocation102_spill] sm:$0xff] %v5510_v52  ;;  %1820 = vmatpush.msrb.mxu0 %v5510_v52  ;;  %1670 = vmatpush.msrb.mxu1 %v5515_v34  ;;  %v5532_v52 = vld [vmem:[#allocation9 + $0x158] sm:$0xff] }
 0x1cd   : > { %1781 = vmatpush.msra.mxu3 %v5041_v55  ;;  %v5522_v55 = vld [vmem:[#allocation12 + $0x100] sm:$0xff]  ;;  %6721 = vst [vmem:[#allocation107_spill] sm:$0xff] %v5532_v52 }
 0x1ce   : > { %1821 = vmatpush.msrb.mxu0 %v5517_v2  ;;  %6718 = vst [vmem:[#allocation104_spill] sm:$0xff] %v5522_v55  ;;  %1671 = vmatpush.msrb.mxu1 %v5522_v55  ;;  %v5539_v2 = vld [vmem:[#allocation9 + $0x150] sm:$0xff]  ;;  %v5635_v55 = vld [vmem:[#allocation9 + $0x188] sm:$0xff] }
 0x1cf   : > { %1782 = vmatpush.msra.mxu3 %v5046_v59  ;;  %v5529_v59 = vld [vmem:[#allocation9 + $0x1f8] sm:$0xff]  ;;  %6723 = vst [vmem:[#allocation109_spill] sm:$0xff] %v5539_v2 }
 0x1d0   : > { %1822 = vmatpush.msrb.mxu0 %v5524_v38  ;;  %6720 = vst [vmem:[#allocation106_spill] sm:$0xff] %v5529_v59  ;;  %1860 = vmatpush.msra.mxu1 %v5529_v59  ;;  %v5543_v38 = vld [vmem:[#allocation9 + $0x1e8] sm:$0xff] }
 0x1d1   : > { %1783 = vmatpush.msra.mxu3 %v5051_v61  ;;  %v5536_v61 = vld [vmem:[#allocation9 + $0x1f0] sm:$0xff]  ;;  %6724 = vst [vmem:[#allocation110_spill] sm:$0xff] %v5543_v38 }
 0x1d2   : > { %1823 = vmatpush.msrb.mxu0 %v5532_v52  ;;  %6722 = vst [vmem:[#allocation108_spill] sm:$0xff] %v5536_v61  ;;  %1861 = vmatpush.msra.mxu1 %v5536_v61  ;;  %v5550_v52 = vld [vmem:[#allocation9 + $0x1e0] sm:$0xff] }
 0x1d3   : > { %1784 = vmatpush.msra.mxu3 %v5054_v63  ;;  %6726 = vst [vmem:[#allocation112_spill] sm:$0xff] %v5550_v52  ;;  %v5553_v61 = vld [vmem:[#allocation9 + $0x140] sm:$0xff] }
 0x1d4   : > { %1824 = vmatpush.msrb.mxu0 %v5539_v2  ;;  %1862 = vmatpush.msra.mxu1 %v5543_v38  ;;  %6727 = vst [vmem:[#allocation113_spill] sm:$0xff] %v5553_v61  ;;  %v5560_v2 = vld [vmem:[#allocation9 + $0x138] sm:$0xff] }
 0x1d5   : > { %1785 = vmatpush.msra.mxu3 %v5060_v7  ;;  %6729 = vst [vmem:[#allocation115_spill] sm:$0xff] %v5560_v2 }
 0x1d6   : > { %1825 = vmatpush.msrb.mxu0 %v5546_v30  ;;  %1863 = vmatpush.msra.mxu1 %v5550_v52  ;;  %v5569_v30 = vld [vmem:[#allocation9 + $0x1d0] sm:$0xff]  ;;  %v5584_v52 = vld [vmem:[#allocation9 + $0x1c0] sm:$0xff] }
 0x1d7   : > { %1786 = vmatpush.msra.mxu3 %v5065_v11  ;;  %v5557_v11 = vld [vmem:[#allocation9 + $0x1d8] sm:$0xff]  ;;  %6732 = vst [vmem:[#allocation116_spill] sm:$0xff] %v5569_v30 }
 0x1d8   : > { %1826 = vmatpush.msrb.mxu0 %v5553_v61  ;;  %6728 = vst [vmem:[#allocation114_spill] sm:$0xff] %v5557_v11  ;;  %1864 = vmatpush.msra.mxu1 %v5557_v11  ;;  %v5576_v61 = vld [vmem:[#allocation9 + $0x1c8] sm:$0xff] }
 0x1d9   : > { %1787 = vmatpush.msra.mxu3 %v5069_v14  ;;  %v5567_v14 = vld [vmem:[%s6730_s18] ss:$0 sm:$0xff]  ;;  %6734 = vst [vmem:[#allocation118_spill] sm:$0xff] %v5576_v61  ;;  %s3519_s18 = sshll.u32 %s6912_s10, 7 }
 0x1da   : > { %1827 = vmatpush.msrb.mxu0 %v5560_v2  ;;  %1865 = vmatpush.msra.mxu1 %v5569_v30  ;;  %6736 = vst [vmem:[#allocation120_spill] sm:$0xff] %v5584_v52  ;;  %s3244_s21 = sadd.s32 %s3519_s18, %s3518_s1 }
 0x1db   : > { %1788 = vmatpush.msra.mxu3 %v5072_v17  ;;  %v5572_v17 = vld [vmem:[#allocation9 + $0x130] sm:$0xff]  ;;  %s3520_s5 = sshll.u32 %s3244_s21, 3 }
 0x1dc   : > { %6733 = vst [vmem:[#allocation117_spill] sm:$0xff] %v5572_v17  ;;  %1828 = vmatpush.msrb.mxu0 %v5572_v17  ;;  %1866 = vmatpush.msra.mxu1 %v5576_v61  ;;  %v5587_v17 = vld [vmem:[#allocation9 + $0x120] sm:$0xff]  ;;  %v5598_v61 = vld [vmem:[#allocation9 + $0x1b0] sm:$0xff] }
 0x1dd   : > { %1789 = vmatpush.msra.mxu3 %v5076_v21  ;;  %v5579_v21 = vld [vmem:[#allocation9 + $0x128] sm:$0xff]  ;;  %6737 = vst [vmem:[#allocation121_spill] sm:$0xff] %v5587_v17 }
 0x1de   : > { %6735 = vst [vmem:[#allocation119_spill] sm:$0xff] %v5579_v21  ;;  %1829 = vmatpush.msrb.mxu0 %v5579_v21  ;;  %1867 = vmatpush.msra.mxu1 %v5584_v52  ;;  %v5594_v21 = vld [vmem:[#allocation9 + $0x118] sm:$0xff]  ;;  %v5601_v52 = vld [vmem:[#allocation9 + $0x110] sm:$0xff] }
 0x1df   : > { %1790 = vmatpush.msra.mxu3 %v5081_v26  ;;  %v5591_v26 = vld [vmem:[#allocation9 + $0x1b8] sm:$0xff]  ;;  %6739 = vst [vmem:[#allocation123_spill] sm:$0xff] %v5594_v21 }
 0x1e0   : > { %1830 = vmatpush.msrb.mxu0 %v5587_v17  ;;  %6738 = vst [vmem:[#allocation122_spill] sm:$0xff] %v5591_v26  ;;  %1868 = vmatpush.msra.mxu1 %v5591_v26  ;;  %v6743_v17 = vld [vmem:[#allocation54_spill] sm:$0xff]  ;;  %v5607_v26 = vld [vmem:[#allocation9 + $0x1a8] sm:$0xff] }
 0x1e1   : > { %1791 = vmatpush.msra.mxu3 %v5085_v29  ;;  %v6740_v29 = vld [vmem:[#allocation52_spill] sm:$0xff]  ;;  %6742 = vst [vmem:[#allocation124_spill] sm:$0xff] %v5601_v52 }
 0x1e2   : > { %1831 = vmatpush.msrb.mxu0 %v5594_v21  ;;  %6741 = vst [vmem:[#allocation52_spill] sm:$0xff] %v5598_v61  ;;  %1869 = vmatpush.msra.mxu1 %v5598_v61  ;;  %v5610_v21 = vld [vmem:[#allocation9 + $0x108] sm:$0xff]  ;;  %v5616_v61 = vld [vmem:[#allocation9 + $0x1a0] sm:$0xff] }
 0x1e3   : > { %1792 = vmatpush.msra.mxu3 %v5088_v32  ;;  %6745 = vst [vmem:[#allocation125_spill] sm:$0xff] %v5607_v26 }
 0x1e4   : > { %1832 = vmatpush.msrb.mxu0 %v5601_v52  ;;  %1870 = vmatpush.msra.mxu1 %v5607_v26  ;;  %6746 = vst [vmem:[#allocation126_spill] sm:$0xff] %v5610_v21 }
 0x1e5   : > { %1793 = vmatpush.msra.mxu3 %v6740_v29 }
 0x1e6   : > { %1833 = vmatpush.msrb.mxu0 %v5610_v21  ;;  %1871 = vmatpush.msra.mxu1 %v5616_v61  ;;  %v5623_v21 = vld [vmem:[#allocation9 + $0x198] sm:$0xff] }
 0x1e7   : > { %1990 = vmatpush.msrb.mxu3 %v6743_v17  ;;  %v5619_v17 = vld [vmem:[#allocation9 + $0x100] sm:$0xff] }
 0x1e8   : > { %6749 = vst [vmem:[#allocation127_spill] sm:$0xff] %v5619_v17  ;;  %1834 = vmatpush.msrb.mxu0 %v5619_v17  ;;  %1872 = vmatpush.msra.mxu1 %v5623_v21  ;;  %v6754_v17 = vld [vmem:[#allocation55_spill] sm:$0xff] }
 0x1f2   : > { %v1474_v63 = vpop.f32.mrf.mxu1 }
 0x1fa   : > { %v1477_v2 = vpop.f32.mrf.mxu1 }
 0x1fc   : > { %v1433_v7 = vpop.f32.mrf.mxu0 }
 0x1fd   : > { %v1434_v30 = vadd.f32 %v5567_v14, %v1433_v7 }
 0x1ff   : > { %v1475_v7 = vadd.f32 %v1474_v63, %v1434_v30  ;;  %v6747_v63 = vld [vmem:[#allocation56_spill] sm:$0xff] }
 0x200   : > { %1991 = vmatpush.msrb.mxu3 %v6747_v63  ;;  %6748 = vst [vmem:[#allocation56_spill] sm:$0xff] %v5616_v61  ;;  %v5628_v61 = vld [vmem:[#allocation9 + $0x190] sm:$0xff] }
 0x201   : > { %1873 = vmatpush.msra.mxu1 %v5628_v61 }
 0x203   : > { %1874 = vmatpush.msra.mxu1 %v5635_v55 }
 0x204   : > { %v1436_v11 = vpop.f32.mrf.mxu0 }
 0x205   : > { %v1437_v29 = vadd.f32 %v5567_v14, %v1436_v11  ;;  %v6751_v11 = vld [vmem:[#allocation53_spill] sm:$0xff] }
 0x207   : > { %v1478_v63 = vadd.f32 %v1477_v2, %v1437_v29  ;;  %v6759_v29 = vld [vmem:[#allocation64_spill] sm:$0xff] }
 0x20b   : > { %v1515_v32 = vpop.f32.mrf.mxu2 }
 0x20c   : > { %v5605_v38 = vadd.f32 %v1515_v32, %v1475_v7  ;;  %v1439_v30 = vpop.f32.mrf.mxu0  ;;  %v1480_v7 = vpop.f32.mrf.mxu1  ;;  %v6750_v32 = vld [vmem:[#allocation58_spill] sm:$0xff] }
 0x20d   : > { %1992 = vmatpush.msrb.mxu3 %v6750_v32  ;;  %6753 = vst [vmem:[#allocation58_spill] sm:$0xff] %v5628_v61  ;;  %v6756_v32 = vld [vmem:[#allocation62_spill] sm:$0xff]  ;;  %v1440_v2 = vadd.f32 %v5567_v14, %v1439_v30  ;;  %v5642_v61 = vld [vmem:[#allocation9 + $0x180] sm:$0xff] }
 0x20e   : > { %6744 = vst [vmem:[#allocation54_spill] sm:$0xff] %v5605_v38  ;;  %v1539_v52 = vmax.f32 %v5605_v38, 0.0  ;;  %v6752_v38 = vld [vmem:[#allocation60_spill] sm:$0xff]  ;;  %1875 = vmatpush.msra.mxu1 %v5642_v61 }
 0x20f   : > { %1993 = vmatpush.msrb.mxu3 %v6752_v38  ;;  %6757 = vst [vmem:[#allocation60_spill] sm:$0xff] %v5635_v55  ;;  %v6766_v55 = vld [vmem:[#allocation63_spill] sm:$0xff] }
 0x210   : > { %1631 = vmatmul.f32.vlgmr.msra.gmra.mxu0 %v1539_v52  ;;  %1593 = vmatmul.f32.gmra.mxu3 %v1539_v52  ;;  %6760 = vst [vmem:[#allocation55_spill] sm:$0xff] %v5642_v61  ;;  %v6767_v61 = vld [vmem:[#allocation69_spill] sm:$0xff] }
 0x211   : > { %2031 = vmatpush.msra.mxu0 %v6751_v11  ;;  %1994 = vmatpush.msrb.mxu3 %v6756_v32  ;;  %v6758_v11 = vld [vmem:[#allocation57_spill] sm:$0xff]  ;;  %v1481_v32 = vadd.f32 %v1480_v7, %v1440_v2 }
 0x212   : > { %v6768_v2 = vld [vmem:[#allocation65_spill] sm:$0xff] }
 0x213   : > { %v1518_v26 = vpop.f32.mrf.mxu2  ;;  %2032 = vmatpush.msra.mxu0 %v6754_v17  ;;  %1995 = vmatpush.msrb.mxu3 %v6759_v29 }
 0x214   : > { %v5632_v59 = vadd.f32 %v1518_v26, %v1478_v63  ;;  %v1442_v52 = vpop.f32.mrf.mxu0  ;;  %v6761_v26 = vld [vmem:[#allocation59_spill] sm:$0xff]  ;;  %v1483_v17 = vpop.f32.mrf.mxu1  ;;  %v6762_v63 = vld [vmem:[#allocation66_spill] sm:$0xff] }
 0x215   : > { %2033 = vmatpush.msra.mxu0 %v6758_v11  ;;  %1996 = vmatpush.msrb.mxu3 %v6762_v63  ;;  %v6763_v11 = vld [vmem:[#allocation61_spill] sm:$0xff]  ;;  %v6772_v63 = vld [vmem:[#allocation70_spill] sm:$0xff] }
 0x216   : > { %6755 = vst [vmem:[#allocation53_spill] sm:$0xff] %v5632_v59  ;;  %v1540_v38 = vmax.f32 %v5632_v59, 0.0  ;;  %v6764_v59 = vld [vmem:[#allocation68_spill] sm:$0xff] }
 0x217   : > { %2034 = vmatpush.msra.mxu0 %v6761_v26  ;;  %1997 = vmatpush.msrb.mxu3 %v6764_v59  ;;  %v6770_v59 = vld [vmem:[#allocation67_spill] sm:$0xff] }
 0x218   : > { %1634 = vmatmul.f32.gmra.mxu0 %v1540_v38  ;;  %1596 = vmatmul.f32.gmra.mxu3 %v1540_v38 }
 0x219   : > { %1672 = vmatmul.f32.vlgmr.msrb.gmra.mxu1 %v1540_v38  ;;  %2035 = vmatpush.msra.mxu0 %v6763_v11  ;;  %v1443_v38 = vadd.f32 %v5567_v14, %v1442_v52  ;;  %v6775_v11 = vld [vmem:[#allocation73_spill] sm:$0xff] }
 0x21a   : > { %2104 = vmatpush.msrb.mxu1 %v5340_v40  ;;  %1998 = vmatpush.msrb.mxu3 %v6767_v61  ;;  %v6769_v40 = vld [vmem:[#allocation71_spill] sm:$0xff] }
 0x21b   : > { %v1521_v30 = vpop.f32.mrf.mxu2  ;;  %2036 = vmatpush.msra.mxu0 %v6766_v55  ;;  %v1484_v55 = vadd.f32 %v1483_v17, %v1443_v38  ;;  %v6776_v38 = vld [vmem:[#allocation75_spill] sm:$0xff] }
 0x21c   : > { %v5650_v29 = vadd.f32 %v1521_v30, %v1481_v32  ;;  %2105 = vmatpush.msrb.mxu1 %v5342_v50  ;;  %v1445_v26 = vpop.f32.mrf.mxu0  ;;  %1999 = vmatpush.msrb.mxu3 %v6769_v40  ;;  %v6771_v50 = vld [vmem:[#allocation72_spill] sm:$0xff]  ;;  %v1486_v61 = vpop.f32.mrf.mxu1  ;;  %v6778_v40 = vld [vmem:[#allocation77_spill] sm:$0xff] }
 0x21d   : > { %2037 = vmatpush.msra.mxu0 %v6768_v2  ;;  %v1446_v30 = vadd.f32 %v5567_v14, %v1445_v26  ;;  %v1705_v2 = vld [vmem:[%s4921_s24] sm:$0xff] }
 0x21e   : > { %6765 = vst [vmem:[#allocation62_spill] sm:$0xff] %v5650_v29  ;;  %v1541_v7 = vmax.f32 %v5650_v29, 0.0  ;;  %2106 = vmatpush.msrb.mxu1 %v5350_v25  ;;  %2000 = vmatpush.msrb.mxu3 %v6771_v50  ;;  %v6774_v25 = vld [vmem:[#allocation74_spill] sm:$0xff]  ;;  %v6782_v50 = vld [vmem:[#allocation81_spill] sm:$0xff] }
 0x21f   : > { %2038 = vmatpush.msra.mxu0 %v6770_v59  ;;  %1753 = vmatmul.f32.vlgmr.msra.gmra.mxu2 %v1705_v2  ;;  %v6779_v59 = vld [vmem:[#allocation80_spill] sm:$0xff] }
 0x220   : > { %1637 = vmatmul.f32.gmra.mxu0 %v1541_v7  ;;  %1599 = vmatmul.f32.gmra.mxu3 %v1541_v7 }
 0x221   : > { %1675 = vmatmul.f32.gmra.mxu1 %v1541_v7  ;;  %2039 = vmatpush.msra.mxu0 %v6772_v63  ;;  %v6777_v7 = vld [vmem:[#allocation76_spill] sm:$0xff]  ;;  %v6783_v63 = vld [vmem:[#allocation79_spill] sm:$0xff] }
 0x222   : > { %2107 = vmatpush.msrb.mxu1 %v5368_v53  ;;  %2001 = vmatpush.msrb.mxu3 %v6774_v25 }
 0x223   : > { %v1524_v52 = vpop.f32.mrf.mxu2  ;;  %2040 = vmatpush.msra.mxu0 %v6775_v11  ;;  %2145 = vmatpush.msra.mxu2 %v5345_v22  ;;  %v6784_v11 = vld [vmem:[#allocation82_spill] sm:$0xff] }
 0x224   : > { %v5664_v32 = vadd.f32 %v1524_v52, %v1484_v55  ;;  %2108 = vmatpush.msrb.mxu1 %v5378_v60  ;;  %2002 = vmatpush.msrb.mxu3 %v6776_v38  ;;  %v1448_v53 = vpop.f32.mrf.mxu0  ;;  %v1487_v60 = vadd.f32 %v1486_v61, %v1446_v30  ;;  %v6780_v55 = vld [vmem:[#allocation78_spill] sm:$0xff]  ;;  %v1489_v52 = vpop.f32.mrf.mxu1  ;;  %v6785_v30 = vld [vmem:[#allocation83_spill] sm:$0xff]  ;;  %v6786_v38 = vld [vmem:[#allocation84_spill] sm:$0xff] }
 0x225   : > { %2041 = vmatpush.msra.mxu0 %v6777_v7  ;;  %2146 = vmatpush.msra.mxu2 %v5354_v12  ;;  %v1449_v61 = vadd.f32 %v5567_v14, %v1448_v53 }
 0x226   : > { %6773 = vst [vmem:[#allocation57_spill] sm:$0xff] %v5664_v32  ;;  %v1542_v17 = vmax.f32 %v5664_v32, 0.0  ;;  %2109 = vmatpush.msrb.mxu1 %v5387_v39  ;;  %2003 = vmatpush.msrb.mxu3 %v6778_v40  ;;  %v1712_v40 = vld [vmem:[%s4921_s24 + $0x38] sm:$0xff] }
 0x227   : > { %2042 = vmatpush.msra.mxu0 %v6779_v59  ;;  %2147 = vmatpush.msra.mxu2 %v5361_v23  ;;  %v3839_v59 = vld [vmem:[#allocation9 + $0x48] sm:$0xff] }
 0x228   : > { %1640 = vmatmul.f32.gmra.mxu0 %v1542_v17  ;;  %1602 = vmatmul.f32.gmra.mxu3 %v1542_v17 }
 0x229   : > { %1678 = vmatmul.f32.gmra.mxu1 %v1542_v17  ;;  %2004 = vmatpush.msrb.mxu3 %v6780_v55  ;;  %v1490_v17 = vadd.f32 %v1489_v52, %v1449_v61  ;;  %v1719_v55 = vld [vmem:[%s4921_s24 + $0x70] sm:$0xff]  ;;  %v1716_v52 = vld [vmem:[%s4921_s24 + $0x58] sm:$0xff] }
 0x22a   : > { %2043 = vmatpush.msra.mxu0 %v6782_v50  ;;  %2110 = vmatpush.msrb.mxu1 %v5396_v13  ;;  %v1709_v13 = vld [vmem:[%s4921_s24 + $0x20] sm:$0xff]  ;;  %v3843_v61 = vld [vmem:[#allocation9 + $0x38] sm:$0xff] }
 0x22b   : > { %v1527_v26 = vpop.f32.mrf.mxu2  ;;  %2005 = vmatpush.msrb.mxu3 %v6783_v63  ;;  %1756 = vmatmul.f32.gmra.mxu2 %v1709_v13  ;;  %v3841_v50 = vld [vmem:[#allocation9 + $0x40] sm:$0xff]  ;;  %v3842_v63 = vld [vmem:[#allocation9 + $0xd0] sm:$0xff] }
 0x22c   : > { %v5679_v39 = vadd.f32 %v1527_v26, %v1487_v60  ;;  %2044 = vmatpush.msra.mxu0 %v6784_v11  ;;  %2111 = vmatpush.msrb.mxu1 %v5406_v58  ;;  %v1451_v22 = vpop.f32.mrf.mxu0  ;;  %v1492_v7 = vpop.f32.mrf.mxu1  ;;  %v3836_v60 = vld [vmem:[#allocation9 + $0xe8] sm:$0xff]  ;;  %v3840_v26 = vld [vmem:[#allocation9 + $0xd8] sm:$0xff]  ;;  %v3847_v11 = vld [vmem:[#allocation9 + $0xc0] sm:$0xff] }
 0x22d   : > { %2148 = vmatpush.msra.mxu2 %v5381_v35  ;;  %v1452_v23 = vadd.f32 %v5567_v14, %v1451_v22  ;;  %v1726_v22 = vld [vmem:[%s4921_s24 + $0xa8] sm:$0xff]  ;;  %v1723_v13 = vld [vmem:[%s4921_s24 + $0x90] sm:$0xff] }
 0x22e   : > { %6781 = vst [vmem:[#allocation64_spill] sm:$0xff] %v5679_v39  ;;  %v1543_v25 = vmax.f32 %v5679_v39, 0.0  ;;  %2045 = vmatpush.msra.mxu0 %v6785_v30  ;;  %2112 = vmatpush.msrb.mxu1 %v5424_v15  ;;  %v1713_v15 = vld [vmem:[%s4921_s24 + $0x40] sm:$0xff] }
 0x22f   : > { %2149 = vmatpush.msra.mxu2 %v5389_v18  ;;  %v1493_v35 = vadd.f32 %v1492_v7, %v1452_v23  ;;  %v3848_v30 = vld [vmem:[#allocation9 + $0x20] sm:$0xff]  ;;  %v3851_v23 = vld [vmem:[#allocation9 + $0x10] sm:$0xff]  ;;  %v3853_v7 = vld [vmem:[#allocation9 + $0x8] sm:$0xff] }
 0x230   : > { %1643 = vmatmul.f32.gmra.mxu0 %v1543_v25  ;;  %1605 = vmatmul.f32.gmra.mxu3 %v1543_v25 }
 0x231   : > { %1681 = vmatmul.f32.gmra.mxu1 %v1543_v25  ;;  %2046 = vmatpush.msra.mxu0 %v6786_v38  ;;  %v3845_v25 = vld [vmem:[#allocation9 + $0xc8] sm:$0xff]  ;;  %v3850_v38 = vld [vmem:[#allocation9 + $0x18] sm:$0xff] }
 0x232   : > { %2113 = vmatpush.msrb.mxu1 %v5432_v20  ;;  %2150 = vmatpush.msra.mxu2 %v5398_v24 }
 0x233   : > { %v1530_v12 = vpop.f32.mrf.mxu2  ;;  %1759 = vmatmul.f32.gmra.mxu2 %v1713_v15  ;;  %v3854_v15 = vld [vmem:[#allocation9 + $0xa8] sm:$0xff] }
 0x234   : > { %v5695_v58 = vadd.f32 %v1530_v12, %v1490_v17  ;;  %2114 = vmatpush.msrb.mxu1 %v5443_v43  ;;  %2151 = vmatpush.msra.mxu2 %v5426_v42  ;;  %v1454_v18 = vpop.f32.mrf.mxu0  ;;  %v1495_v42 = vpop.f32.mrf.mxu1  ;;  %v1720_v17 = vld [vmem:[%s4921_s24 + $0x78] sm:$0xff] }
 0x235   : > { %v1455_v24 = vadd.f32 %v5567_v14, %v1454_v18  ;;  %v3849_v12 = vld [vmem:[#allocation9 + $0xb8] sm:$0xff]  ;;  %v1727_v18 = vld [vmem:[%s4921_s24 + $0xb0] sm:$0xff] }
 0x236   : > { %6787 = vst [vmem:[#allocation59_spill] sm:$0xff] %v5695_v58  ;;  %v1544_v53 = vmax.f32 %v5695_v58, 0.0  ;;  %2115 = vmatpush.msrb.mxu1 %v5448_v56  ;;  %2152 = vmatpush.msra.mxu2 %v5434_v8  ;;  %v1717_v8 = vld [vmem:[%s4921_s24 + $0x60] sm:$0xff] }
 0x237   : > { %v1496_v56 = vadd.f32 %v1495_v42, %v1455_v24  ;;  %v1724_v24 = vld [vmem:[%s4921_s24 + $0x98] sm:$0xff] }
 0x238   : > { %1646 = vmatmul.f32.gmra.mxu0 %v1544_v53  ;;  %1608 = vmatmul.f32.gmra.mxu3 %v1544_v53  ;;  %v3857_v42 = vld [vmem:[#allocation9 + $0x98] sm:$0xff] }
 0x239   : > { %1684 = vmatmul.f32.gmra.mxu1 %v1544_v53  ;;  %2153 = vmatpush.msra.mxu2 %v5446_v3  ;;  %v3852_v53 = vld [vmem:[#allocation9 + $0xb0] sm:$0xff] }
 0x23a   : > { %2116 = vmatpush.msrb.mxu1 %v5454_v37 }
 0x23b   : > { %v1533_v20 = vpop.f32.mrf.mxu2  ;;  %2154 = vmatpush.msra.mxu2 %v5456_v41  ;;  %v1706_v41 = vld [vmem:[%s4921_s24 + $0x8] sm:$0xff] }
 0x23c   : > { %v5707_v2 = vadd.f32 %v1533_v20, %v1493_v35  ;;  %2117 = vmatpush.msrb.mxu1 %v5461_v62  ;;  %1762 = vmatmul.f32.gmra.mxu2 %v1717_v8  ;;  %v1730_v35 = vld [vmem:[%s4921_s24 + $0xc8] sm:$0xff]  ;;  %v3855_v20 = vld [vmem:[#allocation9] sm:$0xff]  ;;  %v3858_v8 = vld [vmem:[#allocation9 + $0x90] sm:$0xff] }
 0x23d   : > { %2155 = vmatpush.msra.mxu2 %v5469_v33  ;;  %v3834_v33 = vld [vmem:[#allocation9 + $0xf0] sm:$0xff] }
 0x23e   : > { %6788 = vst [vmem:[#allocation66_spill] sm:$0xff] %v5707_v2  ;;  %v1545_v43 = vmax.f32 %v5707_v2, 0.0  ;;  %2118 = vmatpush.msrb.mxu1 %v5467_v5  ;;  %v1721_v5 = vld [vmem:[%s4921_s24 + $0x80] sm:$0xff] }
 0x23f   : > { %2156 = vmatpush.msra.mxu2 %v5475_v44  ;;  %v1707_v44 = vld [vmem:[%s4921_s24 + $0x10] sm:$0xff]  ;;  %v3920_v2 = vld [vmem:[#allocation11 + $0x100] sm:$0xff] }
 0x240   : > { %1649 = vmatmul.f32.gmra.mxu0 %v1545_v43  ;;  %1611 = vmatmul.f32.gmra.mxu3 %v1545_v43 }
 0x241   : > { %1687 = vmatmul.f32.gmra.mxu1 %v1545_v43  ;;  %2157 = vmatpush.msra.mxu2 %v5481_v28  ;;  %v1708_v28 = vld [vmem:[%s4921_s24 + $0x18] sm:$0xff]  ;;  %v3856_v43 = vld [vmem:[#allocation9 + $0xa0] sm:$0xff] }
 0x242   : > { %2119 = vmatpush.msrb.mxu1 %v5473_v48  ;;  %v1710_v48 = vld [vmem:[%s4921_s24 + $0x28] sm:$0xff] }
 0x243   : > { %v1536_v3 = vpop.f32.mrf.mxu2  ;;  %2158 = vmatpush.msra.mxu2 %v5487_v36  ;;  %v1725_v36 = vld [vmem:[%s4921_s24 + $0xa0] sm:$0xff] }
 0x244   : > { %v5719_v37 = vadd.f32 %v1536_v3, %v1496_v56  ;;  %1765 = vmatmul.f32.gmra.mxu2 %v1721_v5  ;;  %v1734_v56 = vld [vmem:[%s4921_s24 + $0xe8] sm:$0xff]  ;;  %v1731_v3 = vld [vmem:[%s4921_s24 + $0xd0] sm:$0xff]  ;;  %v3860_v5 = vld [vmem:[#allocation9 + $0x80] sm:$0xff] }
 0x245   : > { %2159 = vmatpush.msra.mxu2 %v5491_v31  ;;  %v3829_v31 = vld [vmem:[#allocation9 + $0x78] sm:$0xff] }
 0x246   : > { %6789 = vst [vmem:[#allocation61_spill] sm:$0xff] %v5719_v37  ;;  %v1546_v62 = vmax.f32 %v5719_v37, 0.0 }
 0x247   : > { %2160 = vmatpush.msra.mxu2 %v5497_v16  ;;  %v1711_v16 = vld [vmem:[%s4921_s24 + $0x30] sm:$0xff] }
 0x248   : > { %1652 = vmatmul.f32.gmra.mxu0 %v1546_v62  ;;  %1794 = vmatmul.f32.vlgmr.msra.gmra.mxu3 %v1706_v41  ;;  %v1728_v41 = vld [vmem:[%s4921_s24 + $0xb8] sm:$0xff] }
 0x249   : > { %1690 = vmatmul.f32.gmra.mxu1 %v1546_v62  ;;  %2186 = vmatpush.msra.mxu3 %v5347_v27  ;;  %v3830_v27 = vld [vmem:[#allocation9 + $0x70] sm:$0xff]  ;;  %v3859_v62 = vld [vmem:[#allocation9 + $0x88] sm:$0xff] }
 0x24b   : > { %2187 = vmatpush.msra.mxu3 %v5356_v47  ;;  %v1714_v47 = vld [vmem:[%s4921_s24 + $0x48] sm:$0xff] }
 0x24c   : > { %1768 = vmatmul.f32.gmra.mxu2 %v1725_v36  ;;  %v5771_v36 = vpop.f32.mrf.mxu3 }
 0x24d   : > { %2188 = vmatpush.msra.mxu3 %v5372_v0  ;;  %v3831_v0 = vld [vmem:[#allocation9 + $0x68] sm:$0xff]  ;;  %6791 = vst [vmem:[#allocation68_spill] sm:$0xff] %v5771_v36 }
 0x24f   : > { %2189 = vmatpush.msra.mxu3 %v5385_v51  ;;  %v3832_v51 = vld [vmem:[#allocation9 + $0xf8] sm:$0xff] }
 0x250   : > { %1797 = vmatmul.f32.gmra.mxu3 %v1710_v48  ;;  %1835 = vmatmul.f32.vlgmr.msrb.gmra.mxu0 %v1707_v44  ;;  %v1735_v48 = vld [vmem:[%s4921_s24 + $0xf0] sm:$0xff]  ;;  %v1732_v44 = vld [vmem:[%s4921_s24 + $0xd8] sm:$0xff] }
 0x251   : > { %1693 = vmatmul.f32.gmra.mxu1 %v6714_v9  ;;  %2190 = vmatpush.msra.mxu3 %v5393_v10  ;;  %v1729_v9 = vld [vmem:[%s4921_s24 + $0xc0] sm:$0xff] }
 0x252   : > { %2267 = vmatpush.msrb.mxu0 %v3829_v31  ;;  %v3833_v10 = vld [vmem:[#allocation9 + $0x60] sm:$0xff] }
 0x253   : > { %2191 = vmatpush.msra.mxu3 %v5422_v4  ;;  %v1718_v4 = vld [vmem:[%s4921_s24 + $0x68] sm:$0xff] }
 0x254   : > { %2268 = vmatpush.msrb.mxu0 %v3830_v27  ;;  %1771 = vmatmul.f32.gmra.mxu2 %v1729_v9  ;;  %v1736_v27 = vld [vmem:[%s4921_s24 + $0xf8] sm:$0xff] }
 0x255   : > { %2192 = vmatpush.msra.mxu3 %v5430_v19  ;;  %v1715_v19 = vld [vmem:[%s4921_s24 + $0x50] sm:$0xff]  ;;  %v3862_v9 = vld [vmem:[#allocation11 + $0xf8] sm:$0xff] }
 0x256   : > { %2269 = vmatpush.msrb.mxu0 %v3831_v0  ;;  %v5782_v0 = vld [vmem:[#allocation2] sm:$0xff] }
 0x257   : > { %2193 = vmatpush.msra.mxu3 %v5440_v57  ;;  %v3835_v57 = vld [vmem:[#allocation9 + $0x58] sm:$0xff] }
 0x258   : > { %1800 = vmatmul.f32.gmra.mxu3 %v1714_v47  ;;  %1838 = vmatmul.f32.gmra.mxu0 %v1711_v16 }
 0x259   : > { %1876 = vmatmul.f32.vlgmr.msra.gmra.mxu1 %v1708_v28  ;;  %2194 = vmatpush.msra.mxu3 %v5450_v6  ;;  %v3837_v6 = vld [vmem:[#allocation9 + $0x50] sm:$0xff] }
 0x25a   : > { %2308 = vmatpush.msra.mxu1 %v3832_v51  ;;  %2270 = vmatpush.msrb.mxu0 %v3833_v10  ;;  %v3863_v10 = vld [vmem:[#allocation11 + $0xf0] sm:$0xff] }
 0x25b   : > { %2195 = vmatpush.msra.mxu3 %v5464_v54  ;;  %v1733_v54 = vld [vmem:[%s4921_s24 + $0xe0] sm:$0xff] }
 0x25c   : > { %2309 = vmatpush.msra.mxu1 %v3834_v33  ;;  %2271 = vmatpush.msrb.mxu0 %v3835_v57  ;;  %v3865_v57 = vld [vmem:[#allocation11 + $0xe0] sm:$0xff] }
 0x25d   : > { %2196 = vmatpush.msra.mxu3 %v5477_v45  ;;  %1774 = vmatmul.f32.gmra.mxu2 %v1733_v54  ;;  %v3838_v45 = vld [vmem:[#allocation9 + $0xe0] sm:$0xff] }
 0x25e   : > { %2310 = vmatpush.msra.mxu1 %v3836_v60  ;;  %2272 = vmatpush.msrb.mxu0 %v3837_v6  ;;  %v3867_v6 = vld [vmem:[#allocation11 + $0xd0] sm:$0xff] }
 0x25f   : > { %2197 = vmatpush.msra.mxu3 %v5495_v1  ;;  %v1722_v1 = vld [vmem:[%s4921_s24 + $0x88] sm:$0xff]  ;;  %s6913_s24 = sld [smem:[#allocation146_spill]] }
 0x260   : > { %1803 = vmatmul.f32.gmra.mxu3 %v1718_v4  ;;  %1841 = vmatmul.f32.gmra.mxu0 %v1715_v19  ;;  %v3864_v19 = vld [vmem:[#allocation11 + $0xe8] sm:$0xff] }
 0x261   : > { %1879 = vmatmul.f32.gmra.mxu1 %v1712_v40  ;;  %2198 = vmatpush.msra.mxu3 %v5501_v46  ;;  %v6790_v46 = vld [vmem:[#allocation104_spill] sm:$0xff]  ;;  %v3866_v40 = vld [vmem:[#allocation11 + $0xd8] sm:$0xff] }
 0x262   : > { %2311 = vmatpush.msra.mxu1 %v3838_v45  ;;  %2273 = vmatpush.msrb.mxu0 %v3839_v59  ;;  %v3868_v59 = vld [vmem:[#allocation11 + $0xc8] sm:$0xff] }
 0x263   : > { %2199 = vmatpush.msra.mxu3 %v5508_v49  ;;  %v3844_v49 = vld [vmem:[#allocation9 + $0x30] sm:$0xff] }
 0x264   : > { %2312 = vmatpush.msra.mxu1 %v3840_v26  ;;  %2274 = vmatpush.msrb.mxu0 %v3841_v50  ;;  %v3869_v26 = vld [vmem:[#allocation11 + $0xc0] sm:$0xff]  ;;  %v3871_v50 = vld [vmem:[#allocation11 + $0xb0] sm:$0xff] }
 0x265   : > { %2200 = vmatpush.msra.mxu3 %v5515_v34  ;;  %v3846_v34 = vld [vmem:[#allocation9 + $0x28] sm:$0xff]  ;;  %s6914_s8 = smov %s6913_s24  ;;  %s3246_s11 = scalar_lea.hbm %s6913_s24, %s3520_s5 }
 0x266   : > { %2313 = vmatpush.msra.mxu1 %v3842_v63  ;;  %2275 = vmatpush.msrb.mxu0 %v3843_v61  ;;  %v3873_v61 = vld [vmem:[#allocation11 + $0xa0] sm:$0xff] }
 0x267   : > { %2201 = vmatpush.msra.mxu3 %v6790_v46  ;;  %v3872_v46 = vld [vmem:[#allocation11 + $0xa8] sm:$0xff] }
 0x268   : > { %1806 = vmatmul.f32.gmra.mxu3 %v1722_v1  ;;  %1844 = vmatmul.f32.gmra.mxu0 %v1719_v55  ;;  %v3870_v1 = vld [vmem:[#allocation11 + $0xb8] sm:$0xff] }
 0x269   : > { %1882 = vmatmul.f32.gmra.mxu1 %v1716_v52  ;;  %2276 = vmatpush.msrb.mxu0 %v3844_v49  ;;  %v3874_v49 = vld [vmem:[#allocation11 + $0x98] sm:$0xff] }
 0x26a   : > { %2314 = vmatpush.msra.mxu1 %v3845_v25 }
 0x26b   : > { %2277 = vmatpush.msrb.mxu0 %v3846_v34  ;;  %v3875_v34 = vld [vmem:[#allocation11 + $0x90] sm:$0xff] }
 0x26c   : > { %2315 = vmatpush.msra.mxu1 %v3847_v11 }
 0x26d   : > { %2278 = vmatpush.msrb.mxu0 %v3848_v30  ;;  %v3877_v30 = vld [vmem:[#allocation11 + $0x80] sm:$0xff] }
 0x26e   : > { %2316 = vmatpush.msra.mxu1 %v3849_v12 }
 0x26f   : > { %2279 = vmatpush.msrb.mxu0 %v3850_v38 }
 0x270   : > { %1809 = vmatmul.f32.gmra.mxu3 %v1726_v22  ;;  %1847 = vmatmul.f32.gmra.mxu0 %v1723_v13  ;;  %v3876_v13 = vld [vmem:[#allocation11 + $0x88] sm:$0xff] }
 0x271   : > { %1885 = vmatmul.f32.gmra.mxu1 %v1720_v17  ;;  %2280 = vmatpush.msrb.mxu0 %v3851_v23 }
 0x272   : > { %2317 = vmatpush.msra.mxu1 %v3852_v53 }
 0x273   : > { %2281 = vmatpush.msrb.mxu0 %v3853_v7 }
 0x274   : > { %2318 = vmatpush.msra.mxu1 %v3854_v15 }
 0x275   : > { %2282 = vmatpush.msrb.mxu0 %v3855_v20 }
 0x276   : > { %2319 = vmatpush.msra.mxu1 %v3856_v43 }
 0x278   : > { %1812 = vmatmul.f32.gmra.mxu3 %v1730_v35  ;;  %1850 = vmatmul.f32.gmra.mxu0 %v1727_v18  ;;  %v5824_v18 = vld [vmem:[%s6697_s0] ss:$0 sm:$0xff] }
 0x279   : > { %1888 = vmatmul.f32.gmra.mxu1 %v1724_v24 }
 0x27a   : > { %2320 = vmatpush.msra.mxu1 %v3857_v42 }
 0x27c   : > { %2321 = vmatpush.msra.mxu1 %v3858_v8 }
 0x27e   : > { %2322 = vmatpush.msra.mxu1 %v3859_v62 }
 0x280   : > { %1815 = vmatmul.f32.gmra.mxu3 %v1734_v56  ;;  %1853 = vmatmul.f32.gmra.mxu0 %v1731_v3 }
 0x281   : > { %1891 = vmatmul.f32.gmra.mxu1 %v1728_v41 }
 0x282   : > { %2323 = vmatpush.msra.mxu1 %v3860_v5 }
 0x288   : > { %1856 = vmatmul.f32.gmra.mxu0 %v1735_v48 }
 0x289   : > { %1894 = vmatmul.f32.gmra.mxu1 %v1732_v44 }
 0x28d   : > { %v5773_v31 = vpop.f32.mrf.mxu0 }
 0x28e   : > { %6792 = vst [vmem:[#allocation63_spill] sm:$0xff] %v5773_v31 }
 0x291   : > { %1897 = vmatmul.f32.gmra.mxu1 %v1736_v27 }
 0x293   : > { %v5776_v47 = vpop.f32.mrf.mxu3 }
 0x294   : > { %6793 = vst [vmem:[#allocation69_spill] sm:$0xff] %v5776_v47 }
 0x295   : > { %v5778_v16 = vpop.f32.mrf.mxu0 }
 0x296   : > { %6794 = vst [vmem:[#allocation65_spill] sm:$0xff] %v5778_v16  ;;  %v5780_v28 = vpop.f32.mrf.mxu1 }
 0x297   : > { %6795 = vst [vmem:[#allocation71_spill] sm:$0xff] %v5780_v28 }
 0x299   : > { %2120 = vmatmul.f32.vlgmr.msrb.gmra.mxu1 %v5782_v0 }
 0x29a   : > { %2520 = vmatpush.msrb.mxu1 %v3862_v9 }
 0x29b   : > { %v5785_v51 = vpop.f32.mrf.mxu3 }
 0x29c   : > { %6796 = vst [vmem:[#allocation67_spill] sm:$0xff] %v5785_v51  ;;  %2521 = vmatpush.msrb.mxu1 %v3863_v10 }
 0x29d   : > { %v5787_v33 = vpop.f32.mrf.mxu0 }
 0x29e   : > { %6797 = vst [vmem:[#allocation72_spill] sm:$0xff] %v5787_v33  ;;  %v5789_v4 = vpop.f32.mrf.mxu1  ;;  %2522 = vmatpush.msrb.mxu1 %v3864_v19 }
 0x29f   : > { %6798 = vst [vmem:[#allocation70_spill] sm:$0xff] %v5789_v4 }
 0x2a0   : > { %2523 = vmatpush.msrb.mxu1 %v3865_v57 }
 0x2a2   : > { %2524 = vmatpush.msrb.mxu1 %v3866_v40  ;;  %v1754_v17 = vpop.f32.mrf.mxu2 }
 0x2a3   : > { %v5791_v60 = vpop.f32.mrf.mxu3  ;;  %v1755_v20 = vadd.f32 %v5824_v18, %v1754_v17 }
 0x2a4   : > { %6799 = vst [vmem:[#allocation74_spill] sm:$0xff] %v5791_v60  ;;  %2525 = vmatpush.msrb.mxu1 %v3867_v6  ;;  %v6815_v6 = vld [vmem:[#allocation106_spill] sm:$0xff] }
 0x2a5   : > { %v5793_v54 = vpop.f32.mrf.mxu0 }
 0x2a6   : > { %6800 = vst [vmem:[#allocation73_spill] sm:$0xff] %v5793_v54  ;;  %v5795_v45 = vpop.f32.mrf.mxu1  ;;  %2526 = vmatpush.msrb.mxu1 %v3868_v59 }
 0x2a7   : > { %6801 = vst [vmem:[#allocation75_spill] sm:$0xff] %v5795_v45 }
 0x2a8   : > { %2527 = vmatpush.msrb.mxu1 %v3869_v26 }
 0x2aa   : > { %2528 = vmatpush.msrb.mxu1 %v3870_v1  ;;  %v6816_v1 = vld [vmem:[#allocation108_spill] sm:$0xff] }
 0x2ab   : > { %v5797_v55 = vpop.f32.mrf.mxu3 }
 0x2ac   : > { %6802 = vst [vmem:[#allocation76_spill] sm:$0xff] %v5797_v55  ;;  %2529 = vmatpush.msrb.mxu1 %v3871_v50 }
 0x2ad   : > { %v5799_v52 = vpop.f32.mrf.mxu0 }
 0x2ae   : > { %6803 = vst [vmem:[#allocation77_spill] sm:$0xff] %v5799_v52  ;;  %v5801_v63 = vpop.f32.mrf.mxu1  ;;  %2530 = vmatpush.msrb.mxu1 %v3872_v46  ;;  %v1757_v7 = vpop.f32.mrf.mxu2 }
 0x2af   : > { %6804 = vst [vmem:[#allocation80_spill] sm:$0xff] %v5801_v63  ;;  %v1758_v41 = vadd.f32 %v5824_v18, %v1757_v7  ;;  %v6819_v7 = vld [vmem:[#allocation87_spill] sm:$0xff] }
 0x2b0   : > { %2531 = vmatpush.msrb.mxu1 %v3873_v61  ;;  %v6817_v61 = vld [vmem:[#allocation110_spill] sm:$0xff] }
 0x2b2   : > { %2532 = vmatpush.msrb.mxu1 %v3874_v49 }
 0x2b3   : > { %v5803_v25 = vpop.f32.mrf.mxu3 }
 0x2b4   : > { %6805 = vst [vmem:[#allocation78_spill] sm:$0xff] %v5803_v25  ;;  %2533 = vmatpush.msrb.mxu1 %v3875_v34 }
 0x2b5   : > { %v5805_v11 = vpop.f32.mrf.mxu0 }
 0x2b6   : > { %6806 = vst [vmem:[#allocation81_spill] sm:$0xff] %v5805_v11  ;;  %v5807_v22 = vpop.f32.mrf.mxu1  ;;  %2534 = vmatpush.msrb.mxu1 %v3876_v13  ;;  %v1760_v42 = vpop.f32.mrf.mxu2 }
 0x2b7   : > { %6807 = vst [vmem:[#allocation79_spill] sm:$0xff] %v5807_v22  ;;  %v1761_v57 = vadd.f32 %v5824_v18, %v1760_v42  ;;  %v6820_v42 = vld [vmem:[#allocation114_spill] sm:$0xff] }
 0x2b8   : > { %2535 = vmatpush.msrb.mxu1 %v3877_v30  ;;  %v6818_v30 = vld [vmem:[#allocation112_spill] sm:$0xff] }
 0x2bb   : > { %v5809_v12 = vpop.f32.mrf.mxu3 }
 0x2bc   : > { %6808 = vst [vmem:[#allocation82_spill] sm:$0xff] %v5809_v12 }
 0x2bd   : > { %v5811_v38 = vpop.f32.mrf.mxu0 }
 0x2be   : > { %6809 = vst [vmem:[#allocation83_spill] sm:$0xff] %v5811_v38  ;;  %v5813_v23 = vpop.f32.mrf.mxu1 }
 0x2bf   : > { %6810 = vst [vmem:[#allocation84_spill] sm:$0xff] %v5813_v23  ;;  %v1763_v9 = vpop.f32.mrf.mxu2 }
 0x2c3   : > { %v5815_v53 = vpop.f32.mrf.mxu3 }
 0x2c4   : > { %6811 = vst [vmem:[#allocation104_spill] sm:$0xff] %v5815_v53  ;;  %v3926_v53 = vld [vmem:[#allocation12 + $0xe8] sm:$0xff] }
 0x2c5   : > { %v5817_v15 = vpop.f32.mrf.mxu0 }
 0x2c6   : > { %6812 = vst [vmem:[#allocation128_spill] sm:$0xff] %v5817_v15  ;;  %v5819_v35 = vpop.f32.mrf.mxu1  ;;  %v3906_v15 = vld [vmem:[#allocation11 + $0x140] sm:$0xff] }
 0x2c7   : > { %6813 = vst [vmem:[#allocation129_spill] sm:$0xff] %v5819_v35  ;;  %v1766_v34 = vpop.f32.mrf.mxu2  ;;  %v3933_v35 = vld [vmem:[#allocation12 + $0xc8] sm:$0xff] }
 0x2cb   : > { %v1795_v24 = vpop.f32.mrf.mxu3 }
 0x2cc   : > { %v1796_v56 = vadd.f32 %v1795_v24, %v1755_v20  ;;  %v1764_v24 = vadd.f32 %v5824_v18, %v1763_v9  ;;  %v1767_v9 = vadd.f32 %v5824_v18, %v1766_v34 }
 0x2cd   : > { %v1836_v43 = vpop.f32.mrf.mxu0 }
 0x2ce   : > { %v5827_v8 = vpop.f32.mrf.mxu1  ;;  %v1837_v3 = vadd.f32 %v1836_v43, %v1796_v56 }
 0x2cf   : > { %6814 = vst [vmem:[#allocation130_spill] sm:$0xff] %v5827_v8 }
 0x2d3   : > { %v1798_v62 = vpop.f32.mrf.mxu3 }
 0x2d4   : > { %v1799_v27 = vadd.f32 %v1798_v62, %v1758_v41  ;;  %v6821_v41 = vld [vmem:[#allocation101_spill] sm:$0xff]  ;;  %v6822_v62 = vld [vmem:[#allocation116_spill] sm:$0xff] }
 0x2d5   : > { %v1839_v5 = vpop.f32.mrf.mxu0 }
 0x2d6   : > { %v1877_v48 = vpop.f32.mrf.mxu1  ;;  %v1840_v19 = vadd.f32 %v1839_v5, %v1799_v27  ;;  %v6824_v27 = vld [vmem:[#allocation118_spill] sm:$0xff] }
 0x2d7   : > { %v1878_v44 = vadd.f32 %v1877_v48, %v1837_v3 }
 0x2d9   : > { %v1901_v10 = vmax.f32 %v1878_v44, 0.0  ;;  %v6823_v44 = vld [vmem:[#allocation102_spill] sm:$0xff] }
 0x2db   : > { %1909 = vst [vmem:[#allocation2 + $0x8] sm:$0xff] %v1901_v10  ;;  %2006 = vmatmul.f32.vlgmr.msrb.gmra.mxu3 %v1901_v10  ;;  %v1801_v40 = vpop.f32.mrf.mxu3 }
 0x2dc   : > { %2390 = vmatpush.msrb.mxu3 %v6815_v6  ;;  %v1802_v46 = vadd.f32 %v1801_v40, %v1761_v57  ;;  %v6825_v40 = vld [vmem:[#allocation103_spill] sm:$0xff]  ;;  %v6826_v6 = vld [vmem:[#allocation120_spill] sm:$0xff] }
 0x2dd   : > { %v1842_v59 = vpop.f32.mrf.mxu0 }
 0x2de   : > { %v1880_v26 = vpop.f32.mrf.mxu1  ;;  %2391 = vmatpush.msrb.mxu3 %v6816_v1  ;;  %v1843_v17 = vadd.f32 %v1842_v59, %v1802_v46 }
 0x2df   : > { %v1881_v50 = vadd.f32 %v1880_v26, %v1840_v19  ;;  %v6827_v26 = vld [vmem:[#allocation89_spill] sm:$0xff] }
 0x2e0   : > { %2392 = vmatpush.msrb.mxu3 %v6817_v61 }
 0x2e1   : > { %v1902_v49 = vmax.f32 %v1881_v50, 0.0  ;;  %v6828_v50 = vld [vmem:[#allocation85_spill] sm:$0xff] }
 0x2e2   : > { %v1917_v13 = vld [vmem:[#allocation2 + $0x7] sm:$0xff]  ;;  %2393 = vmatpush.msrb.mxu3 %v6818_v30 }
 0x2e3   : > { %1910 = vst [vmem:[#allocation2 + $0x10] sm:$0xff] %v1902_v49  ;;  %2009 = vmatmul.f32.gmra.mxu3 %v1902_v49  ;;  %v1933_v20 = vmul.f32 %v1917_v13, %v6819_v7  ;;  %v1804_v43 = vpop.f32.mrf.mxu3  ;;  %v1769_v49 = vpop.f32.mrf.mxu2  ;;  %v6829_v13 = vld [vmem:[#allocation105_spill] sm:$0xff]  ;;  %v6830_v30 = vld [vmem:[#allocation122_spill] sm:$0xff] }
 0x2e4   : > { %2394 = vmatpush.msrb.mxu3 %v6820_v42  ;;  %v1805_v48 = vadd.f32 %v1804_v43, %v1764_v24  ;;  %v6832_v24 = vld [vmem:[#allocation52_spill] sm:$0xff] }
 0x2e5   : > { %1965 = vmatmul.f32.vlgmr.msrb.gmra.mxu2 %v1933_v20  ;;  %v1845_v56 = vpop.f32.mrf.mxu0  ;;  %v6831_v20 = vld [vmem:[#allocation107_spill] sm:$0xff] }
 0x2e6   : > { %v1883_v3 = vpop.f32.mrf.mxu1  ;;  %2349 = vmatpush.msrb.mxu2 %v6821_v41  ;;  %2395 = vmatpush.msrb.mxu3 %v6822_v62  ;;  %v1846_v59 = vadd.f32 %v1845_v56, %v1805_v48  ;;  %v3879_v56 = vld [vmem:[#allocation11 + $0x78] sm:$0xff]  ;;  %v6834_v41 = vld [vmem:[#allocation125_spill] sm:$0xff] }
 0x2e7   : > { %v1884_v5 = vadd.f32 %v1883_v3, %v1843_v17  ;;  %v6833_v3 = vld [vmem:[#allocation109_spill] sm:$0xff] }
 0x2e8   : > { %2350 = vmatpush.msrb.mxu2 %v6823_v44  ;;  %2396 = vmatpush.msrb.mxu3 %v6824_v27  ;;  %v1770_v27 = vadd.f32 %v5824_v18, %v1769_v49 }
 0x2e9   : > { %v1903_v10 = vmax.f32 %v1884_v5, 0.0  ;;  %v3880_v5 = vld [vmem:[#allocation11 + $0x70] sm:$0xff] }
 0x2ea   : > { %v1918_v19 = vld [vmem:[#allocation2 + $0xf] sm:$0xff]  ;;  %2351 = vmatpush.msrb.mxu2 %v6825_v40  ;;  %2397 = vmatpush.msrb.mxu3 %v6826_v6  ;;  %v6838_v6 = vld [vmem:[#allocation86_spill] sm:$0xff] }
 0x2eb   : > { %v1925_v57 = vld [vmem:[#allocation2 + $0x9] sm:$0xff]  ;;  %1911 = vst [vmem:[#allocation2 + $0x18] sm:$0xff] %v1903_v10  ;;  %2012 = vmatmul.f32.gmra.mxu3 %v1903_v10  ;;  %v1934_v1 = vmul.f32 %v1918_v19, %v6827_v26  ;;  %v1807_v61 = vpop.f32.mrf.mxu3  ;;  %v6836_v19 = vld [vmem:[#allocation56_spill] sm:$0xff] }
 0x2ec   : > { %v1941_v46 = vmul.f32 %v1925_v57, %v6828_v50  ;;  %2352 = vmatpush.msrb.mxu2 %v6829_v13  ;;  %2398 = vmatpush.msrb.mxu3 %v6830_v30  ;;  %v1808_v42 = vadd.f32 %v1807_v61, %v1767_v9  ;;  %v6835_v10 = vld [vmem:[#allocation111_spill] sm:$0xff]  ;;  %v6837_v9 = vld [vmem:[#allocation90_spill] sm:$0xff]  ;;  %v6839_v61 = vld [vmem:[#allocation113_spill] sm:$0xff]  ;;  %v1772_v13 = vpop.f32.mrf.mxu2 }
 0x2ed   : > { %1968 = vmatmul.f32.gmra.mxu2 %v1934_v1  ;;  %v1848_v34 = vpop.f32.mrf.mxu0 }
 0x2ee   : > { %2047 = vmatmul.f32.vlgmr.msra.gmra.mxu0 %v1941_v46  ;;  %v1886_v17 = vpop.f32.mrf.mxu1  ;;  %2353 = vmatpush.msrb.mxu2 %v6831_v20  ;;  %v1849_v57 = vadd.f32 %v1848_v34, %v1808_v42  ;;  %v3881_v46 = vld [vmem:[#allocation11 + $0x68] sm:$0xff]  ;;  %v6841_v20 = vld [vmem:[#allocation58_spill] sm:$0xff] }
 0x2ef   : > { %2399 = vmatpush.msrb.mxu3 %v6832_v24  ;;  %v1887_v43 = vadd.f32 %v1886_v17, %v1846_v59  ;;  %2479 = vmatpush.msra.mxu0 %v3879_v56  ;;  %v6840_v17 = vld [vmem:[#allocation115_spill] sm:$0xff]  ;;  %v6842_v42 = vld [vmem:[#allocation117_spill] sm:$0xff]  ;;  %v6843_v56 = vld [vmem:[#allocation60_spill] sm:$0xff] }
 0x2f0   : > { %2354 = vmatpush.msrb.mxu2 %v6833_v3 }
 0x2f1   : > { %2400 = vmatpush.msrb.mxu3 %v6834_v41  ;;  %v1904_v62 = vmax.f32 %v1887_v43, 0.0  ;;  %2480 = vmatpush.msra.mxu0 %v3880_v5  ;;  %v3882_v43 = vld [vmem:[#allocation11 + $0x60] sm:$0xff]  ;;  %v3883_v41 = vld [vmem:[#allocation11 + $0x58] sm:$0xff]  ;;  %v1773_v5 = vadd.f32 %v5824_v18, %v1772_v13 }
 0x2f2   : > { %v1919_v48 = vld [vmem:[#allocation2 + $0x17] sm:$0xff]  ;;  %2355 = vmatpush.msrb.mxu2 %v6835_v10 }
 0x2f3   : > { %v1926_v44 = vld [vmem:[#allocation2 + $0x11] sm:$0xff]  ;;  %2401 = vmatpush.msrb.mxu3 %v6836_v19  ;;  %1912 = vst [vmem:[#allocation2 + $0x20] sm:$0xff] %v1904_v62  ;;  %v1935_v40 = vmul.f32 %v1919_v48, %v6837_v9  ;;  %v1810_v1 = vpop.f32.mrf.mxu3  ;;  %2481 = vmatpush.msra.mxu0 %v3881_v46  ;;  %v6848_v46 = vld [vmem:[#allocation121_spill] sm:$0xff] }
 0x2f4   : > { %2015 = vmatmul.f32.gmra.mxu3 %v1904_v62  ;;  %v1942_v59 = vmul.f32 %v1926_v44, %v6838_v6  ;;  %2356 = vmatpush.msrb.mxu2 %v6839_v61  ;;  %v1811_v24 = vadd.f32 %v1810_v1, %v1770_v27  ;;  %v6844_v48 = vld [vmem:[#allocation119_spill] sm:$0xff]  ;;  %v6846_v10 = vld [vmem:[#allocation92_spill] sm:$0xff]  ;;  %v3884_v1 = vld [vmem:[#allocation11 + $0x50] sm:$0xff] }
 0x2f5   : > { %2402 = vmatpush.msrb.mxu3 %v5623_v21  ;;  %1971 = vmatmul.f32.gmra.mxu2 %v1935_v40  ;;  %v1851_v49 = vpop.f32.mrf.mxu0  ;;  %v6845_v44 = vld [vmem:[#allocation55_spill] sm:$0xff] }
 0x2f6   : > { %2050 = vmatmul.f32.gmra.mxu0 %v1942_v59  ;;  %v1889_v30 = vpop.f32.mrf.mxu1  ;;  %2357 = vmatpush.msrb.mxu2 %v6840_v17  ;;  %v1852_v27 = vadd.f32 %v1851_v49, %v1811_v24  ;;  %v3885_v17 = vld [vmem:[#allocation11 + $0x48] sm:$0xff]  ;;  %v1775_v49 = vpop.f32.mrf.mxu2 }
 0x2f7   : > { %2403 = vmatpush.msrb.mxu3 %v6841_v20  ;;  %v1890_v34 = vadd.f32 %v1889_v30, %v1849_v57  ;;  %2482 = vmatpush.msra.mxu0 %v3882_v43  ;;  %v6847_v57 = vld [vmem:[#allocation88_spill] sm:$0xff]  ;;  %v6849_v30 = vld [vmem:[#allocation123_spill] sm:$0xff] }
 0x2f8   : > { %2358 = vmatpush.msrb.mxu2 %v6842_v42  ;;  %v6850_v24 = vld [vmem:[#allocation124_spill] sm:$0xff] }
 0x2f9   : > { %2404 = vmatpush.msrb.mxu3 %v6843_v56  ;;  %v1905_v3 = vmax.f32 %v1890_v34, 0.0  ;;  %2483 = vmatpush.msra.mxu0 %v3883_v41  ;;  %v3886_v43 = vld [vmem:[#allocation11 + $0x40] sm:$0xff]  ;;  %v1776_v41 = vadd.f32 %v5824_v18, %v1775_v49 }
 0x2fa   : > { %v1920_v21 = vld [vmem:[#allocation2 + $0x1f] sm:$0xff]  ;;  %2359 = vmatpush.msrb.mxu2 %v6844_v48  ;;  %v3890_v49 = vld [vmem:[#allocation11 + $0x20] sm:$0xff] }
 0x2fb   : > { %v1927_v62 = vld [vmem:[#allocation2 + $0x19] sm:$0xff]  ;;  %2405 = vmatpush.msrb.mxu3 %v6845_v44  ;;  %1913 = vst [vmem:[#allocation2 + $0x28] sm:$0xff] %v1905_v3  ;;  %v1936_v19 = vmul.f32 %v1920_v21, %v6846_v10  ;;  %v1813_v59 = vpop.f32.mrf.mxu3  ;;  %2484 = vmatpush.msra.mxu0 %v3884_v1  ;;  %v6851_v21 = vld [vmem:[#allocation126_spill] sm:$0xff] }
 0x2fc   : > { %2018 = vmatmul.f32.gmra.mxu3 %v1905_v3  ;;  %v1943_v40 = vmul.f32 %v1927_v62, %v6847_v57  ;;  %2360 = vmatpush.msrb.mxu2 %v6848_v46  ;;  %v1814_v34 = vadd.f32 %v1813_v59, %v1773_v5  ;;  %v3887_v62 = vld [vmem:[#allocation11 + $0x38] sm:$0xff]  ;;  %v3888_v1 = vld [vmem:[#allocation11 + $0x30] sm:$0xff] }
 0x2fd   : > { %1974 = vmatmul.f32.gmra.mxu2 %v1936_v19  ;;  %v1854_v13 = vpop.f32.mrf.mxu0  ;;  %2485 = vmatpush.msra.mxu0 %v3885_v17  ;;  %v6852_v44 = vld [vmem:[#allocation94_spill] sm:$0xff]  ;;  %v6853_v5 = vld [vmem:[#allocation91_spill] sm:$0xff] }
 0x2fe   : > { %2053 = vmatmul.f32.gmra.mxu0 %v1943_v40  ;;  %v1892_v61 = vpop.f32.mrf.mxu1  ;;  %2361 = vmatpush.msrb.mxu2 %v6849_v30  ;;  %v1855_v48 = vadd.f32 %v1854_v13, %v1814_v34  ;;  %v6854_v59 = vld [vmem:[#allocation127_spill] sm:$0xff] }
 0x2ff   : > { %v1893_v20 = vadd.f32 %v1892_v61, %v1852_v27  ;;  %2486 = vmatpush.msra.mxu0 %v3886_v43  ;;  %v3889_v61 = vld [vmem:[#allocation11 + $0x28] sm:$0xff]  ;;  %v3891_v43 = vld [vmem:[#allocation11 + $0x18] sm:$0xff] }
 0x300   : > { %2362 = vmatpush.msrb.mxu2 %v6850_v24 }
 0x301   : > { %v1906_v42 = vmax.f32 %v1893_v20, 0.0  ;;  %2487 = vmatpush.msra.mxu0 %v3887_v62 }
 0x302   : > { %v1921_v56 = vld [vmem:[#allocation2 + $0x27] sm:$0xff]  ;;  %2363 = vmatpush.msrb.mxu2 %v6851_v21  ;;  %v6856_v21 = vld [vmem:[#allocation93_spill] sm:$0xff] }
 0x303   : > { %v1928_v3 = vld [vmem:[#allocation2 + $0x21] sm:$0xff]  ;;  %1914 = vst [vmem:[#allocation2 + $0x30] sm:$0xff] %v1906_v42  ;;  %v1937_v27 = vmul.f32 %v1921_v56, %v6852_v44  ;;  %v1816_v40 = vpop.f32.mrf.mxu3  ;;  %2488 = vmatpush.msra.mxu0 %v3888_v1  ;;  %v6855_v56 = vld [vmem:[#allocation96_spill] sm:$0xff] }
 0x304   : > { %2021 = vmatmul.f32.gmra.mxu3 %v1906_v42  ;;  %v1944_v19 = vmul.f32 %v1928_v3, %v6853_v5  ;;  %2364 = vmatpush.msrb.mxu2 %v6854_v59  ;;  %v1817_v17 = vadd.f32 %v1816_v40, %v1776_v41  ;;  %v3894_v40 = vld [vmem:[#allocation11] sm:$0xff] }
 0x305   : > { %1977 = vmatmul.f32.gmra.mxu2 %v1937_v27  ;;  %2489 = vmatpush.msra.mxu0 %v3889_v61  ;;  %v1857_v20 = vpop.f32.mrf.mxu0  ;;  %v3892_v27 = vld [vmem:[#allocation11 + $0x10] sm:$0xff] }
 0x306   : > { %2056 = vmatmul.f32.gmra.mxu0 %v1944_v19  ;;  %v1895_v46 = vpop.f32.mrf.mxu1  ;;  %v1858_v42 = vadd.f32 %v1857_v20, %v1817_v17  ;;  %v6857_v61 = vld [vmem:[#allocation98_spill] sm:$0xff]  ;;  %v6858_v17 = vld [vmem:[#allocation95_spill] sm:$0xff] }
 0x307   : > { %v1896_v30 = vadd.f32 %v1895_v46, %v1855_v48  ;;  %2490 = vmatpush.msra.mxu0 %v3890_v49  ;;  %v3893_v48 = vld [vmem:[#allocation11 + $0x8] sm:$0xff] }
 0x309   : > { %v1907_v13 = vmax.f32 %v1896_v30, 0.0  ;;  %2491 = vmatpush.msra.mxu0 %v3891_v43  ;;  %v6860_v43 = vld [vmem:[#allocation97_spill] sm:$0xff] }
 0x30a   : > { %v1922_v34 = vld [vmem:[#allocation2 + $0x2f] sm:$0xff] }
 0x30b   : > { %v1929_v24 = vld [vmem:[#allocation2 + $0x29] sm:$0xff]  ;;  %1915 = vst [vmem:[#allocation2 + $0x38] sm:$0xff] %v1907_v13  ;;  %v1938_v3 = vmul.f32 %v1922_v34, %v6855_v56  ;;  %2492 = vmatpush.msra.mxu0 %v3892_v27 }
 0x30c   : > { %2024 = vmatmul.f32.gmra.mxu3 %v1907_v13  ;;  %v1945_v62 = vmul.f32 %v1929_v24, %v6856_v21  ;;  %v6859_v34 = vld [vmem:[#allocation99_spill] sm:$0xff] }
 0x30d   : > { %1980 = vmatmul.f32.gmra.mxu2 %v1938_v3  ;;  %2493 = vmatpush.msra.mxu0 %v3893_v48 }
 0x30e   : > { %2059 = vmatmul.f32.gmra.mxu0 %v1945_v62  ;;  %v1898_v41 = vpop.f32.mrf.mxu1  ;;  %v6861_v62 = vld [vmem:[#allocation100_spill] sm:$0xff] }
 0x30f   : > { %v1899_v19 = vadd.f32 %v1898_v41, %v1858_v42  ;;  %2494 = vmatpush.msra.mxu0 %v3894_v40 }
 0x311   : > { %v1908_v59 = vmax.f32 %v1899_v19, 0.0 }
 0x312   : > { %v1923_v1 = vld [vmem:[#allocation2 + $0x37] sm:$0xff] }
 0x313   : > { %v1930_v46 = vld [vmem:[#allocation2 + $0x31] sm:$0xff]  ;;  %1916 = vst [vmem:[#allocation2 + $0x40] sm:$0xff] %v1908_v59  ;;  %v1939_v30 = vmul.f32 %v1923_v1, %v6857_v61 }
 0x314   : > { %2027 = vmatmul.f32.gmra.mxu3 %v1908_v59  ;;  %v1946_v20 = vmul.f32 %v1930_v46, %v6858_v17 }
 0x315   : > { %1983 = vmatmul.f32.gmra.mxu2 %v1939_v30 }
 0x316   : > { %2062 = vmatmul.f32.gmra.mxu0 %v1946_v20 }
 0x31a   : > { %v1924_v49 = vld [vmem:[#allocation2 + $0x3f] sm:$0xff] }
 0x31b   : > { %v1931_v13 = vld [vmem:[#allocation2 + $0x39] sm:$0xff]  ;;  %v1940_v24 = vmul.f32 %v1924_v49, %v6859_v34  ;;  %v1932_v42 = vld [vmem:[#allocation2 + $0x41] sm:$0xff] }
 0x31c   : > { %v1947_v3 = vmul.f32 %v1931_v13, %v6860_v43  ;;  %v1948_v27 = vmul.f32 %v1932_v42, %v6861_v62 }
 0x31d   : > { %1986 = vmatmul.f32.gmra.mxu2 %v1940_v24 }
 0x31e   : > { %2065 = vmatmul.f32.gmra.mxu0 %v1947_v3  ;;  %v3895_v3 = vld [vmem:[#allocation11 + $0x178] sm:$0xff] }
 0x326   : > { %2068 = vmatmul.f32.gmra.mxu0 %v1948_v27  ;;  %v3896_v27 = vld [vmem:[#allocation11 + $0x170] sm:$0xff] }
 0x35e   : > { %v2007_v41 = vpop.f32.mrf.mxu3 }
 0x366   : > { %v2010_v48 = vpop.f32.mrf.mxu3 }
 0x368   : > { %v1966_v19 = vpop.f32.mrf.mxu2 }
 0x369   : > { %v1967_v40 = vadd.f32 %v5567_v14, %v1966_v19  ;;  %v3897_v19 = vld [vmem:[#allocation11 + $0x168] sm:$0xff] }
 0x36b   : > { %v2048_v59 = vpop.f32.mrf.mxu0  ;;  %v2008_v1 = vadd.f32 %v2007_v41, %v1967_v40 }
 0x36d   : > { %v5885_v46 = vadd.f32 %v2048_v59, %v2008_v1  ;;  %v3898_v59 = vld [vmem:[#allocation11 + $0x160] sm:$0xff] }
 0x36e   : > { %v2013_v20 = vpop.f32.mrf.mxu3 }
 0x36f   : > { %v2072_v30 = vmax.f32 %v5885_v46, 0.0 }
 0x370   : > { %v1969_v49 = vpop.f32.mrf.mxu2 }
 0x371   : > { %v1970_v13 = vadd.f32 %v5567_v14, %v1969_v49  ;;  %2161 = vmatmul.f32.vlgmr.msra.gmra.mxu2 %v2072_v30  ;;  %2123 = vmatmul.f32.gmra.mxu1 %v2072_v30  ;;  %v5895_v14 = vld [vmem:[%s6731_s3] ss:$0 sm:$0xff]  ;;  %v3900_v49 = vld [vmem:[#allocation11 + $0x158] sm:$0xff] }
 0x372   : > { %2561 = vmatpush.msra.mxu2 %v3895_v3  ;;  %6862 = vst [vmem:[#allocation106_spill] sm:$0xff] %v5895_v14  ;;  %v3902_v3 = vld [vmem:[#allocation11 + $0x150] sm:$0xff] }
 0x373   : > { %v2051_v24 = vpop.f32.mrf.mxu0  ;;  %v2011_v42 = vadd.f32 %v2010_v48, %v1970_v13 }
 0x374   : > { %2562 = vmatpush.msra.mxu2 %v3896_v27  ;;  %v3903_v27 = vld [vmem:[#allocation12 + $0x70] sm:$0xff] }
 0x375   : > { %v5889_v37 = vadd.f32 %v2051_v24, %v2011_v42  ;;  %v3901_v24 = vld [vmem:[#allocation12 + $0x78] sm:$0xff] }
 0x376   : > { %2563 = vmatpush.msra.mxu2 %v3897_v19  ;;  %v3904_v19 = vld [vmem:[#allocation11 + $0x148] sm:$0xff] }
 0x377   : > { %v2073_v41 = vmax.f32 %v5889_v37, 0.0  ;;  %v2016_v48 = vpop.f32.mrf.mxu3 }
 0x378   : > { %v1972_v40 = vpop.f32.mrf.mxu2  ;;  %2564 = vmatpush.msra.mxu2 %v3898_v59  ;;  %v3905_v59 = vld [vmem:[#allocation12 + $0x68] sm:$0xff] }
 0x379   : > { %v1973_v1 = vadd.f32 %v5895_v14, %v1972_v40  ;;  %2164 = vmatmul.f32.gmra.mxu2 %v2073_v41  ;;  %2126 = vmatmul.f32.gmra.mxu1 %v2073_v41 }
 0x37a   : > { %2202 = vmatmul.f32.vlgmr.msra.gmra.mxu3 %v2073_v41  ;;  %2565 = vmatpush.msra.mxu2 %v3900_v49  ;;  %v3908_v49 = vld [vmem:[#allocation12 + $0x60] sm:$0xff] }
 0x37b   : > { %v2054_v30 = vpop.f32.mrf.mxu0  ;;  %v2014_v13 = vadd.f32 %v2013_v20, %v1973_v1  ;;  %2634 = vmatpush.msra.mxu3 %v3901_v24  ;;  %v3907_v1 = vld [vmem:[#allocation11 + $0x138] sm:$0xff]  ;;  %v3909_v24 = vld [vmem:[#allocation11 + $0x130] sm:$0xff] }
 0x37c   : > { %2566 = vmatpush.msra.mxu2 %v3902_v3 }
 0x37d   : > { %v5898_v42 = vadd.f32 %v2054_v30, %v2014_v13  ;;  %2635 = vmatpush.msra.mxu3 %v3903_v27  ;;  %v3910_v27 = vld [vmem:[#allocation12 + $0x58] sm:$0xff] }
 0x37e   : > { %2567 = vmatpush.msra.mxu2 %v3904_v19  ;;  %v3911_v19 = vld [vmem:[#allocation11 + $0x128] sm:$0xff] }
 0x37f   : > { %v2074_v40 = vmax.f32 %v5898_v42, 0.0  ;;  %2636 = vmatpush.msra.mxu3 %v3905_v59  ;;  %v2019_v13 = vpop.f32.mrf.mxu3 }
 0x380   : > { %v1975_v8 = vpop.f32.mrf.mxu2  ;;  %2568 = vmatpush.msra.mxu2 %v3906_v15 }
 0x381   : > { %v1976_v41 = vadd.f32 %v5895_v14, %v1975_v8  ;;  %2167 = vmatmul.f32.gmra.mxu2 %v2074_v40  ;;  %2129 = vmatmul.f32.gmra.mxu1 %v2074_v40  ;;  %v3912_v8 = vld [vmem:[#allocation12 + $0x50] sm:$0xff] }
 0x382   : > { %2205 = vmatmul.f32.gmra.mxu3 %v2074_v40  ;;  %2569 = vmatpush.msra.mxu2 %v3907_v1  ;;  %v3913_v40 = vld [vmem:[#allocation11 + $0x120] sm:$0xff]  ;;  %v3914_v1 = vld [vmem:[#allocation11 + $0x118] sm:$0xff] }
 0x383   : > { %v2057_v20 = vpop.f32.mrf.mxu0  ;;  %v2017_v30 = vadd.f32 %v2016_v48, %v1976_v41  ;;  %2637 = vmatpush.msra.mxu3 %v3908_v49  ;;  %v3916_v49 = vld [vmem:[#allocation11 + $0x110] sm:$0xff] }
 0x384   : > { %2570 = vmatpush.msra.mxu2 %v3909_v24 }
 0x385   : > { %v5902_v3 = vadd.f32 %v2057_v20, %v2017_v30  ;;  %2638 = vmatpush.msra.mxu3 %v3910_v27  ;;  %v3915_v30 = vld [vmem:[#allocation12 + $0x48] sm:$0xff]  ;;  %v3917_v27 = vld [vmem:[#allocation12 + $0x40] sm:$0xff] }
 0x386   : > { %2571 = vmatpush.msra.mxu2 %v3911_v19 }
 0x387   : > { %v2075_v15 = vmax.f32 %v5902_v3, 0.0  ;;  %2639 = vmatpush.msra.mxu3 %v3912_v8  ;;  %v2022_v19 = vpop.f32.mrf.mxu3  ;;  %v3918_v8 = vld [vmem:[#allocation11 + $0x108] sm:$0xff] }
 0x388   : > { %v1978_v59 = vpop.f32.mrf.mxu2  ;;  %2572 = vmatpush.msra.mxu2 %v3913_v40  ;;  %v3919_v40 = vld [vmem:[#allocation12 + $0x38] sm:$0xff] }
 0x389   : > { %v1979_v48 = vadd.f32 %v5895_v14, %v1978_v59  ;;  %2170 = vmatmul.f32.gmra.mxu2 %v2075_v15  ;;  %2132 = vmatmul.f32.gmra.mxu1 %v2075_v15 }
 0x38a   : > { %2208 = vmatmul.f32.gmra.mxu3 %v2075_v15  ;;  %2573 = vmatpush.msra.mxu2 %v3914_v1 }
 0x38b   : > { %v2060_v41 = vpop.f32.mrf.mxu0  ;;  %v2020_v20 = vadd.f32 %v2019_v13, %v1979_v48  ;;  %2640 = vmatpush.msra.mxu3 %v3915_v30  ;;  %v3922_v30 = vld [vmem:[#allocation12 + $0xf8] sm:$0xff] }
 0x38c   : > { %2574 = vmatpush.msra.mxu2 %v3916_v49 }
 0x38d   : > { %v5906_v24 = vadd.f32 %v2060_v41, %v2020_v20  ;;  %2641 = vmatpush.msra.mxu3 %v3917_v27  ;;  %v2235_v41 = vld [vmem:[%s4941_s22] sm:$0xff]  ;;  %v3921_v20 = vld [vmem:[#allocation12 + $0x30] sm:$0xff]  ;;  %v3923_v27 = vld [vmem:[#allocation12 + $0x28] sm:$0xff] }
 0x38e   : > { %2575 = vmatpush.msra.mxu2 %v3918_v8  ;;  %2283 = vmatmul.f32.vlgmr.msrb.gmra.mxu0 %v2235_v41  ;;  %v3924_v8 = vld [vmem:[#allocation12 + $0xf0] sm:$0xff]  ;;  %v3927_v41 = vld [vmem:[#allocation12 + $0xe0] sm:$0xff] }
 0x38f   : > { %v2076_v59 = vmax.f32 %v5906_v24, 0.0  ;;  %2642 = vmatpush.msra.mxu3 %v3919_v40  ;;  %2675 = vmatpush.msrb.mxu0 %v3922_v30  ;;  %v3925_v40 = vld [vmem:[#allocation12 + $0x20] sm:$0xff]  ;;  %v3929_v30 = vld [vmem:[#allocation12 + $0xd8] sm:$0xff] }
 0x390   : > { %v1981_v15 = vpop.f32.mrf.mxu2  ;;  %2576 = vmatpush.msra.mxu2 %v3920_v2 }
 0x391   : > { %v1982_v13 = vadd.f32 %v5895_v14, %v1981_v15  ;;  %2173 = vmatmul.f32.gmra.mxu2 %v2076_v59  ;;  %2135 = vmatmul.f32.gmra.mxu1 %v2076_v59  ;;  %v2025_v15 = vpop.f32.mrf.mxu3 }
 0x392   : > { %2211 = vmatmul.f32.gmra.mxu3 %v2076_v59  ;;  %2676 = vmatpush.msrb.mxu0 %v3924_v8  ;;  %v3930_v8 = vld [vmem:[#allocation12 + $0x10] sm:$0xff] }
 0x393   : > { %v2063_v48 = vpop.f32.mrf.mxu0  ;;  %v2023_v1 = vadd.f32 %v2022_v19, %v1982_v13  ;;  %2643 = vmatpush.msra.mxu3 %v3921_v20  ;;  %v3928_v20 = vld [vmem:[#allocation12 + $0x18] sm:$0xff] }
 0x394   : > { %2677 = vmatpush.msrb.mxu0 %v3926_v53  ;;  %v3931_v53 = vld [vmem:[#allocation12 + $0xd0] sm:$0xff] }
 0x395   : > { %v5911_v49 = vadd.f32 %v2063_v48, %v2023_v1  ;;  %2644 = vmatpush.msra.mxu3 %v3923_v27  ;;  %v2239_v48 = vld [vmem:[%s4941_s22 + $0x20] sm:$0xff] }
 0x396   : > { %2678 = vmatpush.msrb.mxu0 %v3927_v41 }
 0x397   : > { %v2077_v2 = vmax.f32 %v5911_v49, 0.0  ;;  %2645 = vmatpush.msra.mxu3 %v3925_v40  ;;  %2286 = vmatmul.f32.gmra.mxu0 %v2239_v48  ;;  %v3934_v48 = vld [vmem:[#allocation12 + $0xc0] sm:$0xff] }
 0x398   : > { %v1984_v59 = vpop.f32.mrf.mxu2  ;;  %2679 = vmatpush.msrb.mxu0 %v3929_v30  ;;  %v3936_v30 = vld [vmem:[#allocation12 + $0xb8] sm:$0xff] }
 0x399   : > { %v1985_v19 = vadd.f32 %v5895_v14, %v1984_v59  ;;  %2176 = vmatmul.f32.gmra.mxu2 %v2077_v2  ;;  %2138 = vmatmul.f32.gmra.mxu1 %v2077_v2  ;;  %v3932_v59 = vld [vmem:[#allocation12 + $0x8] sm:$0xff] }
 0x39a   : > { %2214 = vmatmul.f32.gmra.mxu3 %v2077_v2  ;;  %2680 = vmatpush.msrb.mxu0 %v3931_v53  ;;  %v3937_v53 = vld [vmem:[#allocation12 + $0xb0] sm:$0xff] }
 0x39b   : > { %v2066_v13 = vpop.f32.mrf.mxu0  ;;  %v2026_v1 = vadd.f32 %v2025_v15, %v1985_v19  ;;  %2646 = vmatpush.msra.mxu3 %v3928_v20  ;;  %v2028_v19 = vpop.f32.mrf.mxu3 }
 0x39c   : > { %2681 = vmatpush.msrb.mxu0 %v3933_v35  ;;  %v2236_v35 = vld [vmem:[%s4941_s22 + $0x8] sm:$0xff] }
 0x39d   : > { %v5916_v27 = vadd.f32 %v2066_v13, %v2026_v1  ;;  %2647 = vmatpush.msra.mxu3 %v3930_v8  ;;  %v2243_v13 = vld [vmem:[%s4941_s22 + $0x40] sm:$0xff] }
 0x39e   : > { %2682 = vmatpush.msrb.mxu0 %v3934_v48  ;;  %v3935_v1 = vld [vmem:[#allocation12] sm:$0xff]  ;;  %v2237_v48 = vld [vmem:[%s4941_s22 + $0x10] sm:$0xff] }
 0x39f   : > { %6863 = vst [vmem:[#allocation108_spill] sm:$0xff] %v5916_v27  ;;  %v2078_v40 = vmax.f32 %v5916_v27, 0.0  ;;  %2648 = vmatpush.msra.mxu3 %v3932_v59  ;;  %2289 = vmatmul.f32.gmra.mxu0 %v2243_v13  ;;  %v3938_v59 = vld [vmem:[#allocation12 + $0xa8] sm:$0xff]  ;;  %v3941_v13 = vld [vmem:[#allocation12 + $0xa0] sm:$0xff] }
 0x3a0   : > { %v1987_v2 = vpop.f32.mrf.mxu2  ;;  %2683 = vmatpush.msrb.mxu0 %v3936_v30  ;;  %v3944_v30 = vld [vmem:[#allocation12 + $0x160] sm:$0xff] }
 0x3a1   : > { %v1988_v15 = vadd.f32 %v5895_v14, %v1987_v2  ;;  %2179 = vmatmul.f32.gmra.mxu2 %v2078_v40  ;;  %2141 = vmatmul.f32.gmra.mxu1 %v2078_v40  ;;  %v2247_v2 = vld [vmem:[%s4941_s22 + $0x60] sm:$0xff] }
 0x3a2   : > { %2217 = vmatmul.f32.gmra.mxu3 %v2078_v40  ;;  %2684 = vmatpush.msrb.mxu0 %v3937_v53  ;;  %v2251_v53 = vld [vmem:[%s4941_s22 + $0x80] sm:$0xff] }
 0x3a3   : > { %v2029_v41 = vadd.f32 %v2028_v19, %v1988_v15  ;;  %2649 = vmatpush.msra.mxu3 %v3935_v1  ;;  %v2069_v20 = vpop.f32.mrf.mxu0  ;;  %v3939_v15 = vld [vmem:[#allocation12 + $0x178] sm:$0xff]  ;;  %v3940_v19 = vld [vmem:[#allocation12 + $0x170] sm:$0xff]  ;;  %v3942_v1 = vld [vmem:[#allocation12 + $0x168] sm:$0xff] }
 0x3a4   : > { %2685 = vmatpush.msrb.mxu0 %v3938_v59  ;;  %v3947_v59 = vld [vmem:[#allocation12 + $0x150] sm:$0xff] }
 0x3a5   : > { %v5921_v8 = vadd.f32 %v2069_v20, %v2029_v41  ;;  %v2240_v41 = vld [vmem:[%s4941_s22 + $0x28] sm:$0xff]  ;;  %v3943_v20 = vld [vmem:[#allocation12 + $0x98] sm:$0xff] }
 0x3a6   : > { %2686 = vmatpush.msrb.mxu0 %v3941_v13  ;;  %v3949_v13 = vld [vmem:[#allocation12 + $0x148] sm:$0xff] }
 0x3a7   : > { %6864 = vst [vmem:[#allocation110_spill] sm:$0xff] %v5921_v8  ;;  %v2079_v40 = vmax.f32 %v5921_v8, 0.0  ;;  %2292 = vmatmul.f32.gmra.mxu0 %v2247_v2  ;;  %v3948_v2 = vld [vmem:[#allocation12 + $0x88] sm:$0xff] }
 0x3a8   : > { %2687 = vmatpush.msrb.mxu0 %v3943_v20  ;;  %v2255_v20 = vld [vmem:[%s4941_s22 + $0xa0] sm:$0xff] }
 0x3a9   : > { %2182 = vmatmul.f32.gmra.mxu2 %v2079_v40  ;;  %2324 = vmatmul.f32.vlgmr.msra.gmra.mxu1 %v2236_v35  ;;  %v3945_v35 = vld [vmem:[#allocation12 + $0x90] sm:$0xff] }
 0x3aa   : > { %2220 = vmatmul.f32.gmra.mxu3 %v2079_v40  ;;  %2716 = vmatpush.msra.mxu1 %v3939_v15  ;;  %v3946_v40 = vld [vmem:[#allocation12 + $0x158] sm:$0xff]  ;;  %v2241_v15 = vld [vmem:[%s4941_s22 + $0x30] sm:$0xff] }
 0x3ab   : > { %2688 = vmatpush.msrb.mxu0 %v3945_v35  ;;  %v3953_v35 = vld [vmem:[#allocation12 + $0x130] sm:$0xff] }
 0x3ac   : > { %2717 = vmatpush.msra.mxu1 %v3940_v19  ;;  %v2244_v19 = vld [vmem:[%s4941_s22 + $0x48] sm:$0xff] }
 0x3ad   : > { %2689 = vmatpush.msrb.mxu0 %v3948_v2  ;;  %v2242_v2 = vld [vmem:[%s4941_s22 + $0x38] sm:$0xff] }
 0x3ae   : > { %2718 = vmatpush.msra.mxu1 %v3942_v1  ;;  %v3951_v1 = vld [vmem:[#allocation12 + $0x140] sm:$0xff] }
 0x3af   : > { %2295 = vmatmul.f32.gmra.mxu0 %v2251_v53  ;;  %v2245_v53 = vld [vmem:[%s4941_s22 + $0x50] sm:$0xff] }
 0x3b0   : > { %2719 = vmatpush.msra.mxu1 %v3944_v30  ;;  %v3952_v30 = vld [vmem:[#allocation12 + $0x138] sm:$0xff] }
 0x3b1   : > { %2365 = vmatmul.f32.vlgmr.msrb.gmra.mxu2 %v2237_v48  ;;  %2327 = vmatmul.f32.gmra.mxu1 %v2240_v41  ;;  %v3950_v48 = vld [vmem:[#allocation12 + $0x80] sm:$0xff]  ;;  %v2238_v41 = vld [vmem:[%s4941_s22 + $0x18] sm:$0xff] }
 0x3b2   : > { %2223 = vmatmul.f32.gmra.mxu3 %v5782_v0  ;;  %2720 = vmatpush.msra.mxu1 %v3946_v40  ;;  %v2248_v40 = vld [vmem:[%s4941_s22 + $0x68] sm:$0xff] }
 0x3b3   : > { %2690 = vmatpush.msrb.mxu0 %v3950_v48  ;;  %v3957_v48 = vld [vmem:[#allocation12 + $0x110] sm:$0xff] }
 0x3b4   : > { %2721 = vmatpush.msra.mxu1 %v3947_v59  ;;  %v3954_v59 = vld [vmem:[#allocation12 + $0x128] sm:$0xff] }
 0x3b6   : > { %2722 = vmatpush.msra.mxu1 %v3949_v13  ;;  %v3955_v13 = vld [vmem:[#allocation12 + $0x120] sm:$0xff] }
 0x3b7   : > { %2298 = vmatmul.f32.gmra.mxu0 %v2255_v20  ;;  %v3958_v20 = vld [vmem:[#allocation12 + $0x108] sm:$0xff] }
 0x3b8   : > { %2723 = vmatpush.msra.mxu1 %v3951_v1  ;;  %v2252_v1 = vld [vmem:[%s4941_s22 + $0x88] sm:$0xff] }
 0x3b9   : > { %2368 = vmatmul.f32.gmra.mxu2 %v2241_v15  ;;  %2330 = vmatmul.f32.gmra.mxu1 %v2244_v19  ;;  %v2259_v15 = vld [vmem:[%s4941_s22 + $0xc0] sm:$0xff]  ;;  %v3956_v19 = vld [vmem:[#allocation12 + $0x118] sm:$0xff] }
 0x3ba   : > { %2406 = vmatmul.f32.vlgmr.msrb.gmra.mxu3 %v2238_v41  ;;  %2724 = vmatpush.msra.mxu1 %v3952_v30  ;;  %v2249_v41 = vld [vmem:[%s4941_s22 + $0x70] sm:$0xff]  ;;  %v2246_v30 = vld [vmem:[%s4941_s22 + $0x58] sm:$0xff] }
 0x3bc   : > { %2725 = vmatpush.msra.mxu1 %v3953_v35  ;;  %v3959_v35 = vld [vmem:[#allocation12 + $0x100] sm:$0xff] }
 0x3be   : > { %2726 = vmatpush.msra.mxu1 %v3954_v59  ;;  %v2250_v59 = vld [vmem:[%s4941_s22 + $0x78] sm:$0xff] }
 0x3bf   : > { %2301 = vmatmul.f32.gmra.mxu0 %v2259_v15  ;;  %v2260_v15 = vld [vmem:[%s4941_s22 + $0xc8] sm:$0xff] }
 0x3c0   : > { %2727 = vmatpush.msra.mxu1 %v3955_v13  ;;  %v2257_v13 = vld [vmem:[%s4941_s22 + $0xb0] sm:$0xff] }
 0x3c1   : > { %2371 = vmatmul.f32.gmra.mxu2 %v2245_v53  ;;  %2333 = vmatmul.f32.gmra.mxu1 %v2248_v40  ;;  %v2253_v53 = vld [vmem:[%s4941_s22 + $0x90] sm:$0xff]  ;;  %v2256_v40 = vld [vmem:[%s4941_s22 + $0xa8] sm:$0xff] }
 0x3c2   : > { %2409 = vmatmul.f32.gmra.mxu3 %v2242_v2  ;;  %2728 = vmatpush.msra.mxu1 %v3956_v19  ;;  %v2263_v2 = vld [vmem:[%s4941_s22 + $0xe0] sm:$0xff]  ;;  %v2254_v19 = vld [vmem:[%s4941_s22 + $0x98] sm:$0xff] }
 0x3c4   : > { %2729 = vmatpush.msra.mxu1 %v3957_v48  ;;  %v2261_v48 = vld [vmem:[%s4941_s22 + $0xd0] sm:$0xff] }
 0x3c6   : > { %2730 = vmatpush.msra.mxu1 %v3958_v20  ;;  %v5951_v20 = vpop.f32.mrf.mxu1 }
 0x3c7   : > { %2304 = vmatmul.f32.gmra.mxu0 %v2263_v2 }
 0x3c8   : > { %2731 = vmatpush.msra.mxu1 %v3959_v35  ;;  %v2262_v35 = vld [vmem:[%s4941_s22 + $0xd8] sm:$0xff] }
 0x3c9   : > { %2374 = vmatmul.f32.gmra.mxu2 %v2249_v41  ;;  %2336 = vmatmul.f32.gmra.mxu1 %v2252_v1  ;;  %v2264_v41 = vld [vmem:[%s4941_s22 + $0xe8] sm:$0xff]  ;;  %v2258_v1 = vld [vmem:[%s4941_s22 + $0xb8] sm:$0xff] }
 0x3ca   : > { %2412 = vmatmul.f32.gmra.mxu3 %v2246_v30  ;;  %v2265_v30 = vld [vmem:[%s4941_s22 + $0xf0] sm:$0xff] }
 0x3d1   : > { %2377 = vmatmul.f32.gmra.mxu2 %v2253_v53  ;;  %2339 = vmatmul.f32.gmra.mxu1 %v2256_v40  ;;  %v2266_v40 = vld [vmem:[%s4941_s22 + $0xf8] sm:$0xff] }
 0x3d2   : > { %2415 = vmatmul.f32.gmra.mxu3 %v2250_v59 }
 0x3d9   : > { %2380 = vmatmul.f32.gmra.mxu2 %v2257_v13  ;;  %2342 = vmatmul.f32.gmra.mxu1 %v2260_v15 }
 0x3da   : > { %2418 = vmatmul.f32.gmra.mxu3 %v2254_v19 }
 0x3e1   : > { %2383 = vmatmul.f32.gmra.mxu2 %v2261_v48  ;;  %2345 = vmatmul.f32.gmra.mxu1 %v2264_v41 }
 0x3e2   : > { %2421 = vmatmul.f32.gmra.mxu3 %v2258_v1 }
 0x3e9   : > { %2386 = vmatmul.f32.gmra.mxu2 %v2265_v30 }
 0x3ea   : > { %2424 = vmatmul.f32.gmra.mxu3 %v2262_v35 }
 0x3ee   : > { %v5955_v53 = vpop.f32.mrf.mxu1 }
 0x3f2   : > { %2427 = vmatmul.f32.gmra.mxu3 %v2266_v40 }
 0x3f4   : > { %v5958_v59 = vpop.f32.mrf.mxu2 }
 0x3f6   : > { %v5960_v2 = vpop.f32.mrf.mxu1 }
 0x3fa   : > { %2650 = vmatmul.f32.vlgmr.msra.gmra.mxu3 %v5782_v0 }
 0x3fc   : > { %v5963_v13 = vpop.f32.mrf.mxu2 }
 0x3fd   : > { %v5965_v15 = vpop.f32.mrf.mxu3 }
 0x3fe   : > { %v5967_v19 = vpop.f32.mrf.mxu1 }
 0x404   : > { %v5969_v48 = vpop.f32.mrf.mxu2 }
 0x405   : > { %v5971_v41 = vpop.f32.mrf.mxu3 }
 0x406   : > { %v5973_v1 = vpop.f32.mrf.mxu1 }
 0x40b   : > { %v2284_v39 = vpop.f32.mrf.mxu0 }
 0x40c   : > { %v5975_v30 = vpop.f32.mrf.mxu2  ;;  %v2285_v29 = vadd.f32 %v5824_v18, %v2284_v39 }
 0x40d   : > { %v5977_v35 = vpop.f32.mrf.mxu3 }
 0x40e   : > { %v5979_v40 = vpop.f32.mrf.mxu1 }
 0x414   : > { %v5981_v38 = vpop.f32.mrf.mxu2  ;;  %v2287_v32 = vpop.f32.mrf.mxu0 }
 0x415   : > { %v5983_v0 = vpop.f32.mrf.mxu3  ;;  %v2288_v47 = vadd.f32 %v5824_v18, %v2287_v32 }
 0x416   : > { %v5985_v58 = vpop.f32.mrf.mxu1 }
 0x41c   : > { %v5987_v12 = vpop.f32.mrf.mxu2  ;;  %v2290_v45 = vpop.f32.mrf.mxu0 }
 0x41d   : > { %v5989_v23 = vpop.f32.mrf.mxu3  ;;  %v2291_v39 = vadd.f32 %v5824_v18, %v2290_v45 }
 0x41e   : > { %v5991_v11 = vpop.f32.mrf.mxu1 }
 0x41f   : > { %6865 = vst [vmem:[#allocation112_spill] sm:$0xff] %v5991_v11 }
 0x424   : > { %v5993_v25 = vpop.f32.mrf.mxu2  ;;  %v2293_v8 = vpop.f32.mrf.mxu0 }
 0x425   : > { %6866 = vst [vmem:[#allocation87_spill] sm:$0xff] %v5993_v25  ;;  %v5995_v22 = vpop.f32.mrf.mxu3 }
 0x426   : > { %v2325_v52 = vpop.f32.mrf.mxu1 }
 0x427   : > { %v2326_v51 = vadd.f32 %v2325_v52, %v2285_v29 }
 0x42c   : > { %v5997_v55 = vpop.f32.mrf.mxu2 }
 0x42d   : > { %6867 = vst [vmem:[#allocation114_spill] sm:$0xff] %v5997_v55  ;;  %v5999_v63 = vpop.f32.mrf.mxu3 }
 0x42e   : > { %6868 = vst [vmem:[#allocation101_spill] sm:$0xff] %v5999_v63  ;;  %v2328_v54 = vpop.f32.mrf.mxu1 }
 0x42f   : > { %v2329_v14 = vadd.f32 %v2328_v54, %v2288_v47 }
 0x434   : > { %v2366_v60 = vpop.f32.mrf.mxu2 }
 0x435   : > { %v6002_v33 = vpop.f32.mrf.mxu3  ;;  %v2367_v16 = vadd.f32 %v2366_v60, %v2326_v51  ;;  %v2296_v51 = vpop.f32.mrf.mxu0 }
 0x436   : > { %6869 = vst [vmem:[#allocation116_spill] sm:$0xff] %v6002_v33  ;;  %v2331_v4 = vpop.f32.mrf.mxu1 }
 0x437   : > { %v2332_v29 = vadd.f32 %v2331_v4, %v2291_v39  ;;  %v966_v39 = vld [vmem:[#allocation14 + $0x78] sm:$0xff] }
 0x438   : > { %2816 = vmatpush.msrb.mxu2 %v966_v39 }
 0x43c   : > { %v2369_v28 = vpop.f32.mrf.mxu2 }
 0x43d   : > { %v2407_v31 = vpop.f32.mrf.mxu3  ;;  %v2370_v27 = vadd.f32 %v2369_v28, %v2329_v14 }
 0x43e   : > { %v2408_v36 = vadd.f32 %v2407_v31, %v2367_v16  ;;  %v2334_v11 = vpop.f32.mrf.mxu1 }
 0x440   : > { %v2431_v55 = vmax.f32 %v2408_v36, 0.0  ;;  %v2294_v36 = vadd.f32 %v5824_v18, %v2293_v8 }
 0x442   : > { %2439 = vst [vmem:[#allocation2 + $0x8] sm:$0xff] %v2431_v55  ;;  %2536 = vmatmul.f32.vlgmr.msrb.gmra.mxu1 %v2431_v55  ;;  %v2335_v45 = vadd.f32 %v2334_v11, %v2294_v36 }
 0x444   : > { %v2372_v63 = vpop.f32.mrf.mxu2 }
 0x445   : > { %v2410_v25 = vpop.f32.mrf.mxu3  ;;  %v2373_v32 = vadd.f32 %v2372_v63, %v2332_v29 }
 0x446   : > { %v2411_v33 = vadd.f32 %v2410_v25, %v2370_v27  ;;  %v2337_v28 = vpop.f32.mrf.mxu1  ;;  %v2299_v27 = vpop.f32.mrf.mxu0 }
 0x448   : > { %v2432_v52 = vmax.f32 %v2411_v33, 0.0  ;;  %v2297_v33 = vadd.f32 %v5824_v18, %v2296_v51 }
 0x449   : > { %v2447_v60 = vld [vmem:[#allocation2 + $0x7] sm:$0xff] }
 0x44a   : > { %2440 = vst [vmem:[#allocation2 + $0x10] sm:$0xff] %v2432_v52  ;;  %2539 = vmatmul.f32.gmra.mxu1 %v2432_v52  ;;  %v2463_v31 = vmul.f32 %v2447_v60, %v6819_v7  ;;  %v2338_v52 = vadd.f32 %v2337_v28, %v2297_v33  ;;  %v965_v60 = vld [vmem:[#allocation14 + $0x70] sm:$0xff] }
 0x44b   : > { %2817 = vmatpush.msrb.mxu2 %v965_v60 }
 0x44c   : > { %2495 = vmatmul.f32.vlgmr.msra.gmra.mxu0 %v2463_v31  ;;  %v2375_v47 = vpop.f32.mrf.mxu2  ;;  %v964_v31 = vld [vmem:[#allocation14 + $0x68] sm:$0xff] }
 0x44d   : > { %v2413_v16 = vpop.f32.mrf.mxu3  ;;  %v2376_v4 = vadd.f32 %v2375_v47, %v2335_v45  ;;  %2818 = vmatpush.msrb.mxu2 %v964_v31  ;;  %v963_v45 = vld [vmem:[#allocation14 + $0x60] sm:$0xff] }
 0x44e   : > { %v2414_v54 = vadd.f32 %v2413_v16, %v2373_v32  ;;  %v2340_v32 = vpop.f32.mrf.mxu1 }
 0x44f   : > { %2819 = vmatpush.msrb.mxu2 %v963_v45 }
 0x450   : > { %v2433_v55 = vmax.f32 %v2414_v54, 0.0 }
 0x451   : > { %v2448_v14 = vld [vmem:[#allocation2 + $0xf] sm:$0xff] }
 0x452   : > { %v2455_v25 = vld [vmem:[#allocation2 + $0x9] sm:$0xff]  ;;  %2441 = vst [vmem:[#allocation2 + $0x18] sm:$0xff] %v2433_v55  ;;  %2542 = vmatmul.f32.gmra.mxu1 %v2433_v55  ;;  %v2464_v63 = vmul.f32 %v2448_v14, %v6827_v26  ;;  %v2300_v26 = vadd.f32 %v5824_v18, %v2299_v27  ;;  %v2302_v55 = vpop.f32.mrf.mxu0 }
 0x453   : > { %v2471_v7 = vmul.f32 %v2455_v25, %v6828_v50  ;;  %v962_v14 = vld [vmem:[#allocation14 + $0x58] sm:$0xff]  ;;  %v961_v25 = vld [vmem:[#allocation14 + $0x50] sm:$0xff] }
 0x454   : > { %2498 = vmatmul.f32.gmra.mxu0 %v2464_v63  ;;  %v2378_v8 = vpop.f32.mrf.mxu2  ;;  %2820 = vmatpush.msrb.mxu2 %v962_v14  ;;  %v2341_v63 = vadd.f32 %v2340_v32, %v2300_v26  ;;  %v958_v32 = vld [vmem:[#allocation14 + $0x38] sm:$0xff] }
 0x455   : > { %2577 = vmatmul.f32.vlgmr.msra.gmra.mxu2 %v2471_v7  ;;  %v2416_v29 = vpop.f32.mrf.mxu3  ;;  %v2379_v50 = vadd.f32 %v2378_v8, %v2338_v52  ;;  %v960_v7 = vld [vmem:[#allocation14 + $0x48] sm:$0xff]  ;;  %v959_v8 = vld [vmem:[#allocation14 + $0x40] sm:$0xff] }
 0x456   : > { %v2417_v11 = vadd.f32 %v2416_v29, %v2376_v4  ;;  %2821 = vmatpush.msrb.mxu2 %v961_v25  ;;  %v2343_v29 = vpop.f32.mrf.mxu1 }
 0x458   : > { %v2434_v51 = vmax.f32 %v2417_v11, 0.0  ;;  %2822 = vmatpush.msrb.mxu2 %v960_v7 }
 0x459   : > { %v2449_v36 = vld [vmem:[#allocation2 + $0x17] sm:$0xff] }
 0x45a   : > { %v2456_v47 = vld [vmem:[#allocation2 + $0x11] sm:$0xff]  ;;  %2442 = vst [vmem:[#allocation2 + $0x20] sm:$0xff] %v2434_v51  ;;  %2545 = vmatmul.f32.gmra.mxu1 %v2434_v51  ;;  %v2465_v16 = vmul.f32 %v2449_v36, %v6837_v9  ;;  %2823 = vmatpush.msrb.mxu2 %v959_v8  ;;  %v957_v51 = vld [vmem:[#allocation14 + $0x30] sm:$0xff] }
 0x45b   : > { %v2472_v54 = vmul.f32 %v2456_v47, %v6838_v6  ;;  %v2303_v6 = vadd.f32 %v5824_v18, %v2302_v55  ;;  %v2305_v18 = vpop.f32.mrf.mxu0 }
 0x45c   : > { %2501 = vmatmul.f32.gmra.mxu0 %v2465_v16  ;;  %v2381_v28 = vpop.f32.mrf.mxu2  ;;  %2824 = vmatpush.msrb.mxu2 %v958_v32 }
 0x45d   : > { %2580 = vmatmul.f32.gmra.mxu2 %v2472_v54  ;;  %v2419_v33 = vpop.f32.mrf.mxu3  ;;  %v2382_v11 = vadd.f32 %v2381_v28, %v2341_v63  ;;  %v2344_v26 = vadd.f32 %v2343_v29, %v2303_v6  ;;  %v955_v54 = vld [vmem:[#allocation14 + $0x20] sm:$0xff]  ;;  %v953_v63 = vld [vmem:[#allocation14 + $0x10] sm:$0xff] }
 0x45e   : > { %v2420_v4 = vadd.f32 %v2419_v33, %v2379_v50  ;;  %v956_v50 = vld [vmem:[#allocation14 + $0x28] sm:$0xff]  ;;  %2825 = vmatpush.msrb.mxu2 %v957_v51  ;;  %v2346_v33 = vpop.f32.mrf.mxu1  ;;  %v951_v29 = vld [vmem:[#allocation14] sm:$0xff] }
 0x460   : > { %v2435_v27 = vmax.f32 %v2420_v4, 0.0  ;;  %2826 = vmatpush.msrb.mxu2 %v956_v50  ;;  %v954_v4 = vld [vmem:[#allocation14 + $0x18] sm:$0xff] }
 0x461   : > { %v2450_v39 = vld [vmem:[#allocation2 + $0x1f] sm:$0xff] }
 0x462   : > { %v2457_v9 = vld [vmem:[#allocation2 + $0x19] sm:$0xff]  ;;  %2443 = vst [vmem:[#allocation2 + $0x28] sm:$0xff] %v2435_v27  ;;  %2548 = vmatmul.f32.gmra.mxu1 %v2435_v27  ;;  %v2466_v52 = vmul.f32 %v2450_v39, %v6846_v10  ;;  %2827 = vmatpush.msrb.mxu2 %v955_v54 }
 0x463   : > { %v2473_v60 = vmul.f32 %v2457_v9, %v6847_v57  ;;  %v3960_v10 = vld [vmem:[%s6697_s0] ss:$0 sm:$0xff]  ;;  %v952_v39 = vld [vmem:[#allocation14 + $0x8] sm:$0xff] }
 0x464   : > { %2504 = vmatmul.f32.gmra.mxu0 %v2466_v52  ;;  %v2384_v36 = vpop.f32.mrf.mxu2  ;;  %v2306_v57 = vadd.f32 %v3960_v10, %v2305_v18  ;;  %2828 = vmatpush.msrb.mxu2 %v954_v4 }
 0x465   : > { %2583 = vmatmul.f32.gmra.mxu2 %v2473_v60  ;;  %v2422_v31 = vpop.f32.mrf.mxu3  ;;  %v2385_v55 = vadd.f32 %v2384_v36, %v2344_v26 }
 0x466   : > { %v2423_v47 = vadd.f32 %v2422_v31, %v2382_v11  ;;  %v2347_v8 = vadd.f32 %v2346_v33, %v2306_v57  ;;  %2829 = vmatpush.msrb.mxu2 %v953_v63 }
 0x468   : > { %v2436_v16 = vmax.f32 %v2423_v47, 0.0  ;;  %2830 = vmatpush.msrb.mxu2 %v952_v39 }
 0x469   : > { %v2451_v45 = vld [vmem:[#allocation2 + $0x27] sm:$0xff] }
 0x46a   : > { %v2458_v28 = vld [vmem:[#allocation2 + $0x21] sm:$0xff]  ;;  %2444 = vst [vmem:[#allocation2 + $0x30] sm:$0xff] %v2436_v16  ;;  %2551 = vmatmul.f32.gmra.mxu1 %v2436_v16  ;;  %v2467_v14 = vmul.f32 %v2451_v45, %v6852_v44  ;;  %2831 = vmatpush.msrb.mxu2 %v951_v29 }
 0x46b   : > { %v2474_v25 = vmul.f32 %v2458_v28, %v6853_v5 }
 0x46c   : > { %2507 = vmatmul.f32.gmra.mxu0 %v2467_v14  ;;  %v2387_v9 = vpop.f32.mrf.mxu2 }
 0x46d   : > { %2586 = vmatmul.f32.gmra.mxu2 %v2474_v25  ;;  %v2425_v7 = vpop.f32.mrf.mxu3  ;;  %v2388_v44 = vadd.f32 %v2387_v9, %v2347_v8 }
 0x46e   : > { %v2426_v27 = vadd.f32 %v2425_v7, %v2385_v55  ;;  %v2779_v55 = vstv %s2767_s4 }
 0x470   : > { %v2437_v6 = vmax.f32 %v2426_v27, 0.0 }
 0x471   : > { %v2452_v11 = vld [vmem:[#allocation2 + $0x2f] sm:$0xff] }
 0x472   : > { %v2459_v52 = vld [vmem:[#allocation2 + $0x29] sm:$0xff]  ;;  %2445 = vst [vmem:[#allocation2 + $0x38] sm:$0xff] %v2437_v6  ;;  %2554 = vmatmul.f32.gmra.mxu1 %v2437_v6  ;;  %v2468_v5 = vmul.f32 %v2452_v11, %v6855_v56  ;;  %v6029_v56 = vld [vmem:[%s6871_s20] ss:$0 sm:$0xff]  ;;  %s3249_s20 = sshll.u32 %s3246_s11, 4  ;;  %s3250_s20 = int_to_ptr.hbm [resolvable:$true] %s3249_s20 }
 0x473   : > { %v2475_v60 = vmul.f32 %v2459_v52, %v6856_v21  ;;  %v2122_v21 = vadd.f32 %v6029_v56, %v5951_v20  ;;  %v2125_v10 = vadd.f32 %v6029_v56, %v5955_v53  ;;  %v6872_v6 = vld [vmem:[#allocation87_spill] sm:$0xff]  ;;  %s4369_s4 = sshra.s32 %s3250_s20, 4  ;;  %s4370_s4 = int_to_ptr.hbm [resolvable:$true] %s4369_s4 }
 0x474   : > { %2510 = vmatmul.f32.gmra.mxu0 %v2468_v5  ;;  %s4371_s22 = scalar_lea.hbm %s4370_s4, 256  ;;  %p4376_p12 = scmp.lt.s32.totalorder %s4370_s4, %s6914_s8 }
 0x475   : > { %2589 = vmatmul.f32.gmra.mxu2 %v2475_v60  ;;  %v2428_v32 = vpop.f32.mrf.mxu3  ;;  %v6876_v60 = vld [vmem:[#allocation114_spill] sm:$0xff]  ;;  %p4372_p13 = scmp.ne.s32.totalorder %s4370_s4, %s4371_s22 }
 0x476   : > { %v2429_v51 = vadd.f32 %v2428_v32, %v2388_v44 }
 0x477   : > { %p4373_p4 = pnand %p4372_p13, %p4778_p0 }
 0x478   : > { %v2438_v31 = vmax.f32 %v2429_v51, 0.0 }
 0x479   : > { %v2453_v36 = vld [vmem:[#allocation2 + $0x37] sm:$0xff]  ;;  %p4374_p5 = pneg %p4373_p4 }
 0x47a   : > { %v2460_v47 = vld [vmem:[#allocation2 + $0x31] sm:$0xff]  ;;  %2446 = vst [vmem:[#allocation2 + $0x40] sm:$0xff] %v2438_v31  ;;  %2557 = vmatmul.f32.gmra.mxu1 %v2438_v31  ;;  %v2469_v26 = vmul.f32 %v2453_v36, %v6857_v61  ;;  %v2163_v61 = vadd.f32 %v5958_v59, %v2122_v21 }
 0x47b   : > { %v2476_v18 = vmul.f32 %v2460_v47, %v6858_v17 }
 0x47c   : > { %2513 = vmatmul.f32.gmra.mxu0 %v2469_v26  ;;  %v2204_v17 = vadd.f32 %v5965_v15, %v2163_v61  ;;  %v2128_v15 = vadd.f32 %v6029_v56, %v5960_v2  ;;  %v982_v61 = vld [vmem:[#allocation14 + $0xf8] sm:$0xff] }
 0x47d   : > { %2592 = vmatmul.f32.gmra.mxu2 %v2476_v18  ;;  %2857 = vmatpush.msrb.mxu3 %v982_v61 }
 0x47e   : > { %v2227_v20 = vadd.f32 %v2204_v17, %v5885_v46  ;;  %v2169_v53 = vadd.f32 %v5969_v48, %v2128_v15  ;;  %v979_v15 = vld [vmem:[#allocation14 + $0xe0] sm:$0xff] }
 0x481   : > { %v2454_v50 = vld [vmem:[#allocation2 + $0x3f] sm:$0xff] }
 0x482   : > { %v2461_v16 = vld [vmem:[#allocation2 + $0x39] sm:$0xff]  ;;  %v2470_v54 = vmul.f32 %v2454_v50, %v6859_v34  ;;  %v2462_v28 = vld [vmem:[#allocation2 + $0x41] sm:$0xff]  ;;  %v2166_v34 = vadd.f32 %v5963_v13, %v2125_v10  ;;  %v2131_v13 = vadd.f32 %v6029_v56, %v5967_v19 }
 0x483   : > { %v2477_v45 = vmul.f32 %v2461_v16, %v6860_v43  ;;  %v2478_v57 = vmul.f32 %v2462_v28, %v6861_v62  ;;  %v2771_v43 = vmax.f32 %v2227_v20, 0.0  ;;  %v2210_v62 = vadd.f32 %v5977_v35, %v2169_v53  ;;  %v981_v10 = vld [vmem:[#allocation14 + $0xf0] sm:$0xff] }
 0x484   : > { %2516 = vmatmul.f32.gmra.mxu0 %v2470_v54  ;;  %v2207_v59 = vadd.f32 %v5971_v41, %v2166_v34  ;;  %v2172_v41 = vadd.f32 %v5975_v30, %v2131_v13  ;;  %v6879_v54 = vld [vmem:[#allocation106_spill] sm:$0xff]  ;;  %2858 = vmatpush.msrb.mxu3 %v981_v10  ;;  %v980_v34 = vld [vmem:[#allocation14 + $0xe8] sm:$0xff] }
 0x485   : > { %2595 = vmatmul.f32.gmra.mxu2 %v2477_v45  ;;  %v2780_v14 = vmul.f32 %v2779_v55, %v2771_v43  ;;  %v2229_v33 = vadd.f32 %v2210_v62, %v5898_v42  ;;  %v2137_v42 = vadd.f32 %v6029_v56, %v5979_v40  ;;  %v6873_v40 = vld [vmem:[#allocation101_spill] sm:$0xff] }
 0x486   : > { %v2228_v25 = vadd.f32 %v2207_v59, %v5889_v37  ;;  %v2213_v2 = vadd.f32 %v5983_v0, %v2172_v41  ;;  %v2134_v37 = vadd.f32 %v6029_v56, %v5973_v1  ;;  %2859 = vmatpush.msrb.mxu3 %v980_v34 }
 0x487   : > { %v2773_v63 = vmax.f32 %v2229_v33, 0.0  ;;  %v2178_v0 = vadd.f32 %v5987_v12, %v2137_v42  ;;  %v6875_v12 = vld [vmem:[#allocation108_spill] sm:$0xff] }
 0x488   : > { %v2772_v46 = vmax.f32 %v2228_v25, 0.0  ;;  %v2230_v48 = vadd.f32 %v2213_v2, %v5902_v3  ;;  %v2175_v35 = vadd.f32 %v5981_v38, %v2134_v37  ;;  %v2140_v3 = vadd.f32 %v6029_v56, %v5985_v58  ;;  %v6877_v58 = vld [vmem:[#allocation116_spill] sm:$0xff]  ;;  %2860 = vmatpush.msrb.mxu3 %v979_v15  ;;  %v974_v37 = vld [vmem:[#allocation14 + $0xb8] sm:$0xff] }
 0x489   : > { %v2782_v7 = vmul.f32 %v2779_v55, %v2773_v63  ;;  %v2219_v1 = vadd.f32 %v5995_v22, %v2178_v0  ;;  %v976_v33 = vld [vmem:[#allocation14 + $0xc8] sm:$0xff]  ;;  %v975_v63 = vld [vmem:[#allocation14 + $0xc0] sm:$0xff]  ;;  %v6884_v15 = vld [vmem:[#allocation54_spill] sm:$0xff] }
 0x48a   : > { %v2781_v4 = vmul.f32 %v2779_v55, %v2772_v46  ;;  %v2774_v27 = vmax.f32 %v2230_v48, 0.0  ;;  %v2216_v19 = vadd.f32 %v5989_v23, %v2175_v35  ;;  %v2181_v23 = vadd.f32 %v6872_v6, %v2140_v3  ;;  %v977_v46 = vld [vmem:[#allocation14 + $0xd0] sm:$0xff]  ;;  %v972_v42 = vld [vmem:[#allocation14 + $0xa8] sm:$0xff]  ;;  %v971_v0 = vld [vmem:[#allocation14 + $0xa0] sm:$0xff] }
 0x48b   : > { %v2232_v38 = vadd.f32 %v2219_v1, %v5911_v49  ;;  %v6878_v49 = vld [vmem:[#allocation110_spill] sm:$0xff] }
 0x48c   : > { %v2231_v30 = vadd.f32 %v2216_v19, %v5906_v24  ;;  %v2783_v8 = vmul.f32 %v2779_v55, %v2774_v27  ;;  %v2222_v11 = vadd.f32 %v6873_v40, %v2181_v23  ;;  %v6874_v24 = vld [vmem:[#allocation112_spill] sm:$0xff]  ;;  %v973_v35 = vld [vmem:[#allocation14 + $0xb0] sm:$0xff] }
 0x48d   : > { %2598 = vmatmul.f32.gmra.mxu2 %v2478_v57  ;;  %v2776_v29 = vmax.f32 %v2232_v38, 0.0  ;;  %v2143_v52 = vadd.f32 %v6029_v56, %v6874_v24  ;;  %v968_v23 = vld [vmem:[#allocation14 + $0x88] sm:$0xff]  ;;  %v967_v24 = vld [vmem:[#allocation14 + $0x80] sm:$0xff] }
 0x48e   : > { %v2775_v39 = vmax.f32 %v2231_v30, 0.0  ;;  %v2233_v44 = vadd.f32 %v2222_v11, %v6875_v12 }
 0x48f   : > { %v2785_v5 = vmul.f32 %v2779_v55, %v2776_v29  ;;  %v2184_v22 = vadd.f32 %v6876_v60, %v2143_v52  ;;  %v3961_v60 = vld [vmem:[%s6731_s3] ss:$0 sm:$0xff] }
 0x490   : > { %v2784_v9 = vmul.f32 %v2779_v55, %v2775_v39  ;;  %v2777_v32 = vmax.f32 %v2233_v44, 0.0  ;;  %v970_v39 = vld [vmem:[#allocation14 + $0x98] sm:$0xff] }
 0x491   : > { %v2225_v51 = vadd.f32 %v6877_v58, %v2184_v22 }
 0x492   : > { %v2786_v36 = vmul.f32 %v2779_v55, %v2777_v32 }
 0x493   : > { %v2234_v31 = vadd.f32 %v2225_v51, %v6878_v49 }
 0x495   : > { %2832 = vmatmul.f32.vlgmr.msrb.gmra.mxu2 %v2780_v14  ;;  %v2778_v47 = vmax.f32 %v2234_v31, 0.0  ;;  %v978_v14 = vld [vmem:[#allocation14 + $0xd8] sm:$0xff] }
 0x496   : > { %2861 = vmatpush.msrb.mxu3 %v978_v14 }
 0x497   : > { %v2787_v21 = vmul.f32 %v2779_v55, %v2778_v47 }
 0x498   : > { %2862 = vmatpush.msrb.mxu3 %v977_v46  ;;  %v6885_v46 = vld [vmem:[#allocation65_spill] sm:$0xff] }
 0x49a   : > { %2863 = vmatpush.msrb.mxu3 %v976_v33 }
 0x49c   : > { %2864 = vmatpush.msrb.mxu3 %v975_v63 }
 0x49d   : > { %2835 = vmatmul.f32.gmra.mxu2 %v2781_v4 }
 0x49e   : > { %2865 = vmatpush.msrb.mxu3 %v974_v37 }
 0x4a0   : > { %2866 = vmatpush.msrb.mxu3 %v973_v35 }
 0x4a2   : > { %2867 = vmatpush.msrb.mxu3 %v972_v42 }
 0x4a4   : > { %2868 = vmatpush.msrb.mxu3 %v971_v0  ;;  %v996_v0 = vld [vmem:[#allocation14 + $0x168] sm:$0xff] }
 0x4a5   : > { %2838 = vmatmul.f32.gmra.mxu2 %v2782_v7 }
 0x4a6   : > { %2869 = vmatpush.msrb.mxu3 %v970_v39  ;;  %v995_v39 = vld [vmem:[#allocation14 + $0x160] sm:$0xff] }
 0x4ad   : > { %2841 = vmatmul.f32.gmra.mxu2 %v2783_v8 }
 0x4b5   : > { %2844 = vmatmul.f32.gmra.mxu2 %v2784_v9  ;;  %v969_v9 = vld [vmem:[#allocation14 + $0x90] sm:$0xff] }
 0x4b6   : > { %2870 = vmatpush.msrb.mxu3 %v969_v9  ;;  %v6891_v9 = vld [vmem:[#allocation74_spill] sm:$0xff] }
 0x4b8   : > { %2871 = vmatpush.msrb.mxu3 %v968_v23  ;;  %v1601_v23 = vadd.f32 %v6029_v56, %v6891_v9  ;;  %v986_v9 = vld [vmem:[#allocation14 + $0x118] sm:$0xff] }
 0x4ba   : > { %2872 = vmatpush.msrb.mxu3 %v967_v24  ;;  %v6893_v24 = vld [vmem:[#allocation73_spill] sm:$0xff] }
 0x4bd   : > { %2847 = vmatmul.f32.gmra.mxu2 %v2785_v5 }
 0x4bf   : > { %v2537_v26 = vpop.f32.mrf.mxu1 }
 0x4c5   : > { %2850 = vmatmul.f32.gmra.mxu2 %v2786_v36 }
 0x4c7   : > { %v2540_v50 = vpop.f32.mrf.mxu1 }
 0x4c9   : > { %v2496_v18 = vpop.f32.mrf.mxu0 }
 0x4ca   : > { %v2497_v45 = vadd.f32 %v6879_v54, %v2496_v18  ;;  %v6880_v18 = vld [vmem:[#allocation68_spill] sm:$0xff] }
 0x4cc   : > { %v2538_v17 = vadd.f32 %v2537_v26, %v2497_v45  ;;  %v6881_v45 = vld [vmem:[#allocation63_spill] sm:$0xff] }
 0x4cd   : > { %2853 = vmatmul.f32.gmra.mxu2 %v2787_v21  ;;  %v1592_v21 = vadd.f32 %v6029_v56, %v6880_v18  ;;  %v992_v18 = vld [vmem:[#allocation14 + $0x148] sm:$0xff] }
 0x4cf   : > { %v2543_v55 = vpop.f32.mrf.mxu1  ;;  %v1633_v61 = vadd.f32 %v6881_v45, %v1592_v21  ;;  %v991_v21 = vld [vmem:[#allocation14 + $0x140] sm:$0xff]  ;;  %v6899_v45 = vld [vmem:[#allocation78_spill] sm:$0xff] }
 0x4d1   : > { %v2499_v16 = vpop.f32.mrf.mxu0 }
 0x4d2   : > { %v2500_v43 = vadd.f32 %v6879_v54, %v2499_v16 }
 0x4d4   : > { %v2541_v25 = vadd.f32 %v2540_v50, %v2500_v43  ;;  %v6883_v43 = vld [vmem:[#allocation69_spill] sm:$0xff] }
 0x4d7   : > { %v2546_v2 = vpop.f32.mrf.mxu1 }
 0x4d8   : > { %v2578_v28 = vpop.f32.mrf.mxu2 }
 0x4d9   : > { %v6076_v20 = vadd.f32 %v2578_v28, %v2538_v17  ;;  %v2502_v57 = vpop.f32.mrf.mxu0  ;;  %v6882_v28 = vld [vmem:[#allocation71_spill] sm:$0xff] }
 0x4da   : > { %v2503_v4 = vadd.f32 %v6879_v54, %v2502_v57  ;;  %v1674_v10 = vadd.f32 %v6882_v28, %v1633_v61  ;;  %v1607_v61 = vadd.f32 %v6029_v56, %v6899_v45  ;;  %v6900_v28 = vld [vmem:[#allocation64_spill] sm:$0xff] }
 0x4db   : > { %v2602_v59 = vmax.f32 %v6076_v20, 0.0 }
 0x4dc   : > { %v2544_v48 = vadd.f32 %v2543_v55, %v2503_v4  ;;  %v6111_v14 = vadd.f32 %v1674_v10, %v6884_v15  ;;  %v998_v4 = vld [vmem:[#allocation14 + $0x178] sm:$0xff] }
 0x4dd   : > { %2610 = vst [vmem:[#allocation2 + $0x8] sm:$0xff] %v2602_v59  ;;  %2691 = vmatmul.f32.vlgmr.msrb.gmra.mxu0 %v2602_v59  ;;  %2653 = vmatmul.f32.gmra.mxu3 %v2602_v59  ;;  %v1595_v59 = vadd.f32 %v6029_v56, %v6883_v43  ;;  %v990_v43 = vld [vmem:[#allocation14 + $0x138] sm:$0xff] }
 0x4de   : > { %2898 = vmatpush.msra.mxu0 %v998_v4  ;;  %v2788_v63 = vmax.f32 %v6111_v14, 0.0  ;;  %v6904_v4 = vld [vmem:[#allocation59_spill] sm:$0xff] }
 0x4df   : > { %v2549_v3 = vpop.f32.mrf.mxu1 }
 0x4e0   : > { %v2581_v53 = vpop.f32.mrf.mxu2 }
 0x4e1   : > { %v6080_v62 = vadd.f32 %v2581_v53, %v2541_v25  ;;  %v2505_v13 = vpop.f32.mrf.mxu0 }
 0x4e2   : > { %v2506_v30 = vadd.f32 %v6879_v54, %v2505_v13  ;;  %v1636_v13 = vadd.f32 %v6885_v46, %v1595_v59  ;;  %v989_v59 = vld [vmem:[#allocation14 + $0x130] sm:$0xff] }
 0x4e3   : > { %v2603_v41 = vmax.f32 %v6080_v62, 0.0  ;;  %v6903_v46 = vld [vmem:[#allocation82_spill] sm:$0xff] }
 0x4e4   : > { %v2547_v1 = vadd.f32 %v2546_v2, %v2506_v30  ;;  %v6886_v2 = vld [vmem:[#allocation70_spill] sm:$0xff]  ;;  %v6889_v30 = vld [vmem:[#allocation72_spill] sm:$0xff] }
 0x4e5   : > { %2611 = vst [vmem:[#allocation2 + $0x10] sm:$0xff] %v2603_v41  ;;  %2694 = vmatmul.f32.gmra.mxu0 %v2603_v41  ;;  %2656 = vmatmul.f32.gmra.mxu3 %v2603_v41  ;;  %v1677_v37 = vadd.f32 %v6886_v2, %v1636_v13  ;;  %v1610_v13 = vadd.f32 %v6029_v56, %v6903_v46 }
 0x4e6   : > { %2732 = vmatmul.f32.vlgmr.msra.gmra.mxu1 %v2603_v41  ;;  %v997_v41 = vld [vmem:[#allocation14 + $0x170] sm:$0xff] }
 0x4e7   : > { %v2552_v5 = vpop.f32.mrf.mxu1  ;;  %2899 = vmatpush.msra.mxu0 %v997_v41 }
 0x4e8   : > { %v2584_v7 = vpop.f32.mrf.mxu2 }
 0x4e9   : > { %v6084_v27 = vadd.f32 %v2584_v7, %v2544_v48  ;;  %v2508_v19 = vpop.f32.mrf.mxu0  ;;  %v6887_v7 = vld [vmem:[#allocation67_spill] sm:$0xff]  ;;  %2900 = vmatpush.msra.mxu0 %v996_v0 }
 0x4ea   : > { %v2509_v29 = vadd.f32 %v6879_v54, %v2508_v19  ;;  %v1598_v35 = vadd.f32 %v6029_v56, %v6887_v7  ;;  %v6888_v19 = vld [vmem:[#allocation53_spill] sm:$0xff] }
 0x4eb   : > { %v2604_v8 = vmax.f32 %v6084_v27, 0.0  ;;  %v6122_v42 = vadd.f32 %v1677_v37, %v6888_v19  ;;  %2901 = vmatpush.msra.mxu0 %v995_v39  ;;  %v6906_v37 = vld [vmem:[#allocation129_spill] sm:$0xff]  ;;  %v6908_v39 = vld [vmem:[#allocation66_spill] sm:$0xff] }
 0x4ec   : > { %v2550_v52 = vadd.f32 %v2549_v3, %v2509_v29  ;;  %v3962_v29 = vld [vmem:[#allocation2] sm:$0xff] }
 0x4ed   : > { %2612 = vst [vmem:[#allocation2 + $0x18] sm:$0xff] %v2604_v8  ;;  %2697 = vmatmul.f32.gmra.mxu0 %v2604_v8  ;;  %2659 = vmatmul.f32.gmra.mxu3 %v2604_v8 }
 0x4ee   : > { %2735 = vmatmul.f32.gmra.mxu1 %v2604_v8  ;;  %v1639_v8 = vadd.f32 %v6889_v30, %v1598_v35  ;;  %v988_v35 = vld [vmem:[#allocation14 + $0x128] sm:$0xff]  ;;  %v987_v30 = vld [vmem:[#allocation14 + $0x120] sm:$0xff] }
 0x4ef   : > { %v2555_v26 = vpop.f32.mrf.mxu1 }
 0x4f0   : > { %v2587_v38 = vpop.f32.mrf.mxu2 }
 0x4f1   : > { %v6088_v6 = vadd.f32 %v2587_v38, %v2547_v1  ;;  %v2511_v11 = vpop.f32.mrf.mxu0  ;;  %v6890_v1 = vld [vmem:[#allocation75_spill] sm:$0xff]  ;;  %v2789_v38 = vmax.f32 %v6122_v42, 0.0 }
 0x4f2   : > { %v2512_v22 = vadd.f32 %v3961_v60, %v2511_v11  ;;  %v1680_v3 = vadd.f32 %v6890_v1, %v1639_v8  ;;  %v6907_v8 = vld [vmem:[#allocation104_spill] sm:$0xff] }
 0x4f3   : > { %v2605_v40 = vmax.f32 %v6088_v6, 0.0  ;;  %v1613_v0 = vadd.f32 %v6029_v56, %v6907_v8 }
 0x4f4   : > { %v2553_v51 = vadd.f32 %v2552_v5, %v2512_v22  ;;  %v993_v5 = vld [vmem:[#allocation14 + $0x150] sm:$0xff] }
 0x4f5   : > { %2613 = vst [vmem:[#allocation2 + $0x20] sm:$0xff] %v2605_v40  ;;  %2700 = vmatmul.f32.gmra.mxu0 %v2605_v40  ;;  %2662 = vmatmul.f32.gmra.mxu3 %v2605_v40 }
 0x4f6   : > { %2738 = vmatmul.f32.gmra.mxu1 %v2605_v40  ;;  %v6892_v40 = vld [vmem:[#allocation62_spill] sm:$0xff] }
 0x4f7   : > { %v2558_v55 = vpop.f32.mrf.mxu1  ;;  %v6130_v11 = vadd.f32 %v1680_v3, %v6892_v40  ;;  %v6909_v3 = vld [vmem:[#allocation128_spill] sm:$0xff] }
 0x4f8   : > { %v2590_v12 = vpop.f32.mrf.mxu2 }
 0x4f9   : > { %v6092_v44 = vadd.f32 %v2590_v12, %v2550_v52  ;;  %v2514_v58 = vpop.f32.mrf.mxu0  ;;  %v1642_v52 = vadd.f32 %v6893_v24, %v1601_v23  ;;  %v994_v12 = vld [vmem:[#allocation14 + $0x158] sm:$0xff]  ;;  %v985_v23 = vld [vmem:[#allocation14 + $0x110] sm:$0xff] }
 0x4fa   : > { %v2515_v36 = vadd.f32 %v3961_v60, %v2514_v58  ;;  %2902 = vmatpush.msra.mxu0 %v994_v12  ;;  %v6895_v58 = vld [vmem:[#allocation76_spill] sm:$0xff]  ;;  %v6911_v12 = vld [vmem:[#allocation61_spill] sm:$0xff] }
 0x4fb   : > { %v2606_v32 = vmax.f32 %v6092_v44, 0.0 }
 0x4fc   : > { %v2556_v50 = vadd.f32 %v2555_v26, %v2515_v36  ;;  %2903 = vmatpush.msra.mxu0 %v993_v5 }
 0x4fd   : > { %2614 = vst [vmem:[#allocation2 + $0x28] sm:$0xff] %v2606_v32  ;;  %2703 = vmatmul.f32.gmra.mxu0 %v2606_v32  ;;  %2665 = vmatmul.f32.gmra.mxu3 %v2606_v32 }
 0x4fe   : > { %2741 = vmatmul.f32.gmra.mxu1 %v2606_v32  ;;  %v2790_v32 = vmax.f32 %v6130_v11, 0.0  ;;  %2904 = vmatpush.msra.mxu0 %v992_v18 }
 0x500   : > { %v2593_v49 = vpop.f32.mrf.mxu2  ;;  %2905 = vmatpush.msra.mxu0 %v991_v21 }
 0x501   : > { %v6098_v31 = vadd.f32 %v2593_v49, %v2553_v51  ;;  %v2517_v16 = vpop.f32.mrf.mxu0  ;;  %v1604_v51 = vadd.f32 %v6029_v56, %v6895_v58  ;;  %v6896_v49 = vld [vmem:[#allocation57_spill] sm:$0xff]  ;;  %v2651_v58 = vpop.f32.mrf.mxu3 }
 0x502   : > { %v2518_v57 = vadd.f32 %v3961_v60, %v2517_v16  ;;  %v6894_v60 = vld [vmem:[#allocation80_spill] sm:$0xff]  ;;  %2906 = vmatpush.msra.mxu0 %v990_v43 }
 0x503   : > { %v2607_v47 = vmax.f32 %v6098_v31, 0.0  ;;  %v1683_v22 = vadd.f32 %v6894_v60, %v1642_v52  ;;  %v984_v60 = vld [vmem:[#allocation14 + $0x108] sm:$0xff] }
 0x504   : > { %v2559_v25 = vadd.f32 %v2558_v55, %v2518_v57  ;;  %v6901_v57 = vld [vmem:[#allocation81_spill] sm:$0xff]  ;;  %v6902_v55 = vld [vmem:[#allocation84_spill] sm:$0xff]  ;;  %2907 = vmatpush.msra.mxu0 %v989_v59 }
 0x505   : > { %2615 = vst [vmem:[#allocation2 + $0x30] sm:$0xff] %v2607_v47  ;;  %2706 = vmatmul.f32.gmra.mxu0 %v2607_v47  ;;  %2668 = vmatmul.f32.gmra.mxu3 %v2607_v47  ;;  %v6138_v36 = vadd.f32 %v1683_v22, %v6896_v49  ;;  %v983_v22 = vld [vmem:[#allocation14 + $0x100] sm:$0xff] }
 0x506   : > { %2744 = vmatmul.f32.gmra.mxu1 %v2607_v47  ;;  %v6897_v47 = vld [vmem:[#allocation77_spill] sm:$0xff]  ;;  %2908 = vmatpush.msra.mxu0 %v988_v35 }
 0x507   : > { %v1645_v26 = vadd.f32 %v6897_v47, %v1604_v51  ;;  %v2652_v47 = vadd.f32 %v6029_v56, %v2651_v58 }
 0x508   : > { %v2596_v54 = vpop.f32.mrf.mxu2  ;;  %2909 = vmatpush.msra.mxu0 %v987_v30 }
 0x509   : > { %v6104_v17 = vadd.f32 %v2596_v54, %v2556_v50  ;;  %v6898_v50 = vld [vmem:[#allocation79_spill] sm:$0xff]  ;;  %v2791_v54 = vmax.f32 %v6138_v36, 0.0 }
 0x50a   : > { %v1686_v16 = vadd.f32 %v6898_v50, %v1645_v26  ;;  %2910 = vmatpush.msra.mxu0 %v986_v9 }
 0x50b   : > { %v2608_v34 = vmax.f32 %v6104_v17, 0.0 }
 0x50c   : > { %v6146_v10 = vadd.f32 %v1686_v16, %v6900_v28  ;;  %2911 = vmatpush.msra.mxu0 %v985_v23 }
 0x50d   : > { %2616 = vst [vmem:[#allocation2 + $0x38] sm:$0xff] %v2608_v34  ;;  %2709 = vmatmul.f32.gmra.mxu0 %v2608_v34  ;;  %2671 = vmatmul.f32.gmra.mxu3 %v2608_v34 }
 0x50e   : > { %2747 = vmatmul.f32.gmra.mxu1 %v2608_v34  ;;  %v1648_v34 = vadd.f32 %v6901_v57, %v1607_v61  ;;  %2912 = vmatpush.msra.mxu0 %v984_v60  ;;  %v6175_v61 = vstv %s2770_s19  ;;  %s4375_s19 = scalar_lea.hbm %s6914_s8, 2048 }
 0x50f   : > { %p4377_p2 = scmp.lt.s32.totalorder %s4375_s19, %s4371_s22 }
 0x510   : > { %v2599_v53 = vpop.f32.mrf.mxu2  ;;  %2913 = vmatpush.msra.mxu0 %v983_v22 }
 0x511   : > { %v6114_v33 = vadd.f32 %v2599_v53, %v2559_v25  ;;  %v1689_v25 = vadd.f32 %v6902_v55, %v1648_v34  ;;  %v2792_v53 = vmax.f32 %v6146_v10, 0.0  ;;  %p4378_p8 = por %p4377_p2, %p4376_p12 }
 0x513   : > { %v2609_v48 = vmax.f32 %v6114_v33, 0.0  ;;  %v6154_v41 = vadd.f32 %v1689_v25, %v6904_v4  ;;  %p4379_p6 = pnand %p4378_p8, %p4374_p5 }
 0x515   : > { %2617 = vst [vmem:[#allocation2 + $0x40] sm:$0xff] %v2609_v48  ;;  %2712 = vmatmul.f32.gmra.mxu0 %v2609_v48  ;;  %2873 = vmatmul.f32.vlgmr.msrb.gmra.mxu3 %v2788_v63  ;;  %v6905_v63 = vld [vmem:[#allocation83_spill] sm:$0xff]  ;;  %v2793_v7 = vmax.f32 %v6154_v41, 0.0 }
 0x516   : > { %2750 = vmatmul.f32.gmra.mxu1 %v2609_v48  ;;  %v1651_v2 = vadd.f32 %v6905_v63, %v1610_v13 }
 0x518   : > { %v1692_v48 = vadd.f32 %v6906_v37, %v1651_v2 }
 0x51a   : > { %v6162_v1 = vadd.f32 %v1692_v48, %v6908_v39 }
 0x51c   : > { %v2794_v52 = vmax.f32 %v6162_v1, 0.0 }
 0x51d   : > { %2876 = vmatmul.f32.gmra.mxu3 %v2789_v38  ;;  %v1654_v38 = vadd.f32 %v6909_v3, %v1613_v0 }
 0x51e   : > { %2753 = vmatmul.f32.gmra.mxu1 %v3962_v29  ;;  %v6910_v29 = vld [vmem:[#allocation130_spill] sm:$0xff] }
 0x51f   : > { %v1695_v24 = vadd.f32 %v6910_v29, %v1654_v38 }
 0x521   : > { %v6168_v5 = vadd.f32 %v1695_v24, %v6911_v12 }
 0x525   : > { %2879 = vmatmul.f32.gmra.mxu3 %v2790_v32  ;;  %v2795_v32 = vmax.f32 %v6168_v5, 0.0 }
 0x52d   : > { %2882 = vmatmul.f32.gmra.mxu3 %v2791_v54 }
 0x535   : > { %2885 = vmatmul.f32.gmra.mxu3 %v2792_v53 }
 0x53d   : > { %2888 = vmatmul.f32.gmra.mxu3 %v2793_v7 }
 0x545   : > { %2891 = vmatmul.f32.gmra.mxu3 %v2794_v52 }
 0x54d   : > { %2894 = vmatmul.f32.gmra.mxu3 %v2795_v32 }
 0x55a   : > { %v2692_v51 = vpop.f32.mrf.mxu0 }
 0x55b   : > { %v2693_v18 = vadd.f32 %v2692_v51, %v2652_v47 }
 0x560   : > { %v2654_v26 = vpop.f32.mrf.mxu3 }
 0x561   : > { %v2655_v54 = vadd.f32 %v6029_v56, %v2654_v26 }
 0x562   : > { %v2695_v21 = vpop.f32.mrf.mxu0 }
 0x563   : > { %v2733_v50 = vpop.f32.mrf.mxu1  ;;  %v2696_v55 = vadd.f32 %v2695_v21, %v2655_v54 }
 0x564   : > { %v2734_v16 = vadd.f32 %v2733_v50, %v2693_v18 }
 0x566   : > { %v2757_v45 = vadd.f32 %v2734_v16, %v6076_v20 }
 0x568   : > { %v2796_v57 = vmax.f32 %v2757_v45, 0.0  ;;  %v2657_v34 = vpop.f32.mrf.mxu3 }
 0x569   : > { %v2658_v46 = vadd.f32 %v6029_v56, %v2657_v34 }
 0x56a   : > { %v2698_v43 = vpop.f32.mrf.mxu0  ;;  %v2805_v59 = vmul.f32 %v6175_v61, %v2796_v57 }
 0x56b   : > { %v2736_v25 = vpop.f32.mrf.mxu1  ;;  %v2699_v48 = vadd.f32 %v2698_v43, %v2658_v46 }
 0x56c   : > { %v2737_v53 = vadd.f32 %v2736_v25, %v2696_v55  ;;  %2914 = vmatmul.f32.vlgmr.msra.gmra.mxu0 %v2805_v59  ;;  %v1060_v55 = vld [vmem:[#allocation15 + $0x1e8] sm:$0xff] }
 0x56d   : > { %v1056_v25 = vld [vmem:[#allocation15 + $0x1c8] sm:$0xff]  ;;  %3013 = vmatpush.msra.mxu2 %v1060_v55  ;;  %v1031_v55 = vld [vmem:[#allocation15 + $0x100] sm:$0xff] }
 0x56e   : > { %v2758_v13 = vadd.f32 %v2737_v53, %v6080_v62 }
 0x56f   : > { %3014 = vmatpush.msra.mxu2 %v1056_v25  ;;  %v1012_v25 = vld [vmem:[#allocation15 + $0x68] sm:$0xff] }
 0x570   : > { %v2797_v63 = vmax.f32 %v2758_v13, 0.0  ;;  %v2660_v2 = vpop.f32.mrf.mxu3 }
 0x571   : > { %v2661_v30 = vadd.f32 %v6029_v56, %v2660_v2 }
 0x572   : > { %v2701_v37 = vpop.f32.mrf.mxu0  ;;  %v2806_v20 = vmul.f32 %v6175_v61, %v2797_v63 }
 0x573   : > { %v2739_v7 = vpop.f32.mrf.mxu1  ;;  %v2702_v9 = vadd.f32 %v2701_v37, %v2661_v30 }
 0x574   : > { %v2740_v35 = vadd.f32 %v2739_v7, %v2699_v48  ;;  %2917 = vmatmul.f32.gmra.mxu0 %v2806_v20  ;;  %v1052_v7 = vld [vmem:[#allocation15 + $0x1a8] sm:$0xff] }
 0x575   : > { %3015 = vmatpush.msra.mxu2 %v1052_v7  ;;  %v1019_v7 = vld [vmem:[#allocation15 + $0xa0] sm:$0xff] }
 0x576   : > { %v2759_v8 = vadd.f32 %v2740_v35, %v6084_v27 }
 0x578   : > { %v2798_v0 = vmax.f32 %v2759_v8, 0.0  ;;  %v2663_v3 = vpop.f32.mrf.mxu3 }
 0x579   : > { %v2664_v24 = vadd.f32 %v6029_v56, %v2663_v3 }
 0x57a   : > { %v2704_v38 = vpop.f32.mrf.mxu0  ;;  %v2807_v23 = vmul.f32 %v6175_v61, %v2798_v0 }
 0x57b   : > { %v2742_v62 = vpop.f32.mrf.mxu1  ;;  %v2705_v32 = vadd.f32 %v2704_v38, %v2664_v24  ;;  %v1036_v24 = vld [vmem:[#allocation15 + $0x128] sm:$0xff] }
 0x57c   : > { %v2743_v29 = vadd.f32 %v2742_v62, %v2702_v9  ;;  %2920 = vmatmul.f32.gmra.mxu0 %v2807_v23  ;;  %v1044_v9 = vld [vmem:[#allocation15 + $0x168] sm:$0xff]  ;;  %v1061_v23 = vld [vmem:[#allocation15 + $0x1f0] sm:$0xff] }
 0x57d   : > { %3054 = vmatpush.msra.mxu3 %v1061_v23  ;;  %v1057_v62 = vld [vmem:[#allocation15 + $0x1d0] sm:$0xff]  ;;  %v1014_v23 = vld [vmem:[#allocation15 + $0x78] sm:$0xff] }
 0x57e   : > { %v2760_v52 = vadd.f32 %v2743_v29, %v6088_v6  ;;  %v1059_v29 = vld [vmem:[#allocation15 + $0x1e0] sm:$0xff] }
 0x57f   : > { %2972 = vmatpush.msrb.mxu1 %v1059_v29  ;;  %3055 = vmatpush.msra.mxu3 %v1057_v62  ;;  %v1010_v62 = vld [vmem:[#allocation15 + $0x58] sm:$0xff]  ;;  %v1004_v29 = vld [vmem:[#allocation15 + $0x28] sm:$0xff] }
 0x580   : > { %v2799_v60 = vmax.f32 %v2760_v52, 0.0  ;;  %v2666_v22 = vpop.f32.mrf.mxu3  ;;  %v1053_v52 = vld [vmem:[#allocation15 + $0x1b0] sm:$0xff] }
 0x581   : > { %v2667_v26 = vadd.f32 %v6029_v56, %v2666_v22  ;;  %3056 = vmatpush.msra.mxu3 %v1053_v52  ;;  %v1049_v22 = vld [vmem:[#allocation15 + $0x190] sm:$0xff] }
 0x582   : > { %v2808_v58 = vmul.f32 %v6175_v61, %v2799_v60  ;;  %v2707_v51 = vpop.f32.mrf.mxu0  ;;  %v1055_v60 = vld [vmem:[#allocation15 + $0x1c0] sm:$0xff]  ;;  %v1005_v52 = vld [vmem:[#allocation15 + $0x30] sm:$0xff] }
 0x583   : > { %v2745_v27 = vpop.f32.mrf.mxu1  ;;  %v2708_v16 = vadd.f32 %v2707_v51, %v2667_v26  ;;  %2973 = vmatpush.msrb.mxu1 %v1055_v60  ;;  %3057 = vmatpush.msra.mxu3 %v1049_v22  ;;  %v6198_v51 = vld [vmem:[#allocation15 + $0x1f8] sm:$0xff]  ;;  %v1024_v26 = vld [vmem:[#allocation15 + $0xc8] sm:$0xff]  ;;  %v999_v22 = vld [vmem:[#allocation15] sm:$0xff] }
 0x584   : > { %v2746_v47 = vadd.f32 %v2745_v27, %v2705_v32  ;;  %2923 = vmatmul.f32.gmra.mxu0 %v2808_v58  ;;  %v1051_v32 = vld [vmem:[#allocation15 + $0x1a0] sm:$0xff]  ;;  %v1045_v58 = vld [vmem:[#allocation15 + $0x170] sm:$0xff]  ;;  %v1006_v60 = vld [vmem:[#allocation15 + $0x38] sm:$0xff] }
 0x585   : > { %2974 = vmatpush.msrb.mxu1 %v1051_v32  ;;  %3058 = vmatpush.msra.mxu3 %v1045_v58  ;;  %v1047_v27 = vld [vmem:[#allocation15 + $0x180] sm:$0xff]  ;;  %v1001_v32 = vld [vmem:[#allocation15 + $0x10] sm:$0xff]  ;;  %v2833_v58 = vpop.f32.mrf.mxu2 }
 0x586   : > { %v2761_v18 = vadd.f32 %v2746_v47, %v6092_v44  ;;  %v6200_v47 = vld [vmem:[#allocation15 + $0x1d8] sm:$0xff]  ;;  %3095 = vmatpush.msrb.mxu0 %v6198_v51 }
 0x587   : > { %2975 = vmatpush.msrb.mxu1 %v1047_v27 }
 0x588   : > { %v2800_v21 = vmax.f32 %v2761_v18, 0.0  ;;  %v2669_v50 = vpop.f32.mrf.mxu3  ;;  %v1041_v18 = vld [vmem:[#allocation15 + $0x150] sm:$0xff]  ;;  %3096 = vmatpush.msrb.mxu0 %v6200_v47 }
 0x589   : > { %v2670_v34 = vadd.f32 %v6029_v56, %v2669_v50  ;;  %3059 = vmatpush.msra.mxu3 %v1041_v18  ;;  %v6203_v50 = vld [vmem:[#allocation15 + $0x1b8] sm:$0xff] }
 0x58a   : > { %v2809_v54 = vmul.f32 %v6175_v61, %v2800_v21  ;;  %v2710_v57 = vpop.f32.mrf.mxu0  ;;  %v1043_v21 = vld [vmem:[#allocation15 + $0x160] sm:$0xff]  ;;  %3097 = vmatpush.msrb.mxu0 %v6203_v50 }
 0x58b   : > { %v2748_v45 = vpop.f32.mrf.mxu1  ;;  %v2711_v53 = vadd.f32 %v2710_v57, %v2670_v34  ;;  %2976 = vmatpush.msrb.mxu1 %v1043_v21  ;;  %v1016_v57 = vld [vmem:[#allocation15 + $0x88] sm:$0xff]  ;;  %v1033_v34 = vld [vmem:[#allocation15 + $0x110] sm:$0xff]  ;;  %v6222_v21 = vld [vmem:[#allocation17] ss:$0 sm:$0xff] }
 0x58c   : > { %v2749_v6 = vadd.f32 %v2748_v45, %v2708_v16  ;;  %2926 = vmatmul.f32.gmra.mxu0 %v2809_v54  ;;  %v1020_v16 = vld [vmem:[#allocation15 + $0xa8] sm:$0xff]  ;;  %v1037_v54 = vld [vmem:[#allocation15 + $0x130] sm:$0xff]  ;;  %v6206_v45 = vld [vmem:[#allocation15 + $0x198] sm:$0xff] }
 0x58d   : > { %3060 = vmatpush.msra.mxu3 %v1037_v54  ;;  %3098 = vmatpush.msrb.mxu0 %v6206_v45 }
 0x58e   : > { %v2762_v43 = vadd.f32 %v2749_v6, %v6098_v31  ;;  %v1048_v31 = vld [vmem:[#allocation15 + $0x188] sm:$0xff]  ;;  %v1039_v6 = vld [vmem:[#allocation15 + $0x140] sm:$0xff] }
 0x58f   : > { %3016 = vmatpush.msra.mxu2 %v1048_v31  ;;  %2977 = vmatpush.msrb.mxu1 %v1039_v6  ;;  %v1030_v31 = vld [vmem:[#allocation15 + $0xf8] sm:$0xff] }
 0x590   : > { %v2801_v59 = vmax.f32 %v2762_v43, 0.0  ;;  %v2672_v44 = vpop.f32.mrf.mxu3  ;;  %v1035_v43 = vld [vmem:[#allocation15 + $0x120] sm:$0xff]  ;;  %3061 = vmatpush.msra.mxu3 %v1033_v34 }
 0x591   : > { %v2673_v2 = vadd.f32 %v6029_v56, %v2672_v44  ;;  %v1040_v56 = vld [vmem:[#allocation15 + $0x148] sm:$0xff]  ;;  %3017 = vmatpush.msra.mxu2 %v1044_v9  ;;  %2978 = vmatpush.msrb.mxu1 %v1035_v43  ;;  %v6212_v44 = vld [vmem:[#allocation15 + $0x158] sm:$0xff]  ;;  %v1013_v9 = vld [vmem:[#allocation15 + $0x70] sm:$0xff] }
 0x592   : > { %v2810_v46 = vmul.f32 %v6175_v61, %v2801_v59  ;;  %v2713_v48 = vpop.f32.mrf.mxu0  ;;  %v6209_v59 = vld [vmem:[#allocation15 + $0x178] sm:$0xff] }
 0x593   : > { %v2751_v13 = vpop.f32.mrf.mxu1  ;;  %v2714_v35 = vadd.f32 %v2713_v48, %v2673_v2  ;;  %3018 = vmatpush.msra.mxu2 %v1040_v56  ;;  %3099 = vmatpush.msrb.mxu0 %v6209_v59  ;;  %v1021_v2 = vld [vmem:[#allocation15 + $0xb0] sm:$0xff]  ;;  %v1023_v48 = vld [vmem:[#allocation15 + $0xc0] sm:$0xff] }
 0x594   : > { %v2752_v63 = vadd.f32 %v2751_v13, %v2711_v53  ;;  %2929 = vmatmul.f32.gmra.mxu0 %v2810_v46  ;;  %v1029_v53 = vld [vmem:[#allocation15 + $0xf0] sm:$0xff]  ;;  %v1027_v13 = vld [vmem:[#allocation15 + $0xe0] sm:$0xff]  ;;  %2979 = vmatpush.msrb.mxu1 %v1031_v55 }
 0x595   : > { %3019 = vmatpush.msra.mxu2 %v1036_v24  ;;  %v1025_v46 = vld [vmem:[#allocation15 + $0xd0] sm:$0xff]  ;;  %3062 = vmatpush.msra.mxu3 %v1029_v53  ;;  %v1007_v56 = vld [vmem:[#allocation15 + $0x40] sm:$0xff] }
 0x596   : > { %v2763_v37 = vadd.f32 %v2752_v63, %v6104_v17  ;;  %v1008_v63 = vld [vmem:[#allocation15 + $0x48] sm:$0xff]  ;;  %3100 = vmatpush.msrb.mxu0 %v6212_v44  ;;  %2980 = vmatpush.msrb.mxu1 %v1027_v13  ;;  %v1003_v24 = vld [vmem:[#allocation15 + $0x20] sm:$0xff] }
 0x597   : > { %3063 = vmatpush.msra.mxu3 %v1025_v46 }
 0x598   : > { %v2802_v20 = vmax.f32 %v2763_v37, 0.0  ;;  %v1038_v37 = vld [vmem:[#allocation15 + $0x138] sm:$0xff]  ;;  %2981 = vmatpush.msrb.mxu1 %v1023_v48  ;;  %v2874_v27 = vpop.f32.mrf.mxu3 }
 0x599   : > { %3064 = vmatpush.msra.mxu3 %v1021_v2  ;;  %3101 = vmatpush.msrb.mxu0 %v1038_v37 }
 0x59a   : > { %v2811_v30 = vmul.f32 %v6175_v61, %v2802_v20  ;;  %v1034_v20 = vld [vmem:[#allocation15 + $0x118] sm:$0xff]  ;;  %2982 = vmatpush.msrb.mxu1 %v1019_v7 }
 0x59b   : > { %v2754_v8 = vpop.f32.mrf.mxu1  ;;  %3102 = vmatpush.msrb.mxu0 %v1034_v20 }
 0x59c   : > { %v2755_v0 = vadd.f32 %v2754_v8, %v2714_v35  ;;  %2932 = vmatmul.f32.gmra.mxu0 %v2811_v30  ;;  %v1026_v35 = vld [vmem:[#allocation15 + $0xd8] sm:$0xff]  ;;  %v1015_v8 = vld [vmem:[#allocation15 + $0x80] sm:$0xff] }
 0x59d   : > { %3103 = vmatpush.msrb.mxu0 %v1030_v31  ;;  %v1022_v30 = vld [vmem:[#allocation15 + $0xb8] sm:$0xff]  ;;  %2983 = vmatpush.msrb.mxu1 %v1015_v8 }
 0x59e   : > { %v2764_v3 = vadd.f32 %v2755_v0, %v6114_v33  ;;  %v1032_v33 = vld [vmem:[#allocation15 + $0x108] sm:$0xff]  ;;  %v1017_v0 = vld [vmem:[#allocation15 + $0x90] sm:$0xff] }
 0x59f   : > { %3020 = vmatpush.msra.mxu2 %v1032_v33  ;;  %3104 = vmatpush.msrb.mxu0 %v1026_v35  ;;  %v1000_v33 = vld [vmem:[#allocation15 + $0x8] sm:$0xff] }
 0x5a0   : > { %v2803_v38 = vmax.f32 %v2764_v3, 0.0  ;;  %v1018_v3 = vld [vmem:[#allocation15 + $0x98] sm:$0xff]  ;;  %3065 = vmatpush.msra.mxu3 %v1017_v0  ;;  %v2877_v18 = vpop.f32.mrf.mxu3 }
 0x5a1   : > { %3105 = vmatpush.msrb.mxu0 %v1022_v30 }
 0x5a2   : > { %v2812_v17 = vmul.f32 %v6175_v61, %v2803_v38  ;;  %v1028_v61 = vld [vmem:[#allocation15 + $0xe8] sm:$0xff]  ;;  %v1011_v38 = vld [vmem:[#allocation15 + $0x60] sm:$0xff]  ;;  %3066 = vmatpush.msra.mxu3 %v1013_v9 }
 0x5a3   : > { %3021 = vmatpush.msra.mxu2 %v1028_v61  ;;  %3106 = vmatpush.msrb.mxu0 %v1018_v3  ;;  %v1002_v61 = vld [vmem:[#allocation15 + $0x18] sm:$0xff] }
 0x5a4   : > { %2935 = vmatmul.f32.gmra.mxu0 %v2812_v17  ;;  %2984 = vmatpush.msrb.mxu1 %v1011_v38  ;;  %v1009_v17 = vld [vmem:[#allocation15 + $0x50] sm:$0xff] }
 0x5a5   : > { %3022 = vmatpush.msra.mxu2 %v1024_v26  ;;  %3107 = vmatpush.msrb.mxu0 %v1014_v23  ;;  %v2836_v26 = vpop.f32.mrf.mxu2 }
 0x5a6   : > { %2985 = vmatpush.msrb.mxu1 %v1007_v56  ;;  %3067 = vmatpush.msra.mxu3 %v1009_v17 }
 0x5a7   : > { %3023 = vmatpush.msra.mxu2 %v1020_v16  ;;  %3108 = vmatpush.msrb.mxu0 %v1010_v62 }
 0x5a8   : > { %2986 = vmatpush.msrb.mxu1 %v1003_v24  ;;  %3068 = vmatpush.msra.mxu3 %v1005_v52 }
 0x5a9   : > { %3024 = vmatpush.msra.mxu2 %v1016_v57  ;;  %3109 = vmatpush.msrb.mxu0 %v1006_v60  ;;  %v2837_v57 = vadd.f32 %v6222_v21, %v2836_v26 }
 0x5aa   : > { %2987 = vmatpush.msrb.mxu1 %v999_v22  ;;  %3069 = vmatpush.msra.mxu3 %v1001_v32 }
 0x5ab   : > { %3025 = vmatpush.msra.mxu2 %v1012_v25  ;;  %3110 = vmatpush.msrb.mxu0 %v1002_v61  ;;  %v2878_v43 = vadd.f32 %v2877_v18, %v2837_v57 }
 0x5ad   : > { %3026 = vmatpush.msra.mxu2 %v1008_v63  ;;  %v2839_v16 = vpop.f32.mrf.mxu2 }
 0x5af   : > { %3027 = vmatpush.msra.mxu2 %v1004_v29 }
 0x5b1   : > { %3028 = vmatpush.msra.mxu2 %v1000_v33 }
 0x5b3   : > { %3539 = vmatpush.msrb.mxu2 %v6198_v51  ;;  %v2834_v51 = vadd.f32 %v6222_v21, %v2833_v58 }
 0x5b5   : > { %3540 = vmatpush.msrb.mxu2 %v6200_v47  ;;  %v2875_v47 = vadd.f32 %v2874_v27, %v2834_v51  ;;  %v2842_v53 = vpop.f32.mrf.mxu2 }
 0x5b6   : > { %v2843_v7 = vadd.f32 %v6222_v21, %v2842_v53 }
 0x5b7   : > { %3541 = vmatpush.msrb.mxu2 %v6203_v50 }
 0x5b9   : > { %3542 = vmatpush.msrb.mxu2 %v6206_v45  ;;  %v2880_v45 = vpop.f32.mrf.mxu3 }
 0x5bb   : > { %3543 = vmatpush.msrb.mxu2 %v6209_v59 }
 0x5bd   : > { %3544 = vmatpush.msrb.mxu2 %v6212_v44 }
 0x5bf   : > { %3545 = vmatpush.msrb.mxu2 %v1038_v37 }
 0x5c1   : > { %3546 = vmatpush.msrb.mxu2 %v1034_v20  ;;  %v2883_v44 = vpop.f32.mrf.mxu3  ;;  %v2845_v20 = vpop.f32.mrf.mxu2 }
 0x5c3   : > { %3547 = vmatpush.msrb.mxu2 %v1030_v31 }
 0x5c5   : > { %3548 = vmatpush.msrb.mxu2 %v1026_v35  ;;  %v2884_v35 = vadd.f32 %v2883_v44, %v2843_v7  ;;  %v3965_v7 = vld [vmem:[%s4934_s14 + $0x8] sm:$0xff] }
 0x5c7   : > { %3549 = vmatpush.msrb.mxu2 %v1022_v30 }
 0x5c9   : > { %3550 = vmatpush.msrb.mxu2 %v1018_v3  ;;  %v2886_v31 = vpop.f32.mrf.mxu3  ;;  %v2846_v3 = vadd.f32 %v6222_v21, %v2845_v20  ;;  %v2848_v38 = vpop.f32.mrf.mxu2 }
 0x5ca   : > { %v2849_v29 = vadd.f32 %v6222_v21, %v2848_v38 }
 0x5cb   : > { %3551 = vmatpush.msrb.mxu2 %v1014_v23  ;;  %v2887_v9 = vadd.f32 %v2886_v31, %v2846_v3  ;;  %v3967_v3 = vld [vmem:[%s4934_s14 + $0x20] sm:$0xff] }
 0x5cd   : > { %3552 = vmatpush.msrb.mxu2 %v1010_v62 }
 0x5cf   : > { %3553 = vmatpush.msrb.mxu2 %v1006_v60 }
 0x5d1   : > { %3554 = vmatpush.msrb.mxu2 %v1002_v61  ;;  %v2889_v56 = vpop.f32.mrf.mxu3  ;;  %v2851_v60 = vpop.f32.mrf.mxu2 }
 0x5d2   : > { %v2890_v24 = vadd.f32 %v2889_v56, %v2849_v29  ;;  %v2852_v61 = vadd.f32 %v6222_v21, %v2851_v60 }
 0x5d9   : > { %v2892_v22 = vpop.f32.mrf.mxu3  ;;  %v2854_v18 = vpop.f32.mrf.mxu2 }
 0x5da   : > { %v2893_v58 = vadd.f32 %v2892_v22, %v2852_v61  ;;  %v3970_v22 = vld [vmem:[%s4934_s14 + $0x30] sm:$0xff] }
 0x5e9   : > { %v2915_v50 = vpop.f32.mrf.mxu0 }
 0x5ea   : > { %v2916_v54 = vadd.f32 %v2915_v50, %v2875_v47  ;;  %v2895_v47 = vpop.f32.mrf.mxu3 }
 0x5ec   : > { %v2939_v6 = vadd.f32 %v2916_v54, %v6884_v15  ;;  %v2840_v15 = vadd.f32 %v6222_v21, %v2839_v16  ;;  %v2855_v16 = vadd.f32 %v6222_v21, %v2854_v18 }
 0x5ee   : > { %v2947_v34 = vadd.f32 %v2939_v6, %v6111_v14  ;;  %v2881_v63 = vadd.f32 %v2880_v45, %v2840_v15  ;;  %v2896_v50 = vadd.f32 %v2895_v47, %v2855_v16 }
 0x5f0   : > { %v2955_v59 = vmax.f32 %v2947_v34, 0.0 }
 0x5f1   : > { %v2918_v55 = vpop.f32.mrf.mxu0 }
 0x5f2   : > { %v2919_v25 = vadd.f32 %v2918_v55, %v2878_v43  ;;  %2988 = vmatmul.f32.vlgmr.msrb.gmra.mxu1 %v2955_v59  ;;  %3029 = vmatmul.f32.vlgmr.msra.gmra.mxu2 %v2955_v59 }
 0x5f3   : > { %3070 = vmatmul.f32.vlgmr.msra.gmra.mxu3 %v2955_v59  ;;  %3111 = vmatmul.f32.vlgmr.msrb.gmra.mxu0 %v2955_v59 }
 0x5f4   : > { %v2940_v46 = vadd.f32 %v2919_v25, %v6888_v19 }
 0x5f6   : > { %v2948_v13 = vadd.f32 %v2940_v46, %v6122_v42  ;;  %v3964_v46 = vld [vmem:[%s4934_s14 + $0x18] sm:$0xff] }
 0x5f8   : > { %v2956_v14 = vmax.f32 %v2948_v13, 0.0 }
 0x5f9   : > { %v2921_v2 = vpop.f32.mrf.mxu0 }
 0x5fa   : > { %v2922_v37 = vadd.f32 %v2921_v2, %v2881_v63  ;;  %2991 = vmatmul.f32.gmra.mxu1 %v2956_v14  ;;  %3032 = vmatmul.f32.gmra.mxu2 %v2956_v14 }
 0x5fb   : > { %3073 = vmatmul.f32.gmra.mxu3 %v2956_v14  ;;  %3114 = vmatmul.f32.gmra.mxu0 %v2956_v14 }
 0x5fc   : > { %v2941_v48 = vadd.f32 %v2922_v37, %v6892_v40 }
 0x5fe   : > { %v2949_v19 = vadd.f32 %v2941_v48, %v6130_v11 }
 0x600   : > { %v2957_v30 = vmax.f32 %v2949_v19, 0.0 }
 0x601   : > { %v2924_v8 = vpop.f32.mrf.mxu0 }
 0x602   : > { %v2925_v42 = vadd.f32 %v2924_v8, %v2884_v35  ;;  %2994 = vmatmul.f32.gmra.mxu1 %v2957_v30  ;;  %3035 = vmatmul.f32.gmra.mxu2 %v2957_v30 }
 0x603   : > { %3076 = vmatmul.f32.gmra.mxu3 %v2957_v30  ;;  %3117 = vmatmul.f32.gmra.mxu0 %v2957_v30  ;;  %v3966_v30 = vld [vmem:[%s4934_s14 + $0x10] sm:$0xff] }
 0x604   : > { %v2942_v0 = vadd.f32 %v2925_v42, %v6896_v49 }
 0x606   : > { %v2950_v40 = vadd.f32 %v2942_v0, %v6138_v36 }
 0x608   : > { %v2958_v23 = vmax.f32 %v2950_v40, 0.0 }
 0x609   : > { %v2927_v11 = vpop.f32.mrf.mxu0 }
 0x60a   : > { %v2928_v17 = vadd.f32 %v2927_v11, %v2887_v9  ;;  %2997 = vmatmul.f32.gmra.mxu1 %v2958_v23  ;;  %3038 = vmatmul.f32.gmra.mxu2 %v2958_v23  ;;  %v3968_v9 = vld [vmem:[%s4934_s14 + $0x38] sm:$0xff] }
 0x60b   : > { %3079 = vmatmul.f32.gmra.mxu3 %v2958_v23  ;;  %3120 = vmatmul.f32.gmra.mxu0 %v2958_v23 }
 0x60c   : > { %v2943_v62 = vadd.f32 %v2928_v17, %v6900_v28 }
 0x60e   : > { %v2951_v49 = vadd.f32 %v2943_v62, %v6146_v10 }
 0x610   : > { %v2959_v52 = vmax.f32 %v2951_v49, 0.0 }
 0x611   : > { %v2930_v36 = vpop.f32.mrf.mxu0 }
 0x612   : > { %v2931_v33 = vadd.f32 %v2930_v36, %v2890_v24  ;;  %3000 = vmatmul.f32.gmra.mxu1 %v2959_v52  ;;  %3041 = vmatmul.f32.gmra.mxu2 %v2959_v52 }
 0x613   : > { %3082 = vmatmul.f32.gmra.mxu3 %v2959_v52  ;;  %3123 = vmatmul.f32.gmra.mxu0 %v2959_v52  ;;  %v3969_v52 = vld [vmem:[%s4934_s14 + $0x28] sm:$0xff] }
 0x614   : > { %v2944_v32 = vadd.f32 %v2931_v33, %v6904_v4 }
 0x616   : > { %v2952_v28 = vadd.f32 %v2944_v32, %v6154_v41 }
 0x618   : > { %v2960_v27 = vmax.f32 %v2952_v28, 0.0 }
 0x619   : > { %v2933_v26 = vpop.f32.mrf.mxu0 }
 0x61a   : > { %v2934_v10 = vadd.f32 %v2933_v26, %v2893_v58  ;;  %3003 = vmatmul.f32.gmra.mxu1 %v2960_v27  ;;  %3044 = vmatmul.f32.gmra.mxu2 %v2960_v27  ;;  %v3971_v58 = vld [vmem:[%s4934_s14 + $0x40] sm:$0xff] }
 0x61b   : > { %3085 = vmatmul.f32.gmra.mxu3 %v2960_v27  ;;  %3126 = vmatmul.f32.gmra.mxu0 %v2960_v27 }
 0x61c   : > { %v2945_v51 = vadd.f32 %v2934_v10, %v6908_v39  ;;  %v1067_v39 = vld [vmem:[#allocation18] sm:$0xf]  ;;  %v3972_v10 = vld [vmem:[%s4934_s14 + $0x58] sm:$0xff] }
 0x61d   : > { %v6250_v21 = vperm.slane %v1067_v39, 3  ;;  %v6255_v53 = vperm.slane %v1067_v39, 1  ;;  %v6258_v15 = vperm.slane %v1067_v39, 2 }
 0x61e   : > { %v2953_v4 = vadd.f32 %v2945_v51, %v6162_v1  ;;  %v6248_v1 = vperm.slane %v1067_v39, 0  ;;  %v3974_v39 = vld [vmem:[%s4934_s14 + $0x50] sm:$0xff] }
 0x620   : > { %v2961_v54 = vmax.f32 %v2953_v4, 0.0 }
 0x621   : > { %v2936_v45 = vpop.f32.mrf.mxu0 }
 0x622   : > { %v2937_v41 = vadd.f32 %v2936_v45, %v2896_v50  ;;  %3006 = vmatmul.f32.gmra.mxu1 %v2961_v54  ;;  %3047 = vmatmul.f32.gmra.mxu2 %v2961_v54 }
 0x623   : > { %3088 = vmatmul.f32.gmra.mxu3 %v2961_v54 }
 0x624   : > { %v2946_v6 = vadd.f32 %v2937_v41, %v6911_v12  ;;  %v3973_v41 = vld [vmem:[%s4934_s14 + $0x48] sm:$0xff] }
 0x626   : > { %v2954_v57 = vadd.f32 %v2946_v6, %v6168_v5  ;;  %v3963_v5 = vld [vmem:[%s4934_s14] sm:$0xff] }
 0x628   : > { %v2962_v34 = vmax.f32 %v2954_v57, 0.0 }
 0x62a   : > { %3009 = vmatmul.f32.gmra.mxu1 %v2962_v34  ;;  %3050 = vmatmul.f32.gmra.mxu2 %v2962_v34 }
 0x62b   : > { %3091 = vmatmul.f32.gmra.mxu3 %v2962_v34 }
 0x632   : > { %3129 = vmatmul.f32.vlgmr.msrb.gmra.mxu2 %v2961_v54 }
 0x63a   : > { %3132 = vmatmul.f32.gmra.mxu2 %v2962_v34 }
 0x66f   : > { %v2989_v43 = vpop.f32.mrf.mxu1 }
 0x670   : > { %v2990_v59 = vadd.f32 %v2989_v43, %v6248_v1  ;;  %v3112_v55 = vpop.f32.mrf.mxu0 }
 0x671   : > { %v3113_v12 = vadd.f32 %v3112_v55, %v6250_v21 }
 0x672   : > { %v3136_v25 = vadd.f32 %v3963_v5, %v2990_v59 }
 0x673   : > { %v3139_v44 = vadd.f32 %v3964_v46, %v3113_v12  ;;  %v3975_v12 = vld [vmem:[%s4934_s14 + $0x60] sm:$0xff]  ;;  %v3976_v46 = vld [vmem:[%s4934_s14 + $0x78] sm:$0xff] }
 0x674   : > { %v3168_v13 = vmax.f32 %v3136_v25, 0.0 }
 0x675   : > { %v3171_v63 = vmax.f32 %v3139_v44, 0.0  ;;  %v3030_v14 = vpop.f32.mrf.mxu2 }
 0x676   : > { %3200 = vst [vmem:[%s6261_s2] sm:$0xff] %v3168_v13  ;;  %v3031_v2 = vadd.f32 %v3030_v14, %v6255_v53  ;;  %v3071_v37 = vpop.f32.mrf.mxu3 }
 0x677   : > { %3203 = vst [vmem:[%s6261_s2 + $0x18] sm:$0xff] %v3171_v63  ;;  %v3072_v48 = vadd.f32 %v3071_v37, %v6258_v15  ;;  %v2992_v20 = vpop.f32.mrf.mxu1 }
 0x678   : > { %v3137_v19 = vadd.f32 %v3965_v7, %v3031_v2  ;;  %v2993_v31 = vadd.f32 %v2992_v20, %v6248_v1  ;;  %v3115_v35 = vpop.f32.mrf.mxu0  ;;  %v3977_v7 = vld [vmem:[%s4934_s14 + $0x68] sm:$0xff] }
 0x679   : > { %v3138_v8 = vadd.f32 %v3966_v30, %v3072_v48  ;;  %v3116_v42 = vadd.f32 %v3115_v35, %v6250_v21  ;;  %v3978_v30 = vld [vmem:[%s4934_s14 + $0x70] sm:$0xff] }
 0x67a   : > { %v3169_v0 = vmax.f32 %v3137_v19, 0.0  ;;  %v3140_v40 = vadd.f32 %v3967_v3, %v2993_v31  ;;  %v3979_v3 = vld [vmem:[%s4934_s14 + $0x80] sm:$0xff] }
 0x67b   : > { %v3170_v38 = vmax.f32 %v3138_v8, 0.0  ;;  %v3143_v23 = vadd.f32 %v3968_v9, %v3116_v42  ;;  %v3980_v9 = vld [vmem:[%s4934_s14 + $0x98] sm:$0xff] }
 0x67c   : > { %3201 = vst [vmem:[%s6261_s2 + $0x8] sm:$0xff] %v3169_v0  ;;  %v3172_v56 = vmax.f32 %v3140_v40, 0.0 }
 0x67d   : > { %3202 = vst [vmem:[%s6261_s2 + $0x10] sm:$0xff] %v3170_v38  ;;  %v3175_v11 = vmax.f32 %v3143_v23, 0.0  ;;  %v3033_v17 = vpop.f32.mrf.mxu2 }
 0x67e   : > { %3204 = vst [vmem:[%s6261_s2 + $0x20] sm:$0xff] %v3172_v56  ;;  %v3034_v62 = vadd.f32 %v3033_v17, %v6255_v53  ;;  %v3074_v29 = vpop.f32.mrf.mxu3 }
 0x67f   : > { %3207 = vst [vmem:[%s6261_s2 + $0x38] sm:$0xff] %v3175_v11  ;;  %v3075_v49 = vadd.f32 %v3074_v29, %v6258_v15  ;;  %v2995_v24 = vpop.f32.mrf.mxu1 }
 0x680   : > { %v3141_v60 = vadd.f32 %v3969_v52, %v3034_v62  ;;  %v2996_v36 = vadd.f32 %v2995_v24, %v6248_v1  ;;  %v3118_v33 = vpop.f32.mrf.mxu0  ;;  %v3981_v52 = vld [vmem:[%s4934_s14 + $0x88] sm:$0xff] }
 0x681   : > { %v3142_v32 = vadd.f32 %v3970_v22, %v3075_v49  ;;  %v3119_v61 = vadd.f32 %v3118_v33, %v6250_v21  ;;  %v3982_v22 = vld [vmem:[%s4934_s14 + $0x90] sm:$0xff] }
 0x682   : > { %v3173_v28 = vmax.f32 %v3141_v60, 0.0  ;;  %v3144_v27 = vadd.f32 %v3971_v58, %v2996_v36  ;;  %v3983_v58 = vld [vmem:[%s4934_s14 + $0xa0] sm:$0xff] }
 0x683   : > { %v3174_v26 = vmax.f32 %v3142_v32, 0.0  ;;  %v3147_v18 = vadd.f32 %v3972_v10, %v3119_v61  ;;  %v3984_v10 = vld [vmem:[%s4934_s14 + $0xb8] sm:$0xff] }
 0x684   : > { %3205 = vst [vmem:[%s6261_s2 + $0x28] sm:$0xff] %v3173_v28  ;;  %v3176_v51 = vmax.f32 %v3144_v27, 0.0 }
 0x685   : > { %3206 = vst [vmem:[%s6261_s2 + $0x30] sm:$0xff] %v3174_v26  ;;  %v3179_v47 = vmax.f32 %v3147_v18, 0.0  ;;  %v3036_v16 = vpop.f32.mrf.mxu2 }
 0x686   : > { %3208 = vst [vmem:[%s6261_s2 + $0x40] sm:$0xff] %v3176_v51  ;;  %v3037_v4 = vadd.f32 %v3036_v16, %v6255_v53  ;;  %v3077_v50 = vpop.f32.mrf.mxu3 }
 0x687   : > { %3211 = vst [vmem:[%s6261_s2 + $0x58] sm:$0xff] %v3179_v47  ;;  %v3078_v54 = vadd.f32 %v3077_v50, %v6258_v15  ;;  %v2998_v45 = vpop.f32.mrf.mxu1 }
 0x688   : > { %v3145_v6 = vadd.f32 %v3973_v41, %v3037_v4  ;;  %v2999_v57 = vadd.f32 %v2998_v45, %v6248_v1  ;;  %v3121_v34 = vpop.f32.mrf.mxu0  ;;  %v3985_v41 = vld [vmem:[%s4934_s14 + $0xa8] sm:$0xff] }
 0x689   : > { %v3146_v43 = vadd.f32 %v3974_v39, %v3078_v54  ;;  %v3122_v59 = vadd.f32 %v3121_v34, %v6250_v21  ;;  %v3986_v34 = vld [vmem:[%s4934_s14 + $0xb0] sm:$0xff] }
 0x68a   : > { %v3177_v55 = vmax.f32 %v3145_v6, 0.0  ;;  %v3148_v5 = vadd.f32 %v3975_v12, %v2999_v57 }
 0x68b   : > { %v3178_v25 = vmax.f32 %v3146_v43, 0.0  ;;  %v3151_v44 = vadd.f32 %v3976_v46, %v3122_v59  ;;  %v3987_v59 = vld [vmem:[%s4934_s14 + $0xc0] sm:$0xff] }
 0x68c   : > { %3209 = vst [vmem:[%s6261_s2 + $0x48] sm:$0xff] %v3177_v55  ;;  %v3180_v13 = vmax.f32 %v3148_v5, 0.0 }
 0x68d   : > { %3210 = vst [vmem:[%s6261_s2 + $0x50] sm:$0xff] %v3178_v25  ;;  %v3183_v63 = vmax.f32 %v3151_v44, 0.0  ;;  %v3039_v14 = vpop.f32.mrf.mxu2 }
 0x68e   : > { %3212 = vst [vmem:[%s6261_s2 + $0x60] sm:$0xff] %v3180_v13  ;;  %v3040_v2 = vadd.f32 %v3039_v14, %v6255_v53  ;;  %v3080_v37 = vpop.f32.mrf.mxu3  ;;  %v3988_v14 = vld [vmem:[%s4934_s14 + $0xc8] sm:$0xff] }
 0x68f   : > { %3215 = vst [vmem:[%s6261_s2 + $0x78] sm:$0xff] %v3183_v63  ;;  %v3081_v48 = vadd.f32 %v3080_v37, %v6258_v15  ;;  %v3001_v20 = vpop.f32.mrf.mxu1 }
 0x690   : > { %v3149_v19 = vadd.f32 %v3977_v7, %v3040_v2  ;;  %v3002_v31 = vadd.f32 %v3001_v20, %v6248_v1  ;;  %v3124_v35 = vpop.f32.mrf.mxu0 }
 0x691   : > { %v3150_v8 = vadd.f32 %v3978_v30, %v3081_v48  ;;  %v3125_v42 = vadd.f32 %v3124_v35, %v6250_v21  ;;  %v3989_v48 = vld [vmem:[%s4934_s14 + $0xd0] sm:$0xff] }
 0x692   : > { %v3181_v0 = vmax.f32 %v3149_v19, 0.0  ;;  %v3152_v40 = vadd.f32 %v3979_v3, %v3002_v31  ;;  %v3990_v19 = vld [vmem:[%s4934_s14 + $0xe0] sm:$0xff]  ;;  %v3991_v3 = vld [vmem:[%s4934_s14 + $0xe8] sm:$0xff] }
 0x693   : > { %v3182_v38 = vmax.f32 %v3150_v8, 0.0  ;;  %v3155_v23 = vadd.f32 %v3980_v9, %v3125_v42 }
 0x694   : > { %3213 = vst [vmem:[%s6261_s2 + $0x68] sm:$0xff] %v3181_v0  ;;  %v3184_v56 = vmax.f32 %v3152_v40, 0.0 }
 0x695   : > { %3214 = vst [vmem:[%s6261_s2 + $0x70] sm:$0xff] %v3182_v38  ;;  %v3187_v11 = vmax.f32 %v3155_v23, 0.0  ;;  %v3042_v17 = vpop.f32.mrf.mxu2  ;;  %v3992_v38 = vld [vmem:[%s4934_s14 + $0xf0] sm:$0xff] }
 0x696   : > { %3216 = vst [vmem:[%s6261_s2 + $0x80] sm:$0xff] %v3184_v56  ;;  %v3043_v62 = vadd.f32 %v3042_v17, %v6255_v53  ;;  %v3083_v29 = vpop.f32.mrf.mxu3  ;;  %v3993_v17 = vld [vmem:[%s4934_s14 + $0xd8] sm:$0xff] }
 0x697   : > { %3219 = vst [vmem:[%s6261_s2 + $0x98] sm:$0xff] %v3187_v11  ;;  %v3084_v49 = vadd.f32 %v3083_v29, %v6258_v15  ;;  %v3004_v24 = vpop.f32.mrf.mxu1 }
 0x698   : > { %v3153_v60 = vadd.f32 %v3981_v52, %v3043_v62  ;;  %v3005_v36 = vadd.f32 %v3004_v24, %v6248_v1  ;;  %v3127_v33 = vpop.f32.mrf.mxu0  ;;  %v3994_v24 = vld [vmem:[%s4934_s14 + $0xf8] sm:$0xff] }
 0x699   : > { %v3154_v32 = vadd.f32 %v3982_v22, %v3084_v49  ;;  %v3128_v61 = vadd.f32 %v3127_v33, %v6250_v21 }
 0x69a   : > { %v3185_v28 = vmax.f32 %v3153_v60, 0.0  ;;  %v3156_v27 = vadd.f32 %v3983_v58, %v3005_v36 }
 0x69b   : > { %v3186_v26 = vmax.f32 %v3154_v32, 0.0  ;;  %v3159_v18 = vadd.f32 %v3984_v10, %v3128_v61 }
 0x69c   : > { %3217 = vst [vmem:[%s6261_s2 + $0x88] sm:$0xff] %v3185_v28  ;;  %v3188_v51 = vmax.f32 %v3156_v27, 0.0 }
 0x69d   : > { %3218 = vst [vmem:[%s6261_s2 + $0x90] sm:$0xff] %v3186_v26  ;;  %v3191_v47 = vmax.f32 %v3159_v18, 0.0  ;;  %v3045_v16 = vpop.f32.mrf.mxu2 }
 0x69e   : > { %3220 = vst [vmem:[%s6261_s2 + $0xa0] sm:$0xff] %v3188_v51  ;;  %v3046_v4 = vadd.f32 %v3045_v16, %v6255_v53  ;;  %v3086_v50 = vpop.f32.mrf.mxu3 }
 0x69f   : > { %3223 = vst [vmem:[%s6261_s2 + $0xb8] sm:$0xff] %v3191_v47  ;;  %v3087_v54 = vadd.f32 %v3086_v50, %v6258_v15  ;;  %v3007_v45 = vpop.f32.mrf.mxu1 }
 0x6a0   : > { %v3157_v6 = vadd.f32 %v3985_v41, %v3046_v4  ;;  %v3008_v57 = vadd.f32 %v3007_v45, %v6248_v1 }
 0x6a1   : > { %v3158_v39 = vadd.f32 %v3986_v34, %v3087_v54 }
 0x6a2   : > { %v3189_v43 = vmax.f32 %v3157_v6, 0.0  ;;  %v3160_v55 = vadd.f32 %v3987_v59, %v3008_v57 }
 0x6a3   : > { %v3190_v12 = vmax.f32 %v3158_v39, 0.0 }
 0x6a4   : > { %3221 = vst [vmem:[%s6261_s2 + $0xa8] sm:$0xff] %v3189_v43  ;;  %v3192_v5 = vmax.f32 %v3160_v55, 0.0 }
 0x6a5   : > { %3222 = vst [vmem:[%s6261_s2 + $0xb0] sm:$0xff] %v3190_v12  ;;  %v3048_v25 = vpop.f32.mrf.mxu2 }
 0x6a6   : > { %3224 = vst [vmem:[%s6261_s2 + $0xc0] sm:$0xff] %v3192_v5  ;;  %v3049_v46 = vadd.f32 %v3048_v25, %v6255_v53  ;;  %v3089_v44 = vpop.f32.mrf.mxu3 }
 0x6a7   : > { %v3090_v13 = vadd.f32 %v3089_v44, %v6258_v15  ;;  %v3010_v63 = vpop.f32.mrf.mxu1 }
 0x6a8   : > { %v3161_v2 = vadd.f32 %v3988_v14, %v3049_v46  ;;  %v3011_v37 = vadd.f32 %v3010_v63, %v6248_v1 }
 0x6a9   : > { %v3162_v20 = vadd.f32 %v3989_v48, %v3090_v13 }
 0x6aa   : > { %v3193_v7 = vmax.f32 %v3161_v2, 0.0  ;;  %v3164_v31 = vadd.f32 %v3990_v19, %v3011_v37 }
 0x6ab   : > { %v3194_v35 = vmax.f32 %v3162_v20, 0.0 }
 0x6ac   : > { %3225 = vst [vmem:[%s6261_s2 + $0xc8] sm:$0xff] %v3193_v7  ;;  %v3196_v30 = vmax.f32 %v3164_v31, 0.0 }
 0x6ad   : > { %3226 = vst [vmem:[%s6261_s2 + $0xd0] sm:$0xff] %v3194_v35  ;;  %v3051_v8 = vpop.f32.mrf.mxu2 }
 0x6ae   : > { %3228 = vst [vmem:[%s6261_s2 + $0xe0] sm:$0xff] %v3196_v30  ;;  %v3052_v42 = vadd.f32 %v3051_v8, %v6255_v53  ;;  %v3092_v1 = vpop.f32.mrf.mxu3 }
 0x6af   : > { %v3093_v0 = vadd.f32 %v3092_v1, %v6258_v15 }
 0x6b0   : > { %v3165_v40 = vadd.f32 %v3991_v3, %v3052_v42 }
 0x6b1   : > { %v3166_v9 = vadd.f32 %v3992_v38, %v3093_v0 }
 0x6b2   : > { %v3197_v23 = vmax.f32 %v3165_v40, 0.0 }
 0x6b3   : > { %v3198_v56 = vmax.f32 %v3166_v9, 0.0 }
 0x6b4   : > { %3229 = vst [vmem:[%s6261_s2 + $0xe8] sm:$0xff] %v3197_v23 }
 0x6b5   : > { %3230 = vst [vmem:[%s6261_s2 + $0xf0] sm:$0xff] %v3198_v56  ;;  %v3130_v11 = vpop.f32.mrf.mxu2 }
 0x6b6   : > { %v3131_v53 = vadd.f32 %v3130_v11, %v6250_v21 }
 0x6b8   : > { %v3163_v15 = vadd.f32 %v3993_v17, %v3131_v53 }
 0x6ba   : > { %v3195_v62 = vmax.f32 %v3163_v15, 0.0 }
 0x6bc   : > { %3227 = vst [vmem:[%s6261_s2 + $0xd8] sm:$0xff] %v3195_v62 }
 0x6bd   : > { %v3133_v29 = vpop.f32.mrf.mxu2 }
 0x6be   : > { %v3134_v49 = vadd.f32 %v3133_v29, %v6250_v21 }
 0x6c0   : > { %v3167_v52 = vadd.f32 %v3994_v24, %v3134_v49 }
 0x6c2   : > { %v3199_v60 = vmax.f32 %v3167_v52, 0.0 }
 0x6c4   : > { %3231 = vst [vmem:[%s6261_s2 + $0xf8] sm:$0xff] %v3199_v60 }
 0x6c5   : > { %4382 = shalt.err (!%p4379_p6)
}
 0x6c6   : > { %s4546_s6 = smov 512   ;;  %s4547_s28 = smov 32  }
 0x6c7   : > { %3597 = dma.vmem_to_hbm [thread:$0]  (%p4778_p0), %s3248_s17, 4096, %s3250_s20, %s3233_s29, %s4546_s6, %s4546_s6, %s4547_s28  }
 0x6c8 PF: > { %s6916_s2 = sld [smem:[#allocation36_spill]]  ;;  %p3660_p10 = scmp.ge.s32.totalorder %s4529_s16, 2 }
 0x6ca   : > { %p3638_p11 = pnand %p3660_p10, %p4788_p9 }
 0x6cc   : > { %p3639_p7 = pneg %p3638_p11 }
 0x6ce   : > { %s3264_s18 = sand.u32 1, %s6916_s2  }
 0x6cf   : > { %s3265_s21 = scalar_lea.sflag [#allocation5], %s3264_s18 }
 0x6d0   : > { %4472 = dma.done.wait (%p3639_p7), %s3265_s21, 4096  }
 0x6d1   : > { %4474 = vsyncadd (%p3639_p7), %s3265_s21, 4294963200  ;;  %s39_s16 = sadd.s32 1, %s4529_s16   ;;  %s6919_s18 = sld [smem:[#allocation34_spill]] }
 0x6d2   : > { %p6378_p1 = scmp.ge.s32.totalorder %s39_s16, 10   ;;  %s6920_s19 = sld [smem:[#allocation35_spill]] }
 0x6d3   : > { %s6921_s21 = sld [smem:[#allocation37_spill]]  ;;  %s6927_s20 = smov %s6947_s7 }
 0x6d4   : > { %s6922_s30 = sld [smem:[#allocation51_spill]]  ;;  %s6928_s22 = smov %s4497_s23 }
 0x6d5   : > { %s6923_s27 = sld [smem:[#allocation41_spill]]  ;;  %s6929_s23 = smov %s4797_s12 }
 0x6d6   : > { %s6924_s28 = sld [smem:[#allocation42_spill]]  ;;  %s6930_s24 = smov %s4505_s25 }
 0x6d7   : > { %s6925_s29 = sld [smem:[#allocation46_spill]]  ;;  %s6931_s25 = smov %s4509_s26 }
 0x6d8   : > { %s6926_s11 = sld [smem:[#allocation47_spill]] }
 0x6da   : > { %s6932_s26 = smov %s6922_s30  ;;  %38 = sbr.rel (!%p6378_p1) target bundleno = 34 (0x22), region = 185 }
 0x6de   : > { %s6933_s30 = smov %s6926_s11 }
 0x6df   :  { %3271 = vsyncpa [#allocation4], 1 }
 0x6e0   :  { %3273 = vsyncpa [#allocation4 + $0x1], 1 }
 0x6e1   :  { %3274 = vsyncpa [#allocation7], 1 }
 0x6e2   :  { %3276 = vsyncpa [#allocation7 + $0x1], 1 }
 0x6e3   :  { %3277 = vsyncpa [#allocation10], 1 }
 0x6e4   :  { %3278 = vsyncpa [#allocation13], 1 }
 0x6e5   :  { %3279 = vsyncpa [#allocation16], 1 }
 0x6e6   :  { %3280 = vsyncpa [#allocation19], 1 }
 0x6e7   :  { %3281 = vsyncpa [#allocation22], 1 }
 0x6e8   :  { %3282 = vsyncpa [#allocation5], 1 }
 0x6e9   :  { %3284 = vsyncpa [#allocation5 + $0x1], 1 }

</bundles_post_ra>
